<compile_context>
chip_gen: v7x
topology: tpu7x:2x2x1
jax: 0.10.0
libtpu: 0.0.40
codegen_flags: <defaults>
</compile_context>

<pallas_src>
import functools

import jax
import jax.numpy as jnp
import numpy as np
from jax import lax
from jax.experimental import pallas as pl
from jax.experimental.pallas import tpu as pltpu

BN_EPS = 1e-5
KSIZE = 15            # kernel size of every Conv1d in the block
_OFF_D1 = 16          # data-row offset inside the d=1 padded conv buffers (conv1, conv2)
_OFF_D4 = 32          # d=4 buffer (conv3)
_OFF_D8 = 64          # d=8 buffer (conv4)
_VMEM_LIMIT = 32 * 1024 * 1024


def _group_factor(c):
    """How many conv taps to pack along the MXU contraction axis (target K ~ 128 lanes)."""
    return min(16, max(1, 128 // c))


def _pad_rows(off, d, c, L):
    """Rows needed by the tap-grouped padded buffer of a k=15 / dilation-d 'same' conv."""
    G = _group_factor(c)
    NG = -(-KSIZE // G)
    maxr = off - 7 * d + (NG - 1) * G * d + L
    return ((maxr + 7) // 8) * 8


# ----------------------------------------------------------------------------
# Kernel 1: CBN1 -> PReLU -> phase-packed transposed convs (first_stack + residual1)
# ----------------------------------------------------------------------------
def _upsample_kernel(u, x_ref, s1_ref, t1_ref, a1_ref, wu1_ref, bu1_ref,
                     wur_ref, bur_ref, up1_ref, resup_ref, xpad_ref):
    L, C = x_ref.shape[1], x_ref.shape[2]
    p = u // 2
    width = 2 * C

    # zero the two halo rows (every step -> megacore-safe; data rows are fully rewritten)
    zrow = jnp.zeros((1, width), jnp.bfloat16)
    xpad_ref[pl.ds(0, 1), :] = zrow
    xpad_ref[pl.ds(L, 1), :] = zrow

    x = x_ref[0]                                           # (L, C_in) f32
    h = x * s1_ref[0] + t1_ref[0]                          # CBN1 (folded, inference stats)
    h = jnp.where(h >= 0.0, h, a1_ref[...] * h)            # PReLU 1 (scalar alpha)

    def run_upsample(v, w_ref, b_ref, out_ref):
        vb = v.astype(jnp.bfloat16)
        xpad_ref[pl.ds(0, L), pl.ds(0, C)] = vb            # slab half 1: v[t]
        xpad_ref[pl.ds(1, L), pl.ds(C, C)] = vb            # slab half 2: v[t-1] (fwd-shifted copy)
        phases = []
        for r in range(u):
            row0 = 0 if r < p else 1                       # r >= p phases read [v[t+1] | v[t]]
            slab = xpad_ref[pl.ds(row0, L), :]             # (L, 2*C_in) bf16
            acc = jnp.dot(slab, w_ref[r], preferred_element_type=jnp.float32)
            phases.append((acc + b_ref[...]).astype(jnp.bfloat16))
        out_ref[0] = jnp.concatenate(phases, axis=-1)      # lane-dense (L, u*C_in) store

    run_upsample(h, wu1_ref, bu1_ref, up1_ref)             # first_stack UpsampleNet
    run_upsample(x, wur_ref, bur_ref, resup_ref)           # residual1 UpsampleNet (raw input)


# ----------------------------------------------------------------------------
# Kernel 2: the four conv stacks + residual path, fully fused (one grid step per batch)
# ----------------------------------------------------------------------------
def _decoder_main_kernel(up1_ref, resup_ref, w1_ref, w2_ref, w3_ref, w4_ref, wres_ref,
                         s2_ref, t2_ref, s3_ref, t3_ref, s4_ref, t4_ref,
                         resb_ref, b4_ref, a2_ref, a3_ref, a4_ref,
                         out_ref, pad1_ref, pad2_ref, pad3_ref, pad4_ref):
    L = up1_ref.shape[1]

    def conv15(pad_ref, w_ref, off, d, val):
        """k=15 'same' conv; taps packed in groups of G along the contraction axis."""
        C = val.shape[-1]
        NG, GC, _ = w_ref.shape
        G = GC // C
        width = pad_ref.shape[1]
        start = off - 7 * d
        # halo-only zeroing (done every grid step; covers every row a real tap can read)
        pad_ref[pl.ds(start, 7 * d), :] = jnp.zeros((7 * d, width), jnp.bfloat16)
        post_start = off + L - (G - 1) * d
        post_len = (NG * G - 8) * d
        pad_ref[pl.ds(post_start, post_len), :] = jnp.zeros((post_len, width), jnp.bfloat16)
        # channel slice j holds the input shifted by j*d rows -> group g is one K=G*C matmul
        for j in range(G):
            pad_ref[pl.ds(off - j * d, L), pl.ds(j * C, C)] = val
        acc = jnp.dot(pad_ref[pl.ds(start, L), :], w_ref[0],
                      preferred_element_type=jnp.float32)
        for g in range(1, NG):
            acc = acc + jnp.dot(pad_ref[pl.ds(start + g * G * d, L), :], w_ref[g],
                                preferred_element_type=jnp.float32)
        return acc

    def prelu(v, a_ref):
        return jnp.where(v >= 0.0, v, a_ref[...] * v)

    # first_stack conv: Conv1d(C_in, C_out, k=15, p=7); its bias is folded into t2
    h = conv15(pad1_ref, w1_ref, _OFF_D1, 1, up1_ref[0])              # up1 already bf16
    h = prelu(h * s2_ref[0] + t2_ref[0], a2_ref)                      # CBN2 + PReLU

    # second_stack conv: Conv1d(C_out, C_out, k=15, p=7); bias folded into res bias
    c2 = conv15(pad2_ref, w2_ref, _OFF_D1, 1, h.astype(jnp.bfloat16))

    # residual1: 1x1 conv on the upsampled raw input, then sum
    res = jnp.dot(resup_ref[0], wres_ref[...], preferred_element_type=jnp.float32)
    residual = res + c2 + resb_ref[...]

    # third_stack: CBN3 -> PReLU -> Conv1d(k=15, dilation=4, p=28); bias folded into t4
    h = prelu(residual * s3_ref[0] + t3_ref[0], a3_ref)
    h = conv15(pad3_ref, w3_ref, _OFF_D4, 4, h.astype(jnp.bfloat16))

    # fourth_stack: CBN4 -> PReLU -> Conv1d(k=15, dilation=8, p=56)
    h = prelu(h * s4_ref[0] + t4_ref[0], a4_ref)
    h = conv15(pad4_ref, w4_ref, _OFF_D8, 8, h.astype(jnp.bfloat16)) + b4_ref[...]

    out_ref[0] = (h + residual).astype(out_ref.dtype)


# ----------------------------------------------------------------------------
# Host-side weight packing / CBN folding
# ----------------------------------------------------------------------------
def _pack_conv_weight(w):
    """(C_out, C_in, 15) torch Conv1d weight -> (NG, G*C_in, C_out) bf16, taps grouped."""
    c_out, c_in, k = w.shape
    G = _group_factor(c_in)
    NG = -(-k // G)
    wt = jnp.transpose(w, (2, 1, 0))                        # (K, C_in, C_out)
    if NG * G != k:
        wt = jnp.concatenate([wt, jnp.zeros((NG * G - k, c_in, c_out), wt.dtype)], axis=0)
    return wt.reshape(NG, G * c_in, c_out).astype(jnp.bfloat16)


def _pack_upsample_weight(w, u):
    """(C, C, 2u) torch ConvTranspose1d weight -> (u, 2*C, C) bf16, one packed matrix per phase."""
    p = u // 2
    wt = jnp.transpose(w, (2, 0, 1))                        # (2u, C_in, C_out); wt[k] = W[:, :, k]
    packs = []
    for r in range(u):
        if r < p:        # this phase reads the slab [v[t] | v[t-1]]
            packs.append(jnp.concatenate([wt[r + p], wt[r + p + u]], axis=0))
        else:            # this phase reads the slab [v[t+1] | v[t]]
            packs.append(jnp.concatenate([wt[r + p - u], wt[r + p]], axis=0))
    return jnp.stack(packs, axis=0).astype(jnp.bfloat16)


def _fold_cbn(cbn, cond):
    """BN running stats + affine + condition gamma/beta -> per-(batch, channel) scale/shift."""
    s = cbn["bn_w"] / jnp.sqrt(cbn["bn_var"] + BN_EPS)
    sh = cbn["bn_b"] - cbn["bn_mean"] * s
    gamma = cond @ cbn["wg"] + cbn["bg"]                    # (B, C)
    beta = cond @ cbn["wb"] + cbn["bb"]                     # (B, C)
    return (gamma * s[None, :])[:, None, :], (gamma * sh[None, :] + beta)[:, None, :]


def prepare_params(params, *, u):
    """Condition-independent preprocessing (packing / bf16 casts), hoisted out of the
    per-call path; only the cond-dependent CBN folds remain per forward call."""
    assert u >= 2 and u % 2 == 0, "only even upsample factors supported"  # TODO(synk): odd u
    prep = dict(params)   # keep CBN dicts / biases / alphas for the per-call folds
    prep.update(
        wu1=_pack_upsample_weight(params["up1_w"], u),
        wur=_pack_upsample_weight(params["upr_w"], u),
        bu1=params["up1_b"][None, :].astype(jnp.float32),
        bur=params["upr_b"][None, :].astype(jnp.float32),
        w1=_pack_conv_weight(params["conv1_w"]),
        w2=_pack_conv_weight(params["conv2_w"]),
        w3=_pack_conv_weight(params["conv3_w"]),
        w4=_pack_conv_weight(params["conv4_w"]),
        wres=jnp.transpose(params["resconv_w"][:, :, 0], (1, 0)).astype(jnp.bfloat16),
    )
    return prep


# ----------------------------------------------------------------------------
# Host wrapper
# ----------------------------------------------------------------------------
def decoder_block_forward(x_ncl, cond, prep, *, u):
    """x_ncl: (B, C_in, L), cond: (B, cond_len) -> (B, C_out, L*u)  (inference-mode BN)."""
    B, C_in, L = x_ncl.shape
    C_out = prep["w1"].shape[-1]
    L_up = L * u
    bf16 = jnp.bfloat16

    x = jnp.transpose(x_ncl, (0, 2, 1)).astype(jnp.float32)   # channels-last (B, L, C_in)

    # per-call (condition-dependent) CBN folds; exactly-foldable conv biases folded too
    s1, t1 = _fold_cbn(prep["cbn1"], cond)
    s2, t2 = _fold_cbn(prep["cbn2"], cond)
    s3, t3 = _fold_cbn(prep["cbn3"], cond)
    s4, t4 = _fold_cbn(prep["cbn4"], cond)
    t2 = t2 + s2 * prep["conv1_b"][None, None, :]              # conv1 bias -> CBN2 shift
    t4 = t4 + s4 * prep["conv3_b"][None, None, :]              # conv3 bias -> CBN4 shift
    resb = (prep["resconv_b"] + prep["conv2_b"])[None, :]
    b4 = prep["conv4_b"][None, :]

    a1 = jnp.reshape(prep["alpha1"], (1, 1)).astype(jnp.float32)
    a2 = jnp.reshape(prep["alpha2"], (1, 1)).astype(jnp.float32)
    a3 = jnp.reshape(prep["alpha3"], (1, 1)).astype(jnp.float32)
    a4 = jnp.reshape(prep["alpha4"], (1, 1)).astype(jnp.float32)

    wu1, wur, bu1, bur = prep["wu1"], prep["wur"], prep["bu1"], prep["bur"]
    w1, w2, w3, w4, wres = prep["w1"], prep["w2"], prep["w3"], prep["w4"], prep["wres"]

    cparams = pltpu.CompilerParams(dimension_semantics=("parallel",),
                                   vmem_limit_bytes=_VMEM_LIMIT)

    # kernel 1: CBN1 -> PReLU -> phase-packed transposed convs; lane-dense (1, L, u*C_in) outputs
    up1_p, resup_p = pl.pallas_call(
        functools.partial(_upsample_kernel, u),
        out_shape=(jax.ShapeDtypeStruct((B, L, u * C_in), bf16),
                   jax.ShapeDtypeStruct((B, L, u * C_in), bf16)),
        grid_spec=pltpu.PrefetchScalarGridSpec(
            num_scalar_prefetch=0,
            grid=(B,),
            in_specs=[
                pl.BlockSpec((1, L, C_in), lambda b: (b, 0, 0)),          # x
                pl.BlockSpec((1, 1, C_in), lambda b: (b, 0, 0)),          # s1
                pl.BlockSpec((1, 1, C_in), lambda b: (b, 0, 0)),          # t1
                pl.BlockSpec((1, 1), lambda b: (0, 0)),                   # alpha1
                pl.BlockSpec((u, 2 * C_in, C_in), lambda b: (0, 0, 0)),   # wu1 (packed)
                pl.BlockSpec((1, C_in), lambda b: (0, 0)),                # bu1
                pl.BlockSpec((u, 2 * C_in, C_in), lambda b: (0, 0, 0)),   # wur (packed)
                pl.BlockSpec((1, C_in), lambda b: (0, 0)),                # bur
            ],
            out_specs=(
                pl.BlockSpec((1, L, u * C_in), lambda b: (b, 0, 0)),
                pl.BlockSpec((1, L, u * C_in), lambda b: (b, 0, 0)),
            ),
            scratch_shapes=[pltpu.VMEM((L + 8, 2 * C_in), jnp.bfloat16)],
        ),
        compiler_params=cparams,
    )(x, s1, t1, a1, wu1, bu1, wur, bur)

    # phase interleave: with phases lane-concatenated this is a pure row-major reshape
    up1 = up1_p.reshape(B, L_up, C_in)
    resup = resup_p.reshape(B, L_up, C_in)

    # kernel 2: the rest of the block, fully fused
    out = pl.pallas_call(
        _decoder_main_kernel,
        out_shape=jax.ShapeDtypeStruct((B, L_up, C_out), jnp.float32),
        grid_spec=pltpu.PrefetchScalarGridSpec(
            num_scalar_prefetch=0,
            grid=(B,),
            in_specs=[
                pl.BlockSpec((1, L_up, C_in), lambda b: (b, 0, 0)),       # up1
                pl.BlockSpec((1, L_up, C_in), lambda b: (b, 0, 0)),       # resup
                pl.BlockSpec(w1.shape, lambda b: (0, 0, 0)),              # w1 (tap-grouped)
                pl.BlockSpec(w2.shape, lambda b: (0, 0, 0)),              # w2
                pl.BlockSpec(w3.shape, lambda b: (0, 0, 0)),              # w3
                pl.BlockSpec(w4.shape, lambda b: (0, 0, 0)),              # w4
                pl.BlockSpec((C_in, C_out), lambda b: (0, 0)),            # wres (1x1)
                pl.BlockSpec((1, 1, C_out), lambda b: (b, 0, 0)),         # s2
                pl.BlockSpec((1, 1, C_out), lambda b: (b, 0, 0)),         # t2
                pl.BlockSpec((1, 1, C_out), lambda b: (b, 0, 0)),         # s3
                pl.BlockSpec((1, 1, C_out), lambda b: (b, 0, 0)),         # t3
                pl.BlockSpec((1, 1, C_out), lambda b: (b, 0, 0)),         # s4
                pl.BlockSpec((1, 1, C_out), lambda b: (b, 0, 0)),         # t4
                pl.BlockSpec((1, C_out), lambda b: (0, 0)),               # res bias
                pl.BlockSpec((1, C_out), lambda b: (0, 0)),               # conv4 bias
                pl.BlockSpec((1, 1), lambda b: (0, 0)),                   # alpha2
                pl.BlockSpec((1, 1), lambda b: (0, 0)),                   # alpha3
                pl.BlockSpec((1, 1), lambda b: (0, 0)),                   # alpha4
            ],
            out_specs=pl.BlockSpec((1, L_up, C_out), lambda b: (b, 0, 0)),
            scratch_shapes=[
                pltpu.VMEM((_pad_rows(_OFF_D1, 1, C_in, L_up),
                            _group_factor(C_in) * C_in), jnp.bfloat16),   # conv1 pad
                pltpu.VMEM((_pad_rows(_OFF_D1, 1, C_out, L_up),
                            _group_factor(C_out) * C_out), jnp.bfloat16), # conv2 pad
                pltpu.VMEM((_pad_rows(_OFF_D4, 4, C_out, L_up),
                            _group_factor(C_out) * C_out), jnp.bfloat16), # conv3 pad (d=4)
                pltpu.VMEM((_pad_rows(_OFF_D8, 8, C_out, L_up),
                            _group_factor(C_out) * C_out), jnp.bfloat16), # conv4 pad (d=8)
            ],
        ),
        compiler_params=cparams,
    )(up1, resup, w1, w2, w3, w4, wres, s2, t2, s3, t3, s4, t4, resb, b4, a2, a3, a4)

    return jnp.transpose(out, (0, 2, 1))                      # back to NCL (B, C_out, L*u)


# ----------------------------------------------------------------------------
# Deterministic parameter init (shapes mirror DecoderBlock.__init__)
# ----------------------------------------------------------------------------
def init_params(key, c_in, c_out, u, cond_len):
    class KG:
        def __init__(self, k): self.k = k
        def __call__(self):
            self.k, sub = jax.random.split(self.k)
            return sub
    kg = KG(key)

    def cbn(c):
        return dict(
            bn_w=1.0 + 0.1 * jax.random.normal(kg(), (c,), jnp.float32),
            bn_b=0.1 * jax.random.normal(kg(), (c,), jnp.float32),
            bn_mean=0.1 * jax.random.normal(kg(), (c,), jnp.float32),
            bn_var=0.5 + jax.random.uniform(kg(), (c,), jnp.float32),
            wg=(0.3 / np.sqrt(cond_len)) * jax.random.normal(kg(), (cond_len, c), jnp.float32),
            bg=1.0 + 0.05 * jax.random.normal(kg(), (c,), jnp.float32),
            wb=(0.3 / np.sqrt(cond_len)) * jax.random.normal(kg(), (cond_len, c), jnp.float32),
            bb=0.05 * jax.random.normal(kg(), (c,), jnp.float32),
        )

    k2 = 2 * u
    return dict(
        cbn1=cbn(c_in), cbn2=cbn(c_out), cbn3=cbn(c_out), cbn4=cbn(c_out),
        up1_w=jax.random.normal(kg(), (c_in, c_in, k2), jnp.float32) / np.sqrt(c_in * k2),
        up1_b=0.1 * jax.random.normal(kg(), (c_in,), jnp.float32),
        upr_w=jax.random.normal(kg(), (c_in, c_in, k2), jnp.float32) / np.sqrt(c_in * k2),
        upr_b=0.1 * jax.random.normal(kg(), (c_in,), jnp.float32),
        conv1_w=jax.random.normal(kg(), (c_out, c_in, KSIZE), jnp.float32) / np.sqrt(c_in * KSIZE),
        conv1_b=0.1 * jax.random.normal(kg(), (c_out,), jnp.float32),
        conv2_w=jax.random.normal(kg(), (c_out, c_out, KSIZE), jnp.float32) / np.sqrt(c_out * KSIZE),
        conv2_b=0.1 * jax.random.normal(kg(), (c_out,), jnp.float32),
        resconv_w=jax.random.normal(kg(), (c_out, c_in, 1), jnp.float32) / np.sqrt(c_in),
        resconv_b=0.1 * jax.random.normal(kg(), (c_out,), jnp.float32),
        conv3_w=jax.random.normal(kg(), (c_out, c_out, KSIZE), jnp.float32) / np.sqrt(c_out * KSIZE),
        conv3_b=0.1 * jax.random.normal(kg(), (c_out,), jnp.float32),
        conv4_w=jax.random.normal(kg(), (c_out, c_out, KSIZE), jnp.float32) / np.sqrt(c_out * KSIZE),
        conv4_b=0.1 * jax.random.normal(kg(), (c_out,), jnp.float32),
        alpha1=jnp.asarray(0.25, jnp.float32), alpha2=jnp.asarray(0.25, jnp.float32),
        alpha3=jnp.asarray(0.25, jnp.float32), alpha4=jnp.asarray(0.25, jnp.float32),
    )


# ----------------------------------------------------------------------------
# Pure-JAX reference (NCL layout, mirrors the PyTorch forward; same bf16-operand /
# f32-accumulation policy as the kernels so the comparison is tight)
# ----------------------------------------------------------------------------
def reference_forward(x_ncl, cond, params, *, u):
    p = u // 2
    bf16 = jnp.bfloat16

    def cbn(x, cp):
        s = cp["bn_w"] / jnp.sqrt(cp["bn_var"] + BN_EPS)
        sh = cp["bn_b"] - cp["bn_mean"] * s
        xn = x * s[None, :, None] + sh[None, :, None]
        gamma = cond @ cp["wg"] + cp["bg"]
        beta = cond @ cp["wb"] + cp["bb"]
        return gamma[:, :, None] * xn + beta[:, :, None]

    def prelu(x, a):
        return jnp.where(x >= 0.0, x, a * x)

    def conv1d(x, w, b, dil, pad):                    # w: (C_out, C_in, K) torch layout
        y = lax.conv_general_dilated(
            x.astype(bf16), w.astype(bf16), (1,), [(pad, pad)], rhs_dilation=(dil,),
            dimension_numbers=("NCH", "OIH", "NCH"), preferred_element_type=jnp.float32)
        return y + b[None, :, None]

    def upsample(x, w, b):                            # w: (C_in, C_out, 2u) torch layout
        K = w.shape[2]
        wf = jnp.flip(jnp.transpose(w, (1, 0, 2)), axis=2)
        y = lax.conv_general_dilated(
            x.astype(bf16), wf.astype(bf16), (1,), [(K - 1 - p, K - 1 - p)],
            lhs_dilation=(u,), dimension_numbers=("NCH", "OIH", "NCH"),
            preferred_element_type=jnp.float32)
        y = y + b[None, :, None]
        return y[:, :, : x.shape[2] * u]

    inputs = x_ncl
    h = prelu(cbn(inputs, params["cbn1"]), params["alpha1"])
    h = upsample(h, params["up1_w"], params["up1_b"])
    h = conv1d(h, params["conv1_w"], params["conv1_b"], 1, 7)
    h = prelu(cbn(h, params["cbn2"]), params["alpha2"])
    h = conv1d(h, params["conv2_w"], params["conv2_b"], 1, 7)
    r = upsample(inputs, params["upr_w"], params["upr_b"])
    r = conv1d(r, params["resconv_w"], params["resconv_b"], 1, 0)
    residual = r + h
    h = prelu(cbn(residual, params["cbn3"]), params["alpha3"])
    h = conv1d(h, params["conv3_w"], params["conv3_b"], 4, 28)
    h = prelu(cbn(h, params["cbn4"]), params["alpha4"])
    h = conv1d(h, params["conv4_w"], params["conv4_b"], 8, 56)
    return h + residual


if __name__ == "__main__":
    key = jax.random.PRNGKey(0)
    k_x, k_c, k_p = jax.random.split(key, 3)
    B, C_IN, C_OUT, L, U, COND = 2, 64, 32, 16, 2, 8

    x = jax.random.normal(k_x, (B, C_IN, L), jnp.float32)        # enc_out, NCL as in torch
    cond = jax.random.normal(k_c, (B, COND), jnp.float32)        # condition
    params = init_params(k_p, C_IN, C_OUT, U, COND)
    prep = prepare_params(params, u=U)                           # weight packing, hoisted

    fwd = jax.jit(functools.partial(decoder_block_forward, u=U))
    out = jax.block_until_ready(fwd(x, cond, prep))
    assert out.shape == (B, C_OUT, L * U), out.shape

    ref = jax.block_until_ready(reference_forward(x, cond, params, u=U))
    np.testing.assert_allclose(np.asarray(out), np.asarray(ref), rtol=3e-3, atol=3e-3)

    print("KERNEL_OK")
</pallas_src>

<mosaic_0001>
module attributes {stable_mosaic.version = 11 : i64} {
  func.func @_upsample_kernel(%arg0: i32, %arg1: memref<1x16x64xf32, #tpu.memory_space<vmem>>, %arg2: memref<1x1x64xf32, #tpu.memory_space<vmem>>, %arg3: memref<1x1x64xf32, #tpu.memory_space<vmem>>, %arg4: memref<1x1xf32, #tpu.memory_space<vmem>>, %arg5: memref<2x128x64xbf16, #tpu.memory_space<vmem>>, %arg6: memref<1x64xf32, #tpu.memory_space<vmem>>, %arg7: memref<2x128x64xbf16, #tpu.memory_space<vmem>>, %arg8: memref<1x64xf32, #tpu.memory_space<vmem>>, %arg9: memref<1x16x128xbf16, #tpu.memory_space<vmem>>, %arg10: memref<1x16x128xbf16, #tpu.memory_space<vmem>>, %arg11: memref<24x128xbf16, #tpu.memory_space<vmem>>) attributes {dimension_semantics = [#tpu.dimension_semantics<parallel>], iteration_bounds = array<i64: 2>, scalar_prefetch = 0 : i64, scratch_operands = 1 : i64, tpu.core_type = #tpu.core_type<tc>, window_params = [{transform_indices = @transform_0, window_bounds = array<i64: 1, 16, 64>}, {transform_indices = @transform_1, window_bounds = array<i64: 1, 1, 64>}, {transform_indices = @transform_2, window_bounds = array<i64: 1, 1, 64>}, {pipeline_mode = #tpu.pipeline_mode<synchronous>, transform_indices = @transform_3, window_bounds = array<i64: 1, 1>}, {pipeline_mode = #tpu.pipeline_mode<synchronous>, transform_indices = @transform_4, window_bounds = array<i64: 2, 128, 64>}, {pipeline_mode = #tpu.pipeline_mode<synchronous>, transform_indices = @transform_5, window_bounds = array<i64: 1, 64>}, {pipeline_mode = #tpu.pipeline_mode<synchronous>, transform_indices = @transform_6, window_bounds = array<i64: 2, 128, 64>}, {pipeline_mode = #tpu.pipeline_mode<synchronous>, transform_indices = @transform_7, window_bounds = array<i64: 1, 64>}, {transform_indices = @transform_8, window_bounds = array<i64: 1, 16, 128>}, {transform_indices = @transform_9, window_bounds = array<i64: 1, 16, 128>}]} {
    %cst = arith.constant 0.000000e+00 : bf16
    %0 = vector.broadcast %cst : bf16 to vector<1x128xbf16>
    %c0 = arith.constant 0 : index
    %c0_0 = arith.constant 0 : index
    %1 = vector.load %arg11[%c0, %c0_0] : memref<24x128xbf16, #tpu.memory_space<vmem>>, vector<1x128xbf16>
    tpu.vector_store %arg11[%c0, %c0_0], %0 {strides = array<i32>} : memref<24x128xbf16, #tpu.memory_space<vmem>>, vector<1x128xbf16>,
    %c16 = arith.constant 16 : index
    %c0_1 = arith.constant 0 : index
    %2 = vector.load %arg11[%c16, %c0_1] : memref<24x128xbf16, #tpu.memory_space<vmem>>, vector<1x128xbf16>
    tpu.vector_store %arg11[%c16, %c0_1], %0 {strides = array<i32>} : memref<24x128xbf16, #tpu.memory_space<vmem>>, vector<1x128xbf16>,
    %c0_2 = arith.constant 0 : index
    %c0_3 = arith.constant 0 : index
    %c0_4 = arith.constant 0 : index
    %3 = vector.load %arg1[%c0_2, %c0_3, %c0_4] : memref<1x16x64xf32, #tpu.memory_space<vmem>>, vector<1x16x64xf32>
    %4 = vector.shape_cast %3 : vector<1x16x64xf32> to vector<16x64xf32>
    %c0_5 = arith.constant 0 : index
    %c0_6 = arith.constant 0 : index
    %c0_7 = arith.constant 0 : index
    %5 = vector.load %arg2[%c0_5, %c0_6, %c0_7] : memref<1x1x64xf32, #tpu.memory_space<vmem>>, vector<1x1x64xf32>
    %6 = vector.shape_cast %5 : vector<1x1x64xf32> to vector<1x64xf32>
    %7 = vector.broadcast %6 : vector<1x64xf32> to vector<16x64xf32>
    %8 = arith.mulf %4, %7 : vector<16x64xf32>
    %c0_8 = arith.constant 0 : index
    %c0_9 = arith.constant 0 : index
    %c0_10 = arith.constant 0 : index
    %9 = vector.load %arg3[%c0_8, %c0_9, %c0_10] : memref<1x1x64xf32, #tpu.memory_space<vmem>>, vector<1x1x64xf32>
    %10 = vector.shape_cast %9 : vector<1x1x64xf32> to vector<1x64xf32>
    %11 = vector.broadcast %10 : vector<1x64xf32> to vector<16x64xf32>
    %12 = arith.addf %8, %11 : vector<16x64xf32>
    %cst_11 = arith.constant 0.000000e+00 : f32
    %13 = vector.broadcast %cst_11 : f32 to vector<16x64xf32>
    %14 = arith.cmpf oge, %12, %13 : vector<16x64xf32>
    %c0_12 = arith.constant 0 : index
    %c0_13 = arith.constant 0 : index
    %15 = vector.load %arg4[%c0_12, %c0_13] : memref<1x1xf32, #tpu.memory_space<vmem>>, vector<1x1xf32>
    %16 = vector.broadcast %15 : vector<1x1xf32> to vector<16x64xf32>
    %17 = arith.mulf %16, %12 : vector<16x64xf32>
    %18 = arith.select %14, %12, %17 : vector<16x64xi1>, vector<16x64xf32>
    %19 = arith.truncf %18 : vector<16x64xf32> to vector<16x64xbf16>
    %c0_14 = arith.constant 0 : index
    %c0_15 = arith.constant 0 : index
    %20 = vector.load %arg11[%c0_14, %c0_15] : memref<24x128xbf16, #tpu.memory_space<vmem>>, vector<16x64xbf16>
    tpu.vector_store %arg11[%c0_14, %c0_15], %19 {strides = array<i32>} : memref<24x128xbf16, #tpu.memory_space<vmem>>, vector<16x64xbf16>,
    %c1 = arith.constant 1 : index
    %c64 = arith.constant 64 : index
    %21 = vector.load %arg11[%c1, %c64] : memref<24x128xbf16, #tpu.memory_space<vmem>>, vector<16x64xbf16>
    tpu.vector_store %arg11[%c1, %c64], %19 {strides = array<i32>} : memref<24x128xbf16, #tpu.memory_space<vmem>>, vector<16x64xbf16>,
    %c0_16 = arith.constant 0 : index
    %c0_17 = arith.constant 0 : index
    %22 = vector.load %arg11[%c0_16, %c0_17] : memref<24x128xbf16, #tpu.memory_space<vmem>>, vector<16x128xbf16>
    %c0_18 = arith.constant 0 : index
    %c0_19 = arith.constant 0 : index
    %c0_20 = arith.constant 0 : index
    %23 = vector.load %arg5[%c0_18, %c0_19, %c0_20] : memref<2x128x64xbf16, #tpu.memory_space<vmem>>, vector<1x128x64xbf16>
    %24 = vector.shape_cast %23 : vector<1x128x64xbf16> to vector<128x64xbf16>
    %cst_21 = arith.constant dense<0.000000e+00> : vector<16x64xf32>
    %25 = tpu.matmul %22, %24, %cst_21 {dimension_numbers = #tpu.dot_dimension_numbers<[1], [0], [0], [1], [0, 0, 1, 1], [], []>} : vector<16x128xbf16>, vector<128x64xbf16>, vector<16x64xf32> -> vector<16x64xf32>
    %c0_22 = arith.constant 0 : index
    %c0_23 = arith.constant 0 : index
    %26 = vector.load %arg6[%c0_22, %c0_23] : memref<1x64xf32, #tpu.memory_space<vmem>>, vector<1x64xf32>
    %27 = vector.broadcast %26 : vector<1x64xf32> to vector<16x64xf32>
    %28 = arith.addf %25, %27 : vector<16x64xf32>
    %29 = arith.truncf %28 : vector<16x64xf32> to vector<16x64xbf16>
    %c1_24 = arith.constant 1 : index
    %c0_25 = arith.constant 0 : index
    %30 = vector.load %arg11[%c1_24, %c0_25] : memref<24x128xbf16, #tpu.memory_space<vmem>>, vector<16x128xbf16>
    %c1_26 = arith.constant 1 : index
    %c0_27 = arith.constant 0 : index
    %c0_28 = arith.constant 0 : index
    %31 = vector.load %arg5[%c1_26, %c0_27, %c0_28] : memref<2x128x64xbf16, #tpu.memory_space<vmem>>, vector<1x128x64xbf16>
    %32 = vector.shape_cast %31 : vector<1x128x64xbf16> to vector<128x64xbf16>
    %cst_29 = arith.constant dense<0.000000e+00> : vector<16x64xf32>
    %33 = tpu.matmul %30, %32, %cst_29 {dimension_numbers = #tpu.dot_dimension_numbers<[1], [0], [0], [1], [0, 0, 1, 1], [], []>} : vector<16x128xbf16>, vector<128x64xbf16>, vector<16x64xf32> -> vector<16x64xf32>
    %c0_30 = arith.constant 0 : index
    %c0_31 = arith.constant 0 : index
    %34 = vector.load %arg6[%c0_30, %c0_31] : memref<1x64xf32, #tpu.memory_space<vmem>>, vector<1x64xf32>
    %35 = vector.broadcast %34 : vector<1x64xf32> to vector<16x64xf32>
    %36 = arith.addf %33, %35 : vector<16x64xf32>
    %37 = arith.truncf %36 : vector<16x64xf32> to vector<16x64xbf16>
    %38 = tpu.concatenate %29, %37 in 1 : vector<16x64xbf16>, vector<16x64xbf16> -> vector<16x128xbf16>
    %c0_32 = arith.constant 0 : index
    %c0_33 = arith.constant 0 : index
    %c0_34 = arith.constant 0 : index
    %39 = vector.load %arg9[%c0_32, %c0_33, %c0_34] : memref<1x16x128xbf16, #tpu.memory_space<vmem>>, vector<1x16x128xbf16>
    %40 = vector.shape_cast %39 : vector<1x16x128xbf16> to vector<16x128xbf16>
    %41 = vector.shape_cast %38 : vector<16x128xbf16> to vector<1x16x128xbf16>
    tpu.vector_store %arg9[%c0_32, %c0_33, %c0_34], %41 {strides = array<i32>} : memref<1x16x128xbf16, #tpu.memory_space<vmem>>, vector<1x16x128xbf16>,
    %42 = arith.truncf %4 : vector<16x64xf32> to vector<16x64xbf16>
    %c0_35 = arith.constant 0 : index
    %c0_36 = arith.constant 0 : index
    %43 = vector.load %arg11[%c0_35, %c0_36] : memref<24x128xbf16, #tpu.memory_space<vmem>>, vector<16x64xbf16>
    tpu.vector_store %arg11[%c0_35, %c0_36], %42 {strides = array<i32>} : memref<24x128xbf16, #tpu.memory_space<vmem>>, vector<16x64xbf16>,
    %c1_37 = arith.constant 1 : index
    %c64_38 = arith.constant 64 : index
    %44 = vector.load %arg11[%c1_37, %c64_38] : memref<24x128xbf16, #tpu.memory_space<vmem>>, vector<16x64xbf16>
    tpu.vector_store %arg11[%c1_37, %c64_38], %42 {strides = array<i32>} : memref<24x128xbf16, #tpu.memory_space<vmem>>, vector<16x64xbf16>,
    %c0_39 = arith.constant 0 : index
    %c0_40 = arith.constant 0 : index
    %45 = vector.load %arg11[%c0_39, %c0_40] : memref<24x128xbf16, #tpu.memory_space<vmem>>, vector<16x128xbf16>
    %c0_41 = arith.constant 0 : index
    %c0_42 = arith.constant 0 : index
    %c0_43 = arith.constant 0 : index
    %46 = vector.load %arg7[%c0_41, %c0_42, %c0_43] : memref<2x128x64xbf16, #tpu.memory_space<vmem>>, vector<1x128x64xbf16>
    %47 = vector.shape_cast %46 : vector<1x128x64xbf16> to vector<128x64xbf16>
    %cst_44 = arith.constant dense<0.000000e+00> : vector<16x64xf32>
    %48 = tpu.matmul %45, %47, %cst_44 {dimension_numbers = #tpu.dot_dimension_numbers<[1], [0], [0], [1], [0, 0, 1, 1], [], []>} : vector<16x128xbf16>, vector<128x64xbf16>, vector<16x64xf32> -> vector<16x64xf32>
    %c0_45 = arith.constant 0 : index
    %c0_46 = arith.constant 0 : index
    %49 = vector.load %arg8[%c0_45, %c0_46] : memref<1x64xf32, #tpu.memory_space<vmem>>, vector<1x64xf32>
    %50 = vector.broadcast %49 : vector<1x64xf32> to vector<16x64xf32>
    %51 = arith.addf %48, %50 : vector<16x64xf32>
    %52 = arith.truncf %51 : vector<16x64xf32> to vector<16x64xbf16>
    %c1_47 = arith.constant 1 : index
    %c0_48 = arith.constant 0 : index
    %53 = vector.load %arg11[%c1_47, %c0_48] : memref<24x128xbf16, #tpu.memory_space<vmem>>, vector<16x128xbf16>
    %c1_49 = arith.constant 1 : index
    %c0_50 = arith.constant 0 : index
    %c0_51 = arith.constant 0 : index
    %54 = vector.load %arg7[%c1_49, %c0_50, %c0_51] : memref<2x128x64xbf16, #tpu.memory_space<vmem>>, vector<1x128x64xbf16>
    %55 = vector.shape_cast %54 : vector<1x128x64xbf16> to vector<128x64xbf16>
    %cst_52 = arith.constant dense<0.000000e+00> : vector<16x64xf32>
    %56 = tpu.matmul %53, %55, %cst_52 {dimension_numbers = #tpu.dot_dimension_numbers<[1], [0], [0], [1], [0, 0, 1, 1], [], []>} : vector<16x128xbf16>, vector<128x64xbf16>, vector<16x64xf32> -> vector<16x64xf32>
    %c0_53 = arith.constant 0 : index
    %c0_54 = arith.constant 0 : index
    %57 = vector.load %arg8[%c0_53, %c0_54] : memref<1x64xf32, #tpu.memory_space<vmem>>, vector<1x64xf32>
    %58 = vector.broadcast %57 : vector<1x64xf32> to vector<16x64xf32>
    %59 = arith.addf %56, %58 : vector<16x64xf32>
    %60 = arith.truncf %59 : vector<16x64xf32> to vector<16x64xbf16>
    %61 = tpu.concatenate %52, %60 in 1 : vector<16x64xbf16>, vector<16x64xbf16> -> vector<16x128xbf16>
    %c0_55 = arith.constant 0 : index
    %c0_56 = arith.constant 0 : index
    %c0_57 = arith.constant 0 : index
    %62 = vector.load %arg10[%c0_55, %c0_56, %c0_57] : memref<1x16x128xbf16, #tpu.memory_space<vmem>>, vector<1x16x128xbf16>
    %63 = vector.shape_cast %62 : vector<1x16x128xbf16> to vector<16x128xbf16>
    %64 = vector.shape_cast %61 : vector<16x128xbf16> to vector<1x16x128xbf16>
    tpu.vector_store %arg10[%c0_55, %c0_56, %c0_57], %64 {strides = array<i32>} : memref<1x16x128xbf16, #tpu.memory_space<vmem>>, vector<1x16x128xbf16>,
    return
  }
  func.func @transform_0(%arg0: i32) -> (i32, i32, i32) {
    %c0_i32 = arith.constant 0 : i32
    %c0_i32_0 = arith.constant 0 : i32
    %c0_i32_1 = arith.constant 0 : i32
    return %arg0, %c0_i32, %c0_i32_0 : i32, i32, i32
  }
  func.func @transform_1(%arg0: i32) -> (i32, i32, i32) {
    %c0_i32 = arith.constant 0 : i32
    %c0_i32_0 = arith.constant 0 : i32
    %c0_i32_1 = arith.constant 0 : i32
    return %arg0, %c0_i32, %c0_i32_0 : i32, i32, i32
  }
  func.func @transform_2(%arg0: i32) -> (i32, i32, i32) {
    %c0_i32 = arith.constant 0 : i32
    %c0_i32_0 = arith.constant 0 : i32
    %c0_i32_1 = arith.constant 0 : i32
    return %arg0, %c0_i32, %c0_i32_0 : i32, i32, i32
  }
  func.func @transform_3(%arg0: i32) -> (i32, i32) {
    %c0_i32 = arith.constant 0 : i32
    %c0_i32_0 = arith.constant 0 : i32
    %c0_i32_1 = arith.constant 0 : i32
    return %c0_i32, %c0_i32_0 : i32, i32
  }
  func.func @transform_4(%arg0: i32) -> (i32, i32, i32) {
    %c0_i32 = arith.constant 0 : i32
    %c0_i32_0 = arith.constant 0 : i32
    %c0_i32_1 = arith.constant 0 : i32
    %c0_i32_2 = arith.constant 0 : i32
    return %c0_i32, %c0_i32_0, %c0_i32_1 : i32, i32, i32
  }
  func.func @transform_5(%arg0: i32) -> (i32, i32) {
    %c0_i32 = arith.constant 0 : i32
    %c0_i32_0 = arith.constant 0 : i32
    %c0_i32_1 = arith.constant 0 : i32
    return %c0_i32, %c0_i32_0 : i32, i32
  }
  func.func @transform_6(%arg0: i32) -> (i32, i32, i32) {
    %c0_i32 = arith.constant 0 : i32
    %c0_i32_0 = arith.constant 0 : i32
    %c0_i32_1 = arith.constant 0 : i32
    %c0_i32_2 = arith.constant 0 : i32
    return %c0_i32, %c0_i32_0, %c0_i32_1 : i32, i32, i32
  }
  func.func @transform_7(%arg0: i32) -> (i32, i32) {
    %c0_i32 = arith.constant 0 : i32
    %c0_i32_0 = arith.constant 0 : i32
    %c0_i32_1 = arith.constant 0 : i32
    return %c0_i32, %c0_i32_0 : i32, i32
  }
  func.func @transform_8(%arg0: i32) -> (i32, i32, i32) {
    %c0_i32 = arith.constant 0 : i32
    %c0_i32_0 = arith.constant 0 : i32
    %c0_i32_1 = arith.constant 0 : i32
    return %arg0, %c0_i32, %c0_i32_0 : i32, i32, i32
  }
  func.func @transform_9(%arg0: i32) -> (i32, i32, i32) {
    %c0_i32 = arith.constant 0 : i32
    %c0_i32_0 = arith.constant 0 : i32
    %c0_i32_1 = arith.constant 0 : i32
    return %arg0, %c0_i32, %c0_i32_0 : i32, i32, i32
  }
}

module attributes {stable_mosaic.version = 11 : i64} {
  func.func @_decoder_main_kernel(%arg0: i32, %arg1: memref<1x32x64xbf16, #tpu.memory_space<vmem>>, %arg2: memref<1x32x64xbf16, #tpu.memory_space<vmem>>, %arg3: memref<8x128x32xbf16, #tpu.memory_space<vmem>>, %arg4: memref<4x128x32xbf16, #tpu.memory_space<vmem>>, %arg5: memref<4x128x32xbf16, #tpu.memory_space<vmem>>, %arg6: memref<4x128x32xbf16, #tpu.memory_space<vmem>>, %arg7: memref<64x32xbf16, #tpu.memory_space<vmem>>, %arg8: memref<1x1x32xf32, #tpu.memory_space<vmem>>, %arg9: memref<1x1x32xf32, #tpu.memory_space<vmem>>, %arg10: memref<1x1x32xf32, #tpu.memory_space<vmem>>, %arg11: memref<1x1x32xf32, #tpu.memory_space<vmem>>, %arg12: memref<1x1x32xf32, #tpu.memory_space<vmem>>, %arg13: memref<1x1x32xf32, #tpu.memory_space<vmem>>, %arg14: memref<1x32xf32, #tpu.memory_space<vmem>>, %arg15: memref<1x32xf32, #tpu.memory_space<vmem>>, %arg16: memref<1x1xf32, #tpu.memory_space<vmem>>, %arg17: memref<1x1xf32, #tpu.memory_space<vmem>>, %arg18: memref<1x1xf32, #tpu.memory_space<vmem>>, %arg19: memref<1x32x32xf32, #tpu.memory_space<vmem>>, %arg20: memref<56x128xbf16, #tpu.memory_space<vmem>>, %arg21: memref<56x128xbf16, #tpu.memory_space<vmem>>, %arg22: memref<88x128xbf16, #tpu.memory_space<vmem>>, %arg23: memref<136x128xbf16, #tpu.memory_space<vmem>>) attributes {dimension_semantics = [#tpu.dimension_semantics<parallel>], iteration_bounds = array<i64: 2>, scalar_prefetch = 0 : i64, scratch_operands = 4 : i64, tpu.core_type = #tpu.core_type<tc>, window_params = [{transform_indices = @transform_0, window_bounds = array<i64: 1, 32, 64>}, {transform_indices = @transform_1, window_bounds = array<i64: 1, 32, 64>}, {pipeline_mode = #tpu.pipeline_mode<synchronous>, transform_indices = @transform_2, window_bounds = array<i64: 8, 128, 32>}, {pipeline_mode = #tpu.pipeline_mode<synchronous>, transform_indices = @transform_3, window_bounds = array<i64: 4, 128, 32>}, {pipeline_mode = #tpu.pipeline_mode<synchronous>, transform_indices = @transform_4, window_bounds = array<i64: 4, 128, 32>}, {pipeline_mode = #tpu.pipeline_mode<synchronous>, transform_indices = @transform_5, window_bounds = array<i64: 4, 128, 32>}, {pipeline_mode = #tpu.pipeline_mode<synchronous>, transform_indices = @transform_6, window_bounds = array<i64: 64, 32>}, {transform_indices = @transform_7, window_bounds = array<i64: 1, 1, 32>}, {transform_indices = @transform_8, window_bounds = array<i64: 1, 1, 32>}, {transform_indices = @transform_9, window_bounds = array<i64: 1, 1, 32>}, {transform_indices = @transform_10, window_bounds = array<i64: 1, 1, 32>}, {transform_indices = @transform_11, window_bounds = array<i64: 1, 1, 32>}, {transform_indices = @transform_12, window_bounds = array<i64: 1, 1, 32>}, {pipeline_mode = #tpu.pipeline_mode<synchronous>, transform_indices = @transform_13, window_bounds = array<i64: 1, 32>}, {pipeline_mode = #tpu.pipeline_mode<synchronous>, transform_indices = @transform_14, window_bounds = array<i64: 1, 32>}, {pipeline_mode = #tpu.pipeline_mode<synchronous>, transform_indices = @transform_15, window_bounds = array<i64: 1, 1>}, {pipeline_mode = #tpu.pipeline_mode<synchronous>, transform_indices = @transform_16, window_bounds = array<i64: 1, 1>}, {pipeline_mode = #tpu.pipeline_mode<synchronous>, transform_indices = @transform_17, window_bounds = array<i64: 1, 1>}, {transform_indices = @transform_18, window_bounds = array<i64: 1, 32, 32>}]} {
    %c0 = arith.constant 0 : index
    %c0_0 = arith.constant 0 : index
    %c0_1 = arith.constant 0 : index
    %0 = vector.load %arg1[%c0, %c0_0, %c0_1] : memref<1x32x64xbf16, #tpu.memory_space<vmem>>, vector<1x32x64xbf16>
    %1 = vector.shape_cast %0 : vector<1x32x64xbf16> to vector<32x64xbf16>
    %cst = arith.constant 0.000000e+00 : bf16
    %2 = vector.broadcast %cst : bf16 to vector<7x128xbf16>
    %c9 = arith.constant 9 : index
    %c0_2 = arith.constant 0 : index
    %3 = vector.load %arg20[%c9, %c0_2] : memref<56x128xbf16, #tpu.memory_space<vmem>>, vector<7x128xbf16>
    tpu.vector_store %arg20[%c9, %c0_2], %2 {strides = array<i32>} : memref<56x128xbf16, #tpu.memory_space<vmem>>, vector<7x128xbf16>,
    %cst_3 = arith.constant 0.000000e+00 : bf16
    %4 = vector.broadcast %cst_3 : bf16 to vector<8x128xbf16>
    %c47 = arith.constant 47 : index
    %c0_4 = arith.constant 0 : index
    %5 = vector.load %arg20[%c47, %c0_4] : memref<56x128xbf16, #tpu.memory_space<vmem>>, vector<8x128xbf16>
    tpu.vector_store %arg20[%c47, %c0_4], %4 {strides = array<i32>} : memref<56x128xbf16, #tpu.memory_space<vmem>>, vector<8x128xbf16>,
    %c16 = arith.constant 16 : index
    %c0_5 = arith.constant 0 : index
    %6 = vector.load %arg20[%c16, %c0_5] : memref<56x128xbf16, #tpu.memory_space<vmem>>, vector<32x64xbf16>
    tpu.vector_store %arg20[%c16, %c0_5], %1 {strides = array<i32>} : memref<56x128xbf16, #tpu.memory_space<vmem>>, vector<32x64xbf16>,
    %c15 = arith.constant 15 : index
    %c64 = arith.constant 64 : index
    %7 = vector.load %arg20[%c15, %c64] : memref<56x128xbf16, #tpu.memory_space<vmem>>, vector<32x64xbf16>
    tpu.vector_store %arg20[%c15, %c64], %1 {strides = array<i32>} : memref<56x128xbf16, #tpu.memory_space<vmem>>, vector<32x64xbf16>,
    %c9_6 = arith.constant 9 : index
    %c0_7 = arith.constant 0 : index
    %8 = vector.load %arg20[%c9_6, %c0_7] : memref<56x128xbf16, #tpu.memory_space<vmem>>, vector<32x128xbf16>
    %c0_8 = arith.constant 0 : index
    %c0_9 = arith.constant 0 : index
    %c0_10 = arith.constant 0 : index
    %9 = vector.load %arg3[%c0_8, %c0_9, %c0_10] : memref<8x128x32xbf16, #tpu.memory_space<vmem>>, vector<1x128x32xbf16>
    %10 = vector.shape_cast %9 : vector<1x128x32xbf16> to vector<128x32xbf16>
    %cst_11 = arith.constant dense<0.000000e+00> : vector<32x32xf32>
    %11 = tpu.matmul %8, %10, %cst_11 {dimension_numbers = #tpu.dot_dimension_numbers<[1], [0], [0], [1], [0, 0, 1, 1], [], []>} : vector<32x128xbf16>, vector<128x32xbf16>, vector<32x32xf32> -> vector<32x32xf32>
    %c11 = arith.constant 11 : index
    %c0_12 = arith.constant 0 : index
    %12 = vector.load %arg20[%c11, %c0_12] : memref<56x128xbf16, #tpu.memory_space<vmem>>, vector<32x128xbf16>
    %c1 = arith.constant 1 : index
    %c0_13 = arith.constant 0 : index
    %c0_14 = arith.constant 0 : index
    %13 = vector.load %arg3[%c1, %c0_13, %c0_14] : memref<8x128x32xbf16, #tpu.memory_space<vmem>>, vector<1x128x32xbf16>
    %14 = vector.shape_cast %13 : vector<1x128x32xbf16> to vector<128x32xbf16>
    %cst_15 = arith.constant dense<0.000000e+00> : vector<32x32xf32>
    %15 = tpu.matmul %12, %14, %cst_15 {dimension_numbers = #tpu.dot_dimension_numbers<[1], [0], [0], [1], [0, 0, 1, 1], [], []>} : vector<32x128xbf16>, vector<128x32xbf16>, vector<32x32xf32> -> vector<32x32xf32>
    %16 = arith.addf %11, %15 : vector<32x32xf32>
    %c13 = arith.constant 13 : index
    %c0_16 = arith.constant 0 : index
    %17 = vector.load %arg20[%c13, %c0_16] : memref<56x128xbf16, #tpu.memory_space<vmem>>, vector<32x128xbf16>
    %c2 = arith.constant 2 : index
    %c0_17 = arith.constant 0 : index
    %c0_18 = arith.constant 0 : index
    %18 = vector.load %arg3[%c2, %c0_17, %c0_18] : memref<8x128x32xbf16, #tpu.memory_space<vmem>>, vector<1x128x32xbf16>
    %19 = vector.shape_cast %18 : vector<1x128x32xbf16> to vector<128x32xbf16>
    %cst_19 = arith.constant dense<0.000000e+00> : vector<32x32xf32>
    %20 = tpu.matmul %17, %19, %cst_19 {dimension_numbers = #tpu.dot_dimension_numbers<[1], [0], [0], [1], [0, 0, 1, 1], [], []>} : vector<32x128xbf16>, vector<128x32xbf16>, vector<32x32xf32> -> vector<32x32xf32>
    %21 = arith.addf %16, %20 : vector<32x32xf32>
    %c15_20 = arith.constant 15 : index
    %c0_21 = arith.constant 0 : index
    %22 = vector.load %arg20[%c15_20, %c0_21] : memref<56x128xbf16, #tpu.memory_space<vmem>>, vector<32x128xbf16>
    %c3 = arith.constant 3 : index
    %c0_22 = arith.constant 0 : index
    %c0_23 = arith.constant 0 : index
    %23 = vector.load %arg3[%c3, %c0_22, %c0_23] : memref<8x128x32xbf16, #tpu.memory_space<vmem>>, vector<1x128x32xbf16>
    %24 = vector.shape_cast %23 : vector<1x128x32xbf16> to vector<128x32xbf16>
    %cst_24 = arith.constant dense<0.000000e+00> : vector<32x32xf32>
    %25 = tpu.matmul %22, %24, %cst_24 {dimension_numbers = #tpu.dot_dimension_numbers<[1], [0], [0], [1], [0, 0, 1, 1], [], []>} : vector<32x128xbf16>, vector<128x32xbf16>, vector<32x32xf32> -> vector<32x32xf32>
    %26 = arith.addf %21, %25 : vector<32x32xf32>
    %c17 = arith.constant 17 : index
    %c0_25 = arith.constant 0 : index
    %27 = vector.load %arg20[%c17, %c0_25] : memref<56x128xbf16, #tpu.memory_space<vmem>>, vector<32x128xbf16>
    %c4 = arith.constant 4 : index
    %c0_26 = arith.constant 0 : index
    %c0_27 = arith.constant 0 : index
    %28 = vector.load %arg3[%c4, %c0_26, %c0_27] : memref<8x128x32xbf16, #tpu.memory_space<vmem>>, vector<1x128x32xbf16>
    %29 = vector.shape_cast %28 : vector<1x128x32xbf16> to vector<128x32xbf16>
    %cst_28 = arith.constant dense<0.000000e+00> : vector<32x32xf32>
    %30 = tpu.matmul %27, %29, %cst_28 {dimension_numbers = #tpu.dot_dimension_numbers<[1], [0], [0], [1], [0, 0, 1, 1], [], []>} : vector<32x128xbf16>, vector<128x32xbf16>, vector<32x32xf32> -> vector<32x32xf32>
    %31 = arith.addf %26, %30 : vector<32x32xf32>
    %c19 = arith.constant 19 : index
    %c0_29 = arith.constant 0 : index
    %32 = vector.load %arg20[%c19, %c0_29] : memref<56x128xbf16, #tpu.memory_space<vmem>>, vector<32x128xbf16>
    %c5 = arith.constant 5 : index
    %c0_30 = arith.constant 0 : index
    %c0_31 = arith.constant 0 : index
    %33 = vector.load %arg3[%c5, %c0_30, %c0_31] : memref<8x128x32xbf16, #tpu.memory_space<vmem>>, vector<1x128x32xbf16>
    %34 = vector.shape_cast %33 : vector<1x128x32xbf16> to vector<128x32xbf16>
    %cst_32 = arith.constant dense<0.000000e+00> : vector<32x32xf32>
    %35 = tpu.matmul %32, %34, %cst_32 {dimension_numbers = #tpu.dot_dimension_numbers<[1], [0], [0], [1], [0, 0, 1, 1], [], []>} : vector<32x128xbf16>, vector<128x32xbf16>, vector<32x32xf32> -> vector<32x32xf32>
    %36 = arith.addf %31, %35 : vector<32x32xf32>
    %c21 = arith.constant 21 : index
    %c0_33 = arith.constant 0 : index
    %37 = vector.load %arg20[%c21, %c0_33] : memref<56x128xbf16, #tpu.memory_space<vmem>>, vector<32x128xbf16>
    %c6 = arith.constant 6 : index
    %c0_34 = arith.constant 0 : index
    %c0_35 = arith.constant 0 : index
    %38 = vector.load %arg3[%c6, %c0_34, %c0_35] : memref<8x128x32xbf16, #tpu.memory_space<vmem>>, vector<1x128x32xbf16>
    %39 = vector.shape_cast %38 : vector<1x128x32xbf16> to vector<128x32xbf16>
    %cst_36 = arith.constant dense<0.000000e+00> : vector<32x32xf32>
    %40 = tpu.matmul %37, %39, %cst_36 {dimension_numbers = #tpu.dot_dimension_numbers<[1], [0], [0], [1], [0, 0, 1, 1], [], []>} : vector<32x128xbf16>, vector<128x32xbf16>, vector<32x32xf32> -> vector<32x32xf32>
    %41 = arith.addf %36, %40 : vector<32x32xf32>
    %c23 = arith.constant 23 : index
    %c0_37 = arith.constant 0 : index
    %42 = vector.load %arg20[%c23, %c0_37] : memref<56x128xbf16, #tpu.memory_space<vmem>>, vector<32x128xbf16>
    %c7 = arith.constant 7 : index
    %c0_38 = arith.constant 0 : index
    %c0_39 = arith.constant 0 : index
    %43 = vector.load %arg3[%c7, %c0_38, %c0_39] : memref<8x128x32xbf16, #tpu.memory_space<vmem>>, vector<1x128x32xbf16>
    %44 = vector.shape_cast %43 : vector<1x128x32xbf16> to vector<128x32xbf16>
    %cst_40 = arith.constant dense<0.000000e+00> : vector<32x32xf32>
    %45 = tpu.matmul %42, %44, %cst_40 {dimension_numbers = #tpu.dot_dimension_numbers<[1], [0], [0], [1], [0, 0, 1, 1], [], []>} : vector<32x128xbf16>, vector<128x32xbf16>, vector<32x32xf32> -> vector<32x32xf32>
    %46 = arith.addf %41, %45 : vector<32x32xf32>
    %c0_41 = arith.constant 0 : index
    %c0_42 = arith.constant 0 : index
    %c0_43 = arith.constant 0 : index
    %47 = vector.load %arg8[%c0_41, %c0_42, %c0_43] : memref<1x1x32xf32, #tpu.memory_space<vmem>>, vector<1x1x32xf32>
    %48 = vector.shape_cast %47 : vector<1x1x32xf32> to vector<1x32xf32>
    %49 = vector.broadcast %48 : vector<1x32xf32> to vector<32x32xf32>
    %50 = arith.mulf %46, %49 : vector<32x32xf32>
    %c0_44 = arith.constant 0 : index
    %c0_45 = arith.constant 0 : index
    %c0_46 = arith.constant 0 : index
    %51 = vector.load %arg9[%c0_44, %c0_45, %c0_46] : memref<1x1x32xf32, #tpu.memory_space<vmem>>, vector<1x1x32xf32>
    %52 = vector.shape_cast %51 : vector<1x1x32xf32> to vector<1x32xf32>
    %53 = vector.broadcast %52 : vector<1x32xf32> to vector<32x32xf32>
    %54 = arith.addf %50, %53 : vector<32x32xf32>
    %cst_47 = arith.constant 0.000000e+00 : f32
    %55 = vector.broadcast %cst_47 : f32 to vector<32x32xf32>
    %56 = arith.cmpf oge, %54, %55 : vector<32x32xf32>
    %c0_48 = arith.constant 0 : index
    %c0_49 = arith.constant 0 : index
    %57 = vector.load %arg16[%c0_48, %c0_49] : memref<1x1xf32, #tpu.memory_space<vmem>>, vector<1x1xf32>
    %58 = vector.broadcast %57 : vector<1x1xf32> to vector<32x32xf32>
    %59 = arith.mulf %58, %54 : vector<32x32xf32>
    %60 = arith.select %56, %54, %59 : vector<32x32xi1>, vector<32x32xf32>
    %61 = arith.truncf %60 : vector<32x32xf32> to vector<32x32xbf16>
    %cst_50 = arith.constant 0.000000e+00 : bf16
    %62 = vector.broadcast %cst_50 : bf16 to vector<7x128xbf16>
    %c9_51 = arith.constant 9 : index
    %c0_52 = arith.constant 0 : index
    %63 = vector.load %arg21[%c9_51, %c0_52] : memref<56x128xbf16, #tpu.memory_space<vmem>>, vector<7x128xbf16>
    tpu.vector_store %arg21[%c9_51, %c0_52], %62 {strides = array<i32>} : memref<56x128xbf16, #tpu.memory_space<vmem>>, vector<7x128xbf16>,
    %cst_53 = arith.constant 0.000000e+00 : bf16
    %64 = vector.broadcast %cst_53 : bf16 to vector<8x128xbf16>
    %c45 = arith.constant 45 : index
    %c0_54 = arith.constant 0 : index
    %65 = vector.load %arg21[%c45, %c0_54] : memref<56x128xbf16, #tpu.memory_space<vmem>>, vector<8x128xbf16>
    tpu.vector_store %arg21[%c45, %c0_54], %64 {strides = array<i32>} : memref<56x128xbf16, #tpu.memory_space<vmem>>, vector<8x128xbf16>,
    %c16_55 = arith.constant 16 : index
    %c0_56 = arith.constant 0 : index
    %66 = vector.load %arg21[%c16_55, %c0_56] : memref<56x128xbf16, #tpu.memory_space<vmem>>, vector<32x32xbf16>
    tpu.vector_store %arg21[%c16_55, %c0_56], %61 {strides = array<i32>} : memref<56x128xbf16, #tpu.memory_space<vmem>>, vector<32x32xbf16>,
    %c15_57 = arith.constant 15 : index
    %c32 = arith.constant 32 : index
    %67 = vector.load %arg21[%c15_57, %c32] : memref<56x128xbf16, #tpu.memory_space<vmem>>, vector<32x32xbf16>
    tpu.vector_store %arg21[%c15_57, %c32], %61 {strides = array<i32>} : memref<56x128xbf16, #tpu.memory_space<vmem>>, vector<32x32xbf16>,
    %c14 = arith.constant 14 : index
    %c64_58 = arith.constant 64 : index
    %68 = vector.load %arg21[%c14, %c64_58] : memref<56x128xbf16, #tpu.memory_space<vmem>>, vector<32x32xbf16>
    tpu.vector_store %arg21[%c14, %c64_58], %61 {strides = array<i32>} : memref<56x128xbf16, #tpu.memory_space<vmem>>, vector<32x32xbf16>,
    %c13_59 = arith.constant 13 : index
    %c96 = arith.constant 96 : index
    %69 = vector.load %arg21[%c13_59, %c96] : memref<56x128xbf16, #tpu.memory_space<vmem>>, vector<32x32xbf16>
    tpu.vector_store %arg21[%c13_59, %c96], %61 {strides = array<i32>} : memref<56x128xbf16, #tpu.memory_space<vmem>>, vector<32x32xbf16>,
    %c9_60 = arith.constant 9 : index
    %c0_61 = arith.constant 0 : index
    %70 = vector.load %arg21[%c9_60, %c0_61] : memref<56x128xbf16, #tpu.memory_space<vmem>>, vector<32x128xbf16>
    %c0_62 = arith.constant 0 : index
    %c0_63 = arith.constant 0 : index
    %c0_64 = arith.constant 0 : index
    %71 = vector.load %arg4[%c0_62, %c0_63, %c0_64] : memref<4x128x32xbf16, #tpu.memory_space<vmem>>, vector<1x128x32xbf16>
    %72 = vector.shape_cast %71 : vector<1x128x32xbf16> to vector<128x32xbf16>
    %cst_65 = arith.constant dense<0.000000e+00> : vector<32x32xf32>
    %73 = tpu.matmul %70, %72, %cst_65 {dimension_numbers = #tpu.dot_dimension_numbers<[1], [0], [0], [1], [0, 0, 1, 1], [], []>} : vector<32x128xbf16>, vector<128x32xbf16>, vector<32x32xf32> -> vector<32x32xf32>
    %c13_66 = arith.constant 13 : index
    %c0_67 = arith.constant 0 : index
    %74 = vector.load %arg21[%c13_66, %c0_67] : memref<56x128xbf16, #tpu.memory_space<vmem>>, vector<32x128xbf16>
    %c1_68 = arith.constant 1 : index
    %c0_69 = arith.constant 0 : index
    %c0_70 = arith.constant 0 : index
    %75 = vector.load %arg4[%c1_68, %c0_69, %c0_70] : memref<4x128x32xbf16, #tpu.memory_space<vmem>>, vector<1x128x32xbf16>
    %76 = vector.shape_cast %75 : vector<1x128x32xbf16> to vector<128x32xbf16>
    %cst_71 = arith.constant dense<0.000000e+00> : vector<32x32xf32>
    %77 = tpu.matmul %74, %76, %cst_71 {dimension_numbers = #tpu.dot_dimension_numbers<[1], [0], [0], [1], [0, 0, 1, 1], [], []>} : vector<32x128xbf16>, vector<128x32xbf16>, vector<32x32xf32> -> vector<32x32xf32>
    %78 = arith.addf %73, %77 : vector<32x32xf32>
    %c17_72 = arith.constant 17 : index
    %c0_73 = arith.constant 0 : index
    %79 = vector.load %arg21[%c17_72, %c0_73] : memref<56x128xbf16, #tpu.memory_space<vmem>>, vector<32x128xbf16>
    %c2_74 = arith.constant 2 : index
    %c0_75 = arith.constant 0 : index
    %c0_76 = arith.constant 0 : index
    %80 = vector.load %arg4[%c2_74, %c0_75, %c0_76] : memref<4x128x32xbf16, #tpu.memory_space<vmem>>, vector<1x128x32xbf16>
    %81 = vector.shape_cast %80 : vector<1x128x32xbf16> to vector<128x32xbf16>
    %cst_77 = arith.constant dense<0.000000e+00> : vector<32x32xf32>
    %82 = tpu.matmul %79, %81, %cst_77 {dimension_numbers = #tpu.dot_dimension_numbers<[1], [0], [0], [1], [0, 0, 1, 1], [], []>} : vector<32x128xbf16>, vector<128x32xbf16>, vector<32x32xf32> -> vector<32x32xf32>
    %83 = arith.addf %78, %82 : vector<32x32xf32>
    %c21_78 = arith.constant 21 : index
    %c0_79 = arith.constant 0 : index
    %84 = vector.load %arg21[%c21_78, %c0_79] : memref<56x128xbf16, #tpu.memory_space<vmem>>, vector<32x128xbf16>
    %c3_80 = arith.constant 3 : index
    %c0_81 = arith.constant 0 : index
    %c0_82 = arith.constant 0 : index
    %85 = vector.load %arg4[%c3_80, %c0_81, %c0_82] : memref<4x128x32xbf16, #tpu.memory_space<vmem>>, vector<1x128x32xbf16>
    %86 = vector.shape_cast %85 : vector<1x128x32xbf16> to vector<128x32xbf16>
    %cst_83 = arith.constant dense<0.000000e+00> : vector<32x32xf32>
    %87 = tpu.matmul %84, %86, %cst_83 {dimension_numbers = #tpu.dot_dimension_numbers<[1], [0], [0], [1], [0, 0, 1, 1], [], []>} : vector<32x128xbf16>, vector<128x32xbf16>, vector<32x32xf32> -> vector<32x32xf32>
    %88 = arith.addf %83, %87 : vector<32x32xf32>
    %c0_84 = arith.constant 0 : index
    %c0_85 = arith.constant 0 : index
    %c0_86 = arith.constant 0 : index
    %89 = vector.load %arg2[%c0_84, %c0_85, %c0_86] : memref<1x32x64xbf16, #tpu.memory_space<vmem>>, vector<1x32x64xbf16>
    %90 = vector.shape_cast %89 : vector<1x32x64xbf16> to vector<32x64xbf16>
    %c0_87 = arith.constant 0 : index
    %c0_88 = arith.constant 0 : index
    %91 = vector.load %arg7[%c0_87, %c0_88] : memref<64x32xbf16, #tpu.memory_space<vmem>>, vector<64x32xbf16>
    %cst_89 = arith.constant dense<0.000000e+00> : vector<32x32xf32>
    %92 = tpu.matmul %90, %91, %cst_89 {dimension_numbers = #tpu.dot_dimension_numbers<[1], [0], [0], [1], [0, 0, 1, 1], [], []>} : vector<32x64xbf16>, vector<64x32xbf16>, vector<32x32xf32> -> vector<32x32xf32>
    %93 = arith.addf %92, %88 : vector<32x32xf32>
    %c0_90 = arith.constant 0 : index
    %c0_91 = arith.constant 0 : index
    %94 = vector.load %arg14[%c0_90, %c0_91] : memref<1x32xf32, #tpu.memory_space<vmem>>, vector<1x32xf32>
    %95 = vector.broadcast %94 : vector<1x32xf32> to vector<32x32xf32>
    %96 = arith.addf %93, %95 : vector<32x32xf32>
    %c0_92 = arith.constant 0 : index
    %c0_93 = arith.constant 0 : index
    %c0_94 = arith.constant 0 : index
    %97 = vector.load %arg10[%c0_92, %c0_93, %c0_94] : memref<1x1x32xf32, #tpu.memory_space<vmem>>, vector<1x1x32xf32>
    %98 = vector.shape_cast %97 : vector<1x1x32xf32> to vector<1x32xf32>
    %99 = vector.broadcast %98 : vector<1x32xf32> to vector<32x32xf32>
    %100 = arith.mulf %96, %99 : vector<32x32xf32>
    %c0_95 = arith.constant 0 : index
    %c0_96 = arith.constant 0 : index
    %c0_97 = arith.constant 0 : index
    %101 = vector.load %arg11[%c0_95, %c0_96, %c0_97] : memref<1x1x32xf32, #tpu.memory_space<vmem>>, vector<1x1x32xf32>
    %102 = vector.shape_cast %101 : vector<1x1x32xf32> to vector<1x32xf32>
    %103 = vector.broadcast %102 : vector<1x32xf32> to vector<32x32xf32>
    %104 = arith.addf %100, %103 : vector<32x32xf32>
    %cst_98 = arith.constant 0.000000e+00 : f32
    %105 = vector.broadcast %cst_98 : f32 to vector<32x32xf32>
    %106 = arith.cmpf oge, %104, %105 : vector<32x32xf32>
    %c0_99 = arith.constant 0 : index
    %c0_100 = arith.constant 0 : index
    %107 = vector.load %arg17[%c0_99, %c0_100] : memref<1x1xf32, #tpu.memory_space<vmem>>, vector<1x1xf32>
    %108 = vector.broadcast %107 : vector<1x1xf32> to vector<32x32xf32>
    %109 = arith.mulf %108, %104 : vector<32x32xf32>
    %110 = arith.select %106, %104, %109 : vector<32x32xi1>, vector<32x32xf32>
    %111 = arith.truncf %110 : vector<32x32xf32> to vector<32x32xbf16>
    %cst_101 = arith.constant 0.000000e+00 : bf16
    %112 = vector.broadcast %cst_101 : bf16 to vector<28x128xbf16>
    %c4_102 = arith.constant 4 : index
    %c0_103 = arith.constant 0 : index
    %113 = vector.load %arg22[%c4_102, %c0_103] : memref<88x128xbf16, #tpu.memory_space<vmem>>, vector<28x128xbf16>
    tpu.vector_store %arg22[%c4_102, %c0_103], %112 {strides = array<i32>} : memref<88x128xbf16, #tpu.memory_space<vmem>>, vector<28x128xbf16>,
    %cst_104 = arith.constant 0.000000e+00 : bf16
    %114 = vector.broadcast %cst_104 : bf16 to vector<32x128xbf16>
    %c52 = arith.constant 52 : index
    %c0_105 = arith.constant 0 : index
    %115 = vector.load %arg22[%c52, %c0_105] : memref<88x128xbf16, #tpu.memory_space<vmem>>, vector<32x128xbf16>
    tpu.vector_store %arg22[%c52, %c0_105], %114 {strides = array<i32>} : memref<88x128xbf16, #tpu.memory_space<vmem>>, vector<32x128xbf16>,
    %c32_106 = arith.constant 32 : index
    %c0_107 = arith.constant 0 : index
    %116 = vector.load %arg22[%c32_106, %c0_107] : memref<88x128xbf16, #tpu.memory_space<vmem>>, vector<32x32xbf16>
    tpu.vector_store %arg22[%c32_106, %c0_107], %111 {strides = array<i32>} : memref<88x128xbf16, #tpu.memory_space<vmem>>, vector<32x32xbf16>,
    %c28 = arith.constant 28 : index
    %c32_108 = arith.constant 32 : index
    %117 = vector.load %arg22[%c28, %c32_108] : memref<88x128xbf16, #tpu.memory_space<vmem>>, vector<32x32xbf16>
    tpu.vector_store %arg22[%c28, %c32_108], %111 {strides = array<i32>} : memref<88x128xbf16, #tpu.memory_space<vmem>>, vector<32x32xbf16>,
    %c24 = arith.constant 24 : index
    %c64_109 = arith.constant 64 : index
    %118 = vector.load %arg22[%c24, %c64_109] : memref<88x128xbf16, #tpu.memory_space<vmem>>, vector<32x32xbf16>
    tpu.vector_store %arg22[%c24, %c64_109], %111 {strides = array<i32>} : memref<88x128xbf16, #tpu.memory_space<vmem>>, vector<32x32xbf16>,
    %c20 = arith.constant 20 : index
    %c96_110 = arith.constant 96 : index
    %119 = vector.load %arg22[%c20, %c96_110] : memref<88x128xbf16, #tpu.memory_space<vmem>>, vector<32x32xbf16>
    tpu.vector_store %arg22[%c20, %c96_110], %111 {strides = array<i32>} : memref<88x128xbf16, #tpu.memory_space<vmem>>, vector<32x32xbf16>,
    %c4_111 = arith.constant 4 : index
    %c0_112 = arith.constant 0 : index
    %120 = vector.load %arg22[%c4_111, %c0_112] : memref<88x128xbf16, #tpu.memory_space<vmem>>, vector<32x128xbf16>
    %c0_113 = arith.constant 0 : index
    %c0_114 = arith.constant 0 : index
    %c0_115 = arith.constant 0 : index
    %121 = vector.load %arg5[%c0_113, %c0_114, %c0_115] : memref<4x128x32xbf16, #tpu.memory_space<vmem>>, vector<1x128x32xbf16>
    %122 = vector.shape_cast %121 : vector<1x128x32xbf16> to vector<128x32xbf16>
    %cst_116 = arith.constant dense<0.000000e+00> : vector<32x32xf32>
    %123 = tpu.matmul %120, %122, %cst_116 {dimension_numbers = #tpu.dot_dimension_numbers<[1], [0], [0], [1], [0, 0, 1, 1], [], []>} : vector<32x128xbf16>, vector<128x32xbf16>, vector<32x32xf32> -> vector<32x32xf32>
    %c20_117 = arith.constant 20 : index
    %c0_118 = arith.constant 0 : index
    %124 = vector.load %arg22[%c20_117, %c0_118] : memref<88x128xbf16, #tpu.memory_space<vmem>>, vector<32x128xbf16>
    %c1_119 = arith.constant 1 : index
    %c0_120 = arith.constant 0 : index
    %c0_121 = arith.constant 0 : index
    %125 = vector.load %arg5[%c1_119, %c0_120, %c0_121] : memref<4x128x32xbf16, #tpu.memory_space<vmem>>, vector<1x128x32xbf16>
    %126 = vector.shape_cast %125 : vector<1x128x32xbf16> to vector<128x32xbf16>
    %cst_122 = arith.constant dense<0.000000e+00> : vector<32x32xf32>
    %127 = tpu.matmul %124, %126, %cst_122 {dimension_numbers = #tpu.dot_dimension_numbers<[1], [0], [0], [1], [0, 0, 1, 1], [], []>} : vector<32x128xbf16>, vector<128x32xbf16>, vector<32x32xf32> -> vector<32x32xf32>
    %128 = arith.addf %123, %127 : vector<32x32xf32>
    %c36 = arith.constant 36 : index
    %c0_123 = arith.constant 0 : index
    %129 = vector.load %arg22[%c36, %c0_123] : memref<88x128xbf16, #tpu.memory_space<vmem>>, vector<32x128xbf16>
    %c2_124 = arith.constant 2 : index
    %c0_125 = arith.constant 0 : index
    %c0_126 = arith.constant 0 : index
    %130 = vector.load %arg5[%c2_124, %c0_125, %c0_126] : memref<4x128x32xbf16, #tpu.memory_space<vmem>>, vector<1x128x32xbf16>
    %131 = vector.shape_cast %130 : vector<1x128x32xbf16> to vector<128x32xbf16>
    %cst_127 = arith.constant dense<0.000000e+00> : vector<32x32xf32>
    %132 = tpu.matmul %129, %131, %cst_127 {dimension_numbers = #tpu.dot_dimension_numbers<[1], [0], [0], [1], [0, 0, 1, 1], [], []>} : vector<32x128xbf16>, vector<128x32xbf16>, vector<32x32xf32> -> vector<32x32xf32>
    %133 = arith.addf %128, %132 : vector<32x32xf32>
    %c52_128 = arith.constant 52 : index
    %c0_129 = arith.constant 0 : index
    %134 = vector.load %arg22[%c52_128, %c0_129] : memref<88x128xbf16, #tpu.memory_space<vmem>>, vector<32x128xbf16>
    %c3_130 = arith.constant 3 : index
    %c0_131 = arith.constant 0 : index
    %c0_132 = arith.constant 0 : index
    %135 = vector.load %arg5[%c3_130, %c0_131, %c0_132] : memref<4x128x32xbf16, #tpu.memory_space<vmem>>, vector<1x128x32xbf16>
    %136 = vector.shape_cast %135 : vector<1x128x32xbf16> to vector<128x32xbf16>
    %cst_133 = arith.constant dense<0.000000e+00> : vector<32x32xf32>
    %137 = tpu.matmul %134, %136, %cst_133 {dimension_numbers = #tpu.dot_dimension_numbers<[1], [0], [0], [1], [0, 0, 1, 1], [], []>} : vector<32x128xbf16>, vector<128x32xbf16>, vector<32x32xf32> -> vector<32x32xf32>
    %138 = arith.addf %133, %137 : vector<32x32xf32>
    %c0_134 = arith.constant 0 : index
    %c0_135 = arith.constant 0 : index
    %c0_136 = arith.constant 0 : index
    %139 = vector.load %arg12[%c0_134, %c0_135, %c0_136] : memref<1x1x32xf32, #tpu.memory_space<vmem>>, vector<1x1x32xf32>
    %140 = vector.shape_cast %139 : vector<1x1x32xf32> to vector<1x32xf32>
    %141 = vector.broadcast %140 : vector<1x32xf32> to vector<32x32xf32>
    %142 = arith.mulf %138, %141 : vector<32x32xf32>
    %c0_137 = arith.constant 0 : index
    %c0_138 = arith.constant 0 : index
    %c0_139 = arith.constant 0 : index
    %143 = vector.load %arg13[%c0_137, %c0_138, %c0_139] : memref<1x1x32xf32, #tpu.memory_space<vmem>>, vector<1x1x32xf32>
    %144 = vector.shape_cast %143 : vector<1x1x32xf32> to vector<1x32xf32>
    %145 = vector.broadcast %144 : vector<1x32xf32> to vector<32x32xf32>
    %146 = arith.addf %142, %145 : vector<32x32xf32>
    %cst_140 = arith.constant 0.000000e+00 : f32
    %147 = vector.broadcast %cst_140 : f32 to vector<32x32xf32>
    %148 = arith.cmpf oge, %146, %147 : vector<32x32xf32>
    %c0_141 = arith.constant 0 : index
    %c0_142 = arith.constant 0 : index
    %149 = vector.load %arg18[%c0_141, %c0_142] : memref<1x1xf32, #tpu.memory_space<vmem>>, vector<1x1xf32>
    %150 = vector.broadcast %149 : vector<1x1xf32> to vector<32x32xf32>
    %151 = arith.mulf %150, %146 : vector<32x32xf32>
    %152 = arith.select %148, %146, %151 : vector<32x32xi1>, vector<32x32xf32>
    %153 = arith.truncf %152 : vector<32x32xf32> to vector<32x32xbf16>
    %cst_143 = arith.constant 0.000000e+00 : bf16
    %154 = vector.broadcast %cst_143 : bf16 to vector<56x128xbf16>
    %c8 = arith.constant 8 : index
    %c0_144 = arith.constant 0 : index
    %155 = vector.load %arg23[%c8, %c0_144] : memref<136x128xbf16, #tpu.memory_space<vmem>>, vector<56x128xbf16>
    tpu.vector_store %arg23[%c8, %c0_144], %154 {strides = array<i32>} : memref<136x128xbf16, #tpu.memory_space<vmem>>, vector<56x128xbf16>,
    %cst_145 = arith.constant 0.000000e+00 : bf16
    %156 = vector.broadcast %cst_145 : bf16 to vector<64x128xbf16>
    %c72 = arith.constant 72 : index
    %c0_146 = arith.constant 0 : index
    %157 = vector.load %arg23[%c72, %c0_146] : memref<136x128xbf16, #tpu.memory_space<vmem>>, vector<64x128xbf16>
    tpu.vector_store %arg23[%c72, %c0_146], %156 {strides = array<i32>} : memref<136x128xbf16, #tpu.memory_space<vmem>>, vector<64x128xbf16>,
    %c64_147 = arith.constant 64 : index
    %c0_148 = arith.constant 0 : index
    %158 = vector.load %arg23[%c64_147, %c0_148] : memref<136x128xbf16, #tpu.memory_space<vmem>>, vector<32x32xbf16>
    tpu.vector_store %arg23[%c64_147, %c0_148], %153 {strides = array<i32>} : memref<136x128xbf16, #tpu.memory_space<vmem>>, vector<32x32xbf16>,
    %c56 = arith.constant 56 : index
    %c32_149 = arith.constant 32 : index
    %159 = vector.load %arg23[%c56, %c32_149] : memref<136x128xbf16, #tpu.memory_space<vmem>>, vector<32x32xbf16>
    tpu.vector_store %arg23[%c56, %c32_149], %153 {strides = array<i32>} : memref<136x128xbf16, #tpu.memory_space<vmem>>, vector<32x32xbf16>,
    %c48 = arith.constant 48 : index
    %c64_150 = arith.constant 64 : index
    %160 = vector.load %arg23[%c48, %c64_150] : memref<136x128xbf16, #tpu.memory_space<vmem>>, vector<32x32xbf16>
    tpu.vector_store %arg23[%c48, %c64_150], %153 {strides = array<i32>} : memref<136x128xbf16, #tpu.memory_space<vmem>>, vector<32x32xbf16>,
    %c40 = arith.constant 40 : index
    %c96_151 = arith.constant 96 : index
    %161 = vector.load %arg23[%c40, %c96_151] : memref<136x128xbf16, #tpu.memory_space<vmem>>, vector<32x32xbf16>
    tpu.vector_store %arg23[%c40, %c96_151], %153 {strides = array<i32>} : memref<136x128xbf16, #tpu.memory_space<vmem>>, vector<32x32xbf16>,
    %c8_152 = arith.constant 8 : index
    %c0_153 = arith.constant 0 : index
    %162 = vector.load %arg23[%c8_152, %c0_153] : memref<136x128xbf16, #tpu.memory_space<vmem>>, vector<32x128xbf16>
    %c0_154 = arith.constant 0 : index
    %c0_155 = arith.constant 0 : index
    %c0_156 = arith.constant 0 : index
    %163 = vector.load %arg6[%c0_154, %c0_155, %c0_156] : memref<4x128x32xbf16, #tpu.memory_space<vmem>>, vector<1x128x32xbf16>
    %164 = vector.shape_cast %163 : vector<1x128x32xbf16> to vector<128x32xbf16>
    %cst_157 = arith.constant dense<0.000000e+00> : vector<32x32xf32>
    %165 = tpu.matmul %162, %164, %cst_157 {dimension_numbers = #tpu.dot_dimension_numbers<[1], [0], [0], [1], [0, 0, 1, 1], [], []>} : vector<32x128xbf16>, vector<128x32xbf16>, vector<32x32xf32> -> vector<32x32xf32>
    %c40_158 = arith.constant 40 : index
    %c0_159 = arith.constant 0 : index
    %166 = vector.load %arg23[%c40_158, %c0_159] : memref<136x128xbf16, #tpu.memory_space<vmem>>, vector<32x128xbf16>
    %c1_160 = arith.constant 1 : index
    %c0_161 = arith.constant 0 : index
    %c0_162 = arith.constant 0 : index
    %167 = vector.load %arg6[%c1_160, %c0_161, %c0_162] : memref<4x128x32xbf16, #tpu.memory_space<vmem>>, vector<1x128x32xbf16>
    %168 = vector.shape_cast %167 : vector<1x128x32xbf16> to vector<128x32xbf16>
    %cst_163 = arith.constant dense<0.000000e+00> : vector<32x32xf32>
    %169 = tpu.matmul %166, %168, %cst_163 {dimension_numbers = #tpu.dot_dimension_numbers<[1], [0], [0], [1], [0, 0, 1, 1], [], []>} : vector<32x128xbf16>, vector<128x32xbf16>, vector<32x32xf32> -> vector<32x32xf32>
    %170 = arith.addf %165, %169 : vector<32x32xf32>
    %c72_164 = arith.constant 72 : index
    %c0_165 = arith.constant 0 : index
    %171 = vector.load %arg23[%c72_164, %c0_165] : memref<136x128xbf16, #tpu.memory_space<vmem>>, vector<32x128xbf16>
    %c2_166 = arith.constant 2 : index
    %c0_167 = arith.constant 0 : index
    %c0_168 = arith.constant 0 : index
    %172 = vector.load %arg6[%c2_166, %c0_167, %c0_168] : memref<4x128x32xbf16, #tpu.memory_space<vmem>>, vector<1x128x32xbf16>
    %173 = vector.shape_cast %172 : vector<1x128x32xbf16> to vector<128x32xbf16>
    %cst_169 = arith.constant dense<0.000000e+00> : vector<32x32xf32>
    %174 = tpu.matmul %171, %173, %cst_169 {dimension_numbers = #tpu.dot_dimension_numbers<[1], [0], [0], [1], [0, 0, 1, 1], [], []>} : vector<32x128xbf16>, vector<128x32xbf16>, vector<32x32xf32> -> vector<32x32xf32>
    %175 = arith.addf %170, %174 : vector<32x32xf32>
    %c104 = arith.constant 104 : index
    %c0_170 = arith.constant 0 : index
    %176 = vector.load %arg23[%c104, %c0_170] : memref<136x128xbf16, #tpu.memory_space<vmem>>, vector<32x128xbf16>
    %c3_171 = arith.constant 3 : index
    %c0_172 = arith.constant 0 : index
    %c0_173 = arith.constant 0 : index
    %177 = vector.load %arg6[%c3_171, %c0_172, %c0_173] : memref<4x128x32xbf16, #tpu.memory_space<vmem>>, vector<1x128x32xbf16>
    %178 = vector.shape_cast %177 : vector<1x128x32xbf16> to vector<128x32xbf16>
    %cst_174 = arith.constant dense<0.000000e+00> : vector<32x32xf32>
    %179 = tpu.matmul %176, %178, %cst_174 {dimension_numbers = #tpu.dot_dimension_numbers<[1], [0], [0], [1], [0, 0, 1, 1], [], []>} : vector<32x128xbf16>, vector<128x32xbf16>, vector<32x32xf32> -> vector<32x32xf32>
    %180 = arith.addf %175, %179 : vector<32x32xf32>
    %c0_175 = arith.constant 0 : index
    %c0_176 = arith.constant 0 : index
    %181 = vector.load %arg15[%c0_175, %c0_176] : memref<1x32xf32, #tpu.memory_space<vmem>>, vector<1x32xf32>
    %182 = vector.broadcast %181 : vector<1x32xf32> to vector<32x32xf32>
    %183 = arith.addf %180, %182 : vector<32x32xf32>
    %184 = arith.addf %183, %96 : vector<32x32xf32>
    %c0_177 = arith.constant 0 : index
    %c0_178 = arith.constant 0 : index
    %c0_179 = arith.constant 0 : index
    %185 = vector.load %arg19[%c0_177, %c0_178, %c0_179] : memref<1x32x32xf32, #tpu.memory_space<vmem>>, vector<1x32x32xf32>
    %186 = vector.shape_cast %185 : vector<1x32x32xf32> to vector<32x32xf32>
    %187 = vector.shape_cast %184 : vector<32x32xf32> to vector<1x32x32xf32>
    tpu.vector_store %arg19[%c0_177, %c0_178, %c0_179], %187 {strides = array<i32>} : memref<1x32x32xf32, #tpu.memory_space<vmem>>, vector<1x32x32xf32>,
    return
  }
  func.func @transform_0(%arg0: i32) -> (i32, i32, i32) {
    %c0_i32 = arith.constant 0 : i32
    %c0_i32_0 = arith.constant 0 : i32
    %c0_i32_1 = arith.constant 0 : i32
    return %arg0, %c0_i32, %c0_i32_0 : i32, i32, i32
  }
  func.func @transform_1(%arg0: i32) -> (i32, i32, i32) {
    %c0_i32 = arith.constant 0 : i32
    %c0_i32_0 = arith.constant 0 : i32
    %c0_i32_1 = arith.constant 0 : i32
    return %arg0, %c0_i32, %c0_i32_0 : i32, i32, i32
  }
  func.func @transform_2(%arg0: i32) -> (i32, i32, i32) {
    %c0_i32 = arith.constant 0 : i32
    %c0_i32_0 = arith.constant 0 : i32
    %c0_i32_1 = arith.constant 0 : i32
    %c0_i32_2 = arith.constant 0 : i32
    return %c0_i32, %c0_i32_0, %c0_i32_1 : i32, i32, i32
  }
  func.func @transform_3(%arg0: i32) -> (i32, i32, i32) {
    %c0_i32 = arith.constant 0 : i32
    %c0_i32_0 = arith.constant 0 : i32
    %c0_i32_1 = arith.constant 0 : i32
    %c0_i32_2 = arith.constant 0 : i32
    return %c0_i32, %c0_i32_0, %c0_i32_1 : i32, i32, i32
  }
  func.func @transform_4(%arg0: i32) -> (i32, i32, i32) {
    %c0_i32 = arith.constant 0 : i32
    %c0_i32_0 = arith.constant 0 : i32
    %c0_i32_1 = arith.constant 0 : i32
    %c0_i32_2 = arith.constant 0 : i32
    return %c0_i32, %c0_i32_0, %c0_i32_1 : i32, i32, i32
  }
  func.func @transform_5(%arg0: i32) -> (i32, i32, i32) {
    %c0_i32 = arith.constant 0 : i32
    %c0_i32_0 = arith.constant 0 : i32
    %c0_i32_1 = arith.constant 0 : i32
    %c0_i32_2 = arith.constant 0 : i32
    return %c0_i32, %c0_i32_0, %c0_i32_1 : i32, i32, i32
  }
  func.func @transform_6(%arg0: i32) -> (i32, i32) {
    %c0_i32 = arith.constant 0 : i32
    %c0_i32_0 = arith.constant 0 : i32
    %c0_i32_1 = arith.constant 0 : i32
    return %c0_i32, %c0_i32_0 : i32, i32
  }
  func.func @transform_7(%arg0: i32) -> (i32, i32, i32) {
    %c0_i32 = arith.constant 0 : i32
    %c0_i32_0 = arith.constant 0 : i32
    %c0_i32_1 = arith.constant 0 : i32
    return %arg0, %c0_i32, %c0_i32_0 : i32, i32, i32
  }
  func.func @transform_8(%arg0: i32) -> (i32, i32, i32) {
    %c0_i32 = arith.constant 0 : i32
    %c0_i32_0 = arith.constant 0 : i32
    %c0_i32_1 = arith.constant 0 : i32
    return %arg0, %c0_i32, %c0_i32_0 : i32, i32, i32
  }
  func.func @transform_9(%arg0: i32) -> (i32, i32, i32) {
    %c0_i32 = arith.constant 0 : i32
    %c0_i32_0 = arith.constant 0 : i32
    %c0_i32_1 = arith.constant 0 : i32
    return %arg0, %c0_i32, %c0_i32_0 : i32, i32, i32
  }
  func.func @transform_10(%arg0: i32) -> (i32, i32, i32) {
    %c0_i32 = arith.constant 0 : i32
    %c0_i32_0 = arith.constant 0 : i32
    %c0_i32_1 = arith.constant 0 : i32
    return %arg0, %c0_i32, %c0_i32_0 : i32, i32, i32
  }
  func.func @transform_11(%arg0: i32) -> (i32, i32, i32) {
    %c0_i32 = arith.constant 0 : i32
    %c0_i32_0 = arith.constant 0 : i32
    %c0_i32_1 = arith.constant 0 : i32
    return %arg0, %c0_i32, %c0_i32_0 : i32, i32, i32
  }
  func.func @transform_12(%arg0: i32) -> (i32, i32, i32) {
    %c0_i32 = arith.constant 0 : i32
    %c0_i32_0 = arith.constant 0 : i32
    %c0_i32_1 = arith.constant 0 : i32
    return %arg0, %c0_i32, %c0_i32_0 : i32, i32, i32
  }
  func.func @transform_13(%arg0: i32) -> (i32, i32) {
    %c0_i32 = arith.constant 0 : i32
    %c0_i32_0 = arith.constant 0 : i32
    %c0_i32_1 = arith.constant 0 : i32
    return %c0_i32, %c0_i32_0 : i32, i32
  }
  func.func @transform_14(%arg0: i32) -> (i32, i32) {
    %c0_i32 = arith.constant 0 : i32
    %c0_i32_0 = arith.constant 0 : i32
    %c0_i32_1 = arith.constant 0 : i32
    return %c0_i32, %c0_i32_0 : i32, i32
  }
  func.func @transform_15(%arg0: i32) -> (i32, i32) {
    %c0_i32 = arith.constant 0 : i32
    %c0_i32_0 = arith.constant 0 : i32
    %c0_i32_1 = arith.constant 0 : i32
    return %c0_i32, %c0_i32_0 : i32, i32
  }
  func.func @transform_16(%arg0: i32) -> (i32, i32) {
    %c0_i32 = arith.constant 0 : i32
    %c0_i32_0 = arith.constant 0 : i32
    %c0_i32_1 = arith.constant 0 : i32
    return %c0_i32, %c0_i32_0 : i32, i32
  }
  func.func @transform_17(%arg0: i32) -> (i32, i32) {
    %c0_i32 = arith.constant 0 : i32
    %c0_i32_0 = arith.constant 0 : i32
    %c0_i32_1 = arith.constant 0 : i32
    return %c0_i32, %c0_i32_0 : i32, i32
  }
  func.func @transform_18(%arg0: i32) -> (i32, i32, i32) {
    %c0_i32 = arith.constant 0 : i32
    %c0_i32_0 = arith.constant 0 : i32
    %c0_i32_1 = arith.constant 0 : i32
    return %arg0, %c0_i32, %c0_i32_0 : i32, i32, i32
  }
}

</mosaic_0001>

<bundles_post_ra>
// kernel: decoder_block_forward.2
= control target key start
LH: loop header
LB: loop body
LE: loop exit
PB: predicated region body
PF: predicated region fallthrough
CT: control target
= control target key end

     0   :  { %s1492_s11 = smov 0   ;;  %s1725_s0 = inlined_call_operand.vmem [shape: f32[2,16,64], index: 0, kind: input, shape index: {}]   ;;  %s1726_s1 = inlined_call_operand.vmem [shape: f32[2,1,64], index: 1, kind: input, shape index: {}]   ;;  %s1727_s2 = inlined_call_operand.vmem [shape: f32[2,1,64], index: 2, kind: input, shape index: {}]   ;;  %s1728_s3 = inlined_call_operand.<no memory space> [shape: f32[1,1], index: 3, kind: input, shape index: {}]   ;;  %s1729_s4 = inlined_call_operand.vmem [shape: bf16[2,128,64], index: 4, kind: input, shape index: {}]   ;;  %s1730_s5 = inlined_call_operand.vmem [shape: f32[1,64], index: 5, kind: input, shape index: {}]   ;;  %s1731_s6 = inlined_call_operand.vmem [shape: bf16[2,128,64], index: 6, kind: input, shape index: {}]   ;;  %s1732_s7 = inlined_call_operand.vmem [shape: f32[1,64], index: 7, kind: input, shape index: {}]   ;;  %s1733_s8 = inlined_call_operand.vmem [shape: bf16[2,16,128], index: 8, kind: output, shape index: {0}]   ;;  %s1734_s9 = inlined_call_operand.vmem [shape: bf16[2,16,128], index: 9, kind: output, shape index: {1}]  }
   0x1   :  { %v15_v0 = vstv %s1728_s3 }
   0x2   :  { %16 = vst [vmem:[#allocation3] sm:$0x1] %v15_v0 }
   0x3 LB: > { %s1159_s12 = sadd.s32 4294967295, %s1433_s11   ;;  %p1163_p0 = scmp.ge.s32.totalorder %s1433_s11, 1  ;;  %s1433_s11 = sphi %s1492_s11, %s22_s11  }
   0x4   : > { %p308_p1 = scmp.lt.s32.totalorder %s1433_s11, 3 }
   0x6   : > { %p309_p2 = pnand %p1163_p0, %p308_p1 }
   0x7   : > { %v1435_v2 = vmov (!%p309_p2), 0   ;;  %vm377_vm0 = vcmask (!%p309_p2), 1040384   ;;  %vm378_vm1 = vsmask.f32 (!%p309_p2), 256  ;;  %v380_v3 = vld [vmem:[#allocation2] sm:$0x1] (!%p309_p2) }
   0x8   : > { %312 = sbr.rel (%p309_p2) target bundleno = 653 (0x28d), region = 52  ;;  %1390 = vset.pattern.permute.xlu0 (!%p309_p2), %v1435_v2  ;;  %vm379_vm2 = vmand (!%p309_p2), %vm377_vm0, %vm378_vm1  ;;  %v383_v5 = vld [vmem:[#allocation2 + $0x8] sm:$0x1] (!%p309_p2)  ;;  %v1391_v7 = vld [vmem:[%s1729_s4] sm:$0xff] (!%p309_p2)   ;;  %v1436_v8 = vmov (!%p309_p2), 0.0   ;;  %p355_p3 = scmp.lt.s32.totalorder (!%p309_p2), %s1159_s12, 1 }
   0x9   : > { %v1172_v1 = vld [vmem:[#allocation3] ss:$0 sm:$0xff] (!%p309_p2)  ;;  %v381_v4 = vsel (!%p309_p2), %vm379_vm2, 0, %v380_v3  ;;  %v384_v6 = vsel (!%p309_p2), %vm379_vm2, 0, %v383_v5  ;;  %1298 = vmatprep.subr.bf16.mxu0 (!%p309_p2), %v1436_v8  ;;  %1318 = vmatprep.subr.bf16.mxu1 (!%p309_p2), %v1436_v8  ;;  %v1394_v9 = vld [vmem:[%s1729_s4 + $0x40] sm:$0xff] (!%p309_p2)   ;;  %v1393_v12 = vld [vmem:[%s1729_s4 + $0x10] sm:$0xff] (!%p309_p2)  }
   0xa   : > { %415 = vperm.xlu0 (!%p309_p2), %1390, %v1172_v1   ;;  %382 = vst [vmem:[#allocation2] sm:$0x1] (!%p309_p2), %v381_v4  ;;  %385 = vst [vmem:[#allocation2 + $0x8] sm:$0x1] (!%p309_p2), %v384_v6  ;;  %1299 = vmatpush3.bf16.msra.mxu0 (!%p309_p2), %v1391_v7  ;;  %v1392_v10 = vld [vmem:[%s1729_s4 + $0x8] sm:$0xff] (!%p309_p2)   ;;  %v1398_v13 = vld [vmem:[%s1729_s4 + $0x50] sm:$0xff] (!%p309_p2)  }
   0xb   : > { %1300 = vmatprep.subr.bf16.mxu0 (!%p309_p2), %v1436_v8  ;;  %1319 = vmatpush3.bf16.msra.mxu1 (!%p309_p2), %v1394_v9  ;;  %v1396_v11 = vld [vmem:[%s1729_s4 + $0x48] sm:$0xff] (!%p309_p2)   ;;  %v1395_v14 = vld [vmem:[%s1729_s4 + $0x18] sm:$0xff] (!%p309_p2)   ;;  %v1397_v15 = vld [vmem:[%s1729_s4 + $0x20] sm:$0xff] (!%p309_p2)   ;;  %vm430_vm5 = vcmask (!%p309_p2), 519168   ;;  %vm433_vm6 = vsmask.f32 (!%p309_p2), 4368 }
   0xc   : > { %1320 = vmatprep.subr.bf16.mxu1 (!%p309_p2), %v1436_v8  ;;  %v1399_v16 = vld [vmem:[%s1729_s4 + $0x28] sm:$0xff] (!%p309_p2)   ;;  %v1400_v25 = vld [vmem:[%s1729_s4 + $0x58] sm:$0xff] (!%p309_p2)   ;;  %v1401_v28 = vld [vmem:[%s1729_s4 + $0x30] sm:$0xff] (!%p309_p2)   ;;  %vm1437_vm8 = vmmov (!%p309_p2), 0   ;;  %s1438_s3 = smov (!%p309_p2), 64   ;;  %vm461_vm9 = vcmask (!%p309_p2), 1043968  }
   0xd   : > { %v1402_v31 = vld [vmem:[%s1729_s4 + $0x60] sm:$0xff] (!%p309_p2)   ;;  %v1403_v38 = vld [vmem:[%s1729_s4 + $0x38] sm:$0xff] (!%p309_p2)   ;;  %v1404_v39 = vld [vmem:[%s1729_s4 + $0x68] sm:$0xff] (!%p309_p2)   ;;  %1314 = vmatprep.mubr.msk.bf16.mxu0 (!%p309_p2), %vm1437_vm8, %v1436_v8  ;;  %1334 = vmatprep.mubr.msk.bf16.mxu1 (!%p309_p2), %vm1437_vm8, %v1436_v8  ;;  %vm462_vm10 = vsmask.f32 (!%p309_p2), 7938  ;;  %vm469_vm12 = vcmask (!%p309_p2), 1040896  }
   0xe   : > { %1301 = vmatpush3.bf16.msra.mxu0 (!%p309_p2), %v1392_v10  ;;  %vm1588_vm7 = vmor (!%p309_p2), %vm378_vm1, %vm433_vm6  ;;  %v1406_v54 = vld [vmem:[%s1729_s4 + $0x70] sm:$0xff] (!%p309_p2)   ;;  %v1408_v60 = vld [vmem:[%s1729_s4 + $0x78] sm:$0xff] (!%p309_p2)   ;;  %vm623_vm14 = vsmask.f32 (!%p309_p2), 7424  ;;  %vm730_vm15 = vcmask (!%p309_p2), 523264  }
   0xf   : > { %1302 = vmatprep.subr.bf16.mxu0 %v1436_v8  ;;  %1321 = vmatpush3.bf16.msra.mxu1 %v1396_v11  ;;  %s1742_s12 = smov (!%p355_p3, %s1159_s12), 1  ;;  %vm1616_vm11 = vmand %vm461_vm9, %vm462_vm10  ;;  %v1405_v11 = vld [vmem:[%s1731_s6] sm:$0xff]  }
  0x10   : > { %1322 = vmatprep.subr.bf16.mxu1 %v1436_v8  ;;  %s1255_s30 = sshll.u32 %s1742_s12, 4  ;;  %s362_s16 = scalar_lea.vmem %s1726_s1, %s1742_s12  ;;  %vm1624_vm13 = vmand %vm469_vm12, %vm378_vm1 }
  0x11   : > { %s359_s13 = scalar_lea.vmem %s1725_s0, %s1255_s30  ;;  %v1170_v19 = vld [vmem:[%s362_s16] ss:$0 sm:$0xff]  ;;  %s365_s19 = scalar_lea.vmem %s1727_s2, %s1742_s12  ;;  %v471_v6 = vld [vmem:[#allocation2 + $0x8] sm:$0x1] }
  0x12   : > { %1303 = vmatpush3.bf16.msra.mxu0 %v1393_v12  ;;  %v386_v17 = vld [vmem:[%s359_s13] sm:$0xff]  ;;  %v387_v18 = vld [vmem:[%s359_s13 + $0x8] sm:$0xff]  ;;  %s1256_s13 = sshll.u32 %s1742_s12, 3 }
  0x13   : > { %1304 = vmatprep.subr.bf16.mxu0 %v1436_v8  ;;  %1323 = vmatpush3.bf16.msra.mxu1 %v1398_v13  ;;  %v395_v20 = vmul.f32 %v1170_v19, %v386_v17  ;;  %v396_v21 = vmul.f32 %v1170_v19, %v387_v18  ;;  %v1171_v22 = vld [vmem:[%s365_s19] ss:$0 sm:$0xff]  ;;  %v1560_v26 = vpack.c.bf16 %v386_v17, %v386_v17  ;;  %s370_s16 = scalar_lea.vmem %s1733_s8, %s1256_s13  ;;  %s375_s19 = scalar_lea.vmem %s1734_s9, %s1256_s13 }
  0x14   : > { %1324 = vmatprep.subr.bf16.mxu1 %v1436_v8  ;;  %v1569_v34 = vpack.c.bf16 %v387_v18, %v387_v18 }
  0x15   : > { %v404_v23 = vadd.f32 %v1171_v22, %v395_v20  ;;  %v405_v24 = vadd.f32 %v1171_v22, %v396_v21  ;;  %v754_v35 = vshrl.u32 %v1560_v26, 16  ;;  %v757_v44 = vshll.u32 %v1560_v26, 16  ;;  %v1407_v20 = vld [vmem:[%s1731_s6 + $0x8] sm:$0xff]  }
  0x16   : > { %1305 = vmatpush3.bf16.msra.mxu0 %v1395_v14  ;;  %v762_v45 = vshrl.u32 %v1569_v34, 16  ;;  %v765_v53 = vshll.u32 %v1569_v34, 16 }
  0x17   : > { %1306 = vmatprep.subr.bf16.mxu0 %v1436_v8  ;;  %1325 = vmatpush3.bf16.msra.mxu1 %v1400_v25  ;;  %vm406_vm3 = vcmp.ge.f32.partialorder %v404_v23, 0.0  ;;  %vm407_vm4 = vcmp.ge.f32.partialorder %v405_v24, 0.0  ;;  %v756_v43 = vrot.slane %v754_v35, 7  ;;  %v1412_v35 = vld [vmem:[%s1731_s6 + $0x18] sm:$0xff]  }
  0x18   : > { %1326 = vmatprep.subr.bf16.mxu1 %v1436_v8  ;;  %v764_v57 = vrot.slane %v762_v45, 7  ;;  %v1421_v45 = vld [vmem:[%s1731_s6 + $0x68] sm:$0xff]  }
  0x19   : > { %v759_v56 = vor.u32 %v757_v44, %v756_v43  ;;  %v760_v58 = vrot.slane %v756_v43, 4  ;;  %v1420_v43 = vld [vmem:[%s1731_s6 + $0x38] sm:$0xff]  }
  0x1a   : > { %1307 = vmatpush3.bf16.msra.mxu0 %v1397_v15  ;;  %v767_v59 = vor.u32 %v765_v53, %v764_v57  ;;  %v769_v62 = vrot.slane %v764_v57, 4  ;;  %v1175_v57 = vld [vmem:[%s1730_s5] ss:$0 sm:$0xff] }
  0x1b   : > { %1308 = vmatprep.subr.bf16.mxu0 %v1436_v8  ;;  %1327 = vmatpush3.bf16.msra.mxu1 %v1402_v31 }
  0x1c   : > { %1328 = vmatprep.subr.bf16.mxu1 %v1436_v8  ;;  %v768_v63 = vsel %vm1588_vm7, %v760_v58, %v767_v59 }
  0x1e   : > { %1309 = vmatpush3.bf16.msra.mxu0 %v1399_v16 }
  0x1f   : > { %1310 = vmatprep.subr.bf16.mxu0 %v1436_v8  ;;  %1329 = vmatpush3.bf16.msra.mxu1 %v1404_v39  ;;  %v1416_v39 = vld [vmem:[%s1731_s6 + $0x28] sm:$0xff]  }
  0x20   : > { %1330 = vmatprep.subr.bf16.mxu1 %v1436_v8 }
  0x22   : > { %1311 = vmatpush3.bf16.msra.mxu0 %v1401_v28 }
  0x23   : > { %1312 = vmatprep.subr.bf16.mxu0 %v1436_v8  ;;  %1331 = vmatpush3.bf16.msra.mxu1 %v1406_v54 }
  0x24   : > { %1332 = vmatprep.subr.bf16.mxu1 %v1436_v8 }
  0x26   : > { %1313 = vmatpush3.bf16.msra.mxu0 %v1403_v38  ;;  %v1415_v38 = vld [vmem:[%s1731_s6 + $0x50] sm:$0xff]  }
  0x27   : > { %1338 = vmatprep.subr.bf16.mxu0 %v1436_v8  ;;  %1333 = vmatpush3.bf16.msra.mxu1 %v1408_v60 }
  0x28   : > { %1358 = vmatprep.subr.bf16.mxu1 %v1436_v8 }
  0x89   : > { %v416_v27 = vpop.permute.xlu0 %415 }
  0x8a   : > { %v418_v29 = vmul.f32 %v416_v27, %v404_v23  ;;  %v419_v30 = vmul.f32 %v416_v27, %v405_v24  ;;  %v1409_v27 = vld [vmem:[%s1731_s6 + $0x10] sm:$0xff]  }
  0x8c   : > { %v420_v32 = vsel %vm406_vm3, %v404_v23, %v418_v29  ;;  %v421_v33 = vsel %vm407_vm4, %v405_v24, %v419_v30 }
  0x8d   : > { %v1258_v36 = vpack.c.bf16 %v420_v32, %v420_v32  ;;  %v1259_v37 = vpack.c.bf16 %v421_v33, %v421_v33  ;;  %v1411_v33 = vld [vmem:[%s1731_s6 + $0x40] sm:$0xff]  }
  0x8f   : > { %v436_v40 = vshrl.u32 %v1258_v36, 16  ;;  %v444_v41 = vshrl.u32 %v1259_v37, 16  ;;  %431 = vst.msk [vmem:[#allocation2] sm:$0xf] %vm430_vm5, %v1258_v36  ;;  %432 = vst.msk [vmem:[#allocation2 + $0x4] sm:$0xf] %vm430_vm5, %v1259_v37 }
  0x90   : > { %v439_v42 = vshll.u32 %v1258_v36, 16  ;;  %v447_v48 = vshll.u32 %v1259_v37, 16  ;;  %v1413_v36 = vld [vmem:[%s1731_s6 + $0x48] sm:$0xff]   ;;  %v1414_v37 = vld [vmem:[%s1731_s6 + $0x20] sm:$0xff]  }
  0x91   : > { %v438_v46 = vrot.slane %v436_v40, 7  ;;  %v446_v47 = vrot.slane %v444_v41, 7  ;;  %v1417_v40 = vld [vmem:[%s1731_s6 + $0x58] sm:$0xff]   ;;  %v1418_v41 = vld [vmem:[%s1731_s6 + $0x30] sm:$0xff]  }
  0x93   : > { %v441_v50 = vor.u32 %v439_v42, %v438_v46  ;;  %v442_v51 = vrot.slane %v438_v46, 4  ;;  %v449_v52 = vor.u32 %v447_v48, %v446_v47  ;;  %v451_v61 = vrot.slane %v446_v47, 4  ;;  %v1419_v42 = vld [vmem:[%s1731_s6 + $0x60] sm:$0xff]   ;;  %v1423_v48 = vld [vmem:[%s1731_s6 + $0x70] sm:$0xff]  }
  0x95   : > { %452 = vrot.lane.b32.xlu0 %v441_v50, %s1438_s3  ;;  %v450_v55 = vsel %vm1588_vm7, %v442_v51, %v449_v52  ;;  %v1424_v52 = vld [vmem:[%s1731_s6 + $0x78] sm:$0xff]  }
  0x96   : > { %454 = vrot.lane.b32.xlu1 %v450_v55, %s1438_s3  ;;  %v464_v2 = vld [vmem:[#allocation2] sm:$0xf] }
  0x99   : > { %770 = vrot.lane.b32.xlu0 %v759_v56, %s1438_s3 }
  0x9a   : > { %456 = vrot.lane.b32.xlu1 %v451_v61, %s1438_s3 }
  0x9d   : > { %774 = vrot.lane.b32.xlu0 %v769_v62, %s1438_s3 }
  0x9e   : > { %772 = vrot.lane.b32.xlu1 %v768_v63, %s1438_s3 }
 0x107   : > { %v453_v1 = vpop.permute.xlu0 %452 }
 0x108   : > { %v465_v3 = vsel %vm1616_vm11, %v453_v1, %v464_v2  ;;  %v455_v4 = vpop.permute.xlu1 %454 }
 0x109   : > { %466 = vst [vmem:[#allocation2] sm:$0xf] %v465_v3  ;;  %468 = vst.msk [vmem:[#allocation2 + $0x4] sm:$0xf] %vm461_vm9, %v455_v4 }
 0x10b   : > { %v771_v10 = vpop.permute.xlu0 %770 }
 0x10c   : > { %v457_v7 = vpop.permute.xlu1 %456 }
 0x10d   : > { %v472_v9 = vsel %vm1624_vm13, %v457_v7, %v471_v6  ;;  %v1215_v7 = vld [vmem:[%s1732_s7] ss:$0 sm:$0xff] }
 0x10e   : > { %473 = vst [vmem:[#allocation2 + $0x8] sm:$0x1] %v472_v9 }
 0x10f   : > { %v775_v19 = vpop.permute.xlu0 %774 }
 0x110   : > { %v474_v12 = vld [vmem:[#allocation2] sm:$0xf]  ;;  %v475_v14 = vld [vmem:[#allocation2 + $0x4] sm:$0xf]  ;;  %v773_v15 = vpop.permute.xlu1 %772 }
 0x111   : > { %v595_v13 = vld [vmem:[#allocation2] sm:$0xf]  ;;  %v1176_v16 = vcombine.low %v474_v12, %v475_v14  ;;  %v596_v17 = vld [vmem:[#allocation2 + $0x4] sm:$0xf] }
 0x112   : > { %751 = vst.msk [vmem:[#allocation2] sm:$0xf] %vm430_vm5, %v1560_v26  ;;  %752 = vst.msk [vmem:[#allocation2 + $0x4] sm:$0xf] %vm430_vm5, %v1569_v34  ;;  %v1201_v18 = vcombine.low %v595_v13, %v596_v17 }
 0x113   : > { %1315 = vmatmul.mubr.bf16.vlgmr.msra.gmra.mrb[0].mxu0 %v1176_v16  ;;  %782 = vst.msk [vmem:[#allocation2 + $0x4] sm:$0xf] %vm461_vm9, %v773_v15 }
 0x114   : > { %1339 = vmatpush3.bf16.msra.mxu0 %v1405_v11  ;;  %v627_v21 = vshll.u32 %v1201_v18, 16  ;;  %1354 = vmatprep.mubr.msk.bf16.mxu0 %vm1437_vm8, %v1436_v8  ;;  %v625_v28 = vshrl.u32 %v1201_v18, 16 }
 0x115   : > { %v783_v22 = vld [vmem:[#allocation2 + $0x8] sm:$0x1]  ;;  %1340 = vmatprep.subr.bf16.mxu0 %v1436_v8 }
 0x116   : > { %v784_v23 = vsel %vm1624_vm13, %v775_v19, %v783_v22  ;;  %v1410_v24 = vld [vmem:[#allocation2 + $0x8] ss:$0 sps:$4 sm:$0x11]   ;;  %v629_v25 = vrot.slane %v627_v21, 1 }
 0x117   : > { %785 = vst [vmem:[#allocation2 + $0x8] sm:$0x1] %v784_v23  ;;  %v632_v29 = vshll.u32 %v1410_v24, 16 }
 0x118   : > { %1341 = vmatpush3.bf16.msra.mxu0 %v1407_v20  ;;  %v630_v31 = vor.u32 %v629_v25, %v625_v28 }
 0x119   : > { %v779_v26 = vld [vmem:[#allocation2] sm:$0xf]  ;;  %1342 = vmatprep.subr.bf16.mxu0 %v1436_v8  ;;  %v634_v32 = vrot.slane %v632_v29, 1 }
 0x11a   : > { %v780_v30 = vsel %vm1616_vm11, %v771_v10, %v779_v26 }
 0x11b   : > { %781 = vst [vmem:[#allocation2] sm:$0xf] %v780_v30  ;;  %v635_v34 = vsel %vm623_vm14, %v630_v31, %v634_v32 }
 0x11c   : > { %1343 = vmatpush3.bf16.msra.mxu0 %v1409_v27  ;;  %1335 = vmatmul.mubr.bf16.vlgmr.msra.gmra.mrb[0].mxu1 %v635_v34 }
 0x11d   : > { %1344 = vmatprep.subr.bf16.mxu0 %v1436_v8  ;;  %1359 = vmatpush3.bf16.msra.mxu1 %v1411_v33 }
 0x11e   : > { %1374 = vmatprep.mubr.msk.bf16.mxu1 %vm1437_vm8, %v1436_v8  ;;  %1360 = vmatprep.subr.bf16.mxu1 %v1436_v8  ;;  %v1426_v49 = vld [vmem:[#allocation2 + $0x8] ss:$0 sps:$4 sm:$0x11]  }
 0x11f   : > { %v943_v53 = vshll.u32 %v1426_v49, 16 }
 0x120   : > { %1345 = vmatpush3.bf16.msra.mxu0 %v1412_v35 }
 0x121   : > { %1346 = vmatprep.subr.bf16.mxu0 %v1436_v8  ;;  %1361 = vmatpush3.bf16.msra.mxu1 %v1413_v36  ;;  %v945_v55 = vrot.slane %v943_v53, 1 }
 0x122   : > { %1362 = vmatprep.subr.bf16.mxu1 %v1436_v8  ;;  %v1425_v44 = vld [vmem:[#allocation2] sm:$0xff]  }
 0x123   : > { %v1422_v46 = vld [vmem:[#allocation2] sm:$0xff]   ;;  %v938_v47 = vshll.u32 %v1425_v44, 16  ;;  %v936_v50 = vshrl.u32 %v1425_v44, 16 }
 0x124   : > { %1347 = vmatpush3.bf16.msra.mxu0 %v1414_v37 }
 0x125   : > { %1348 = vmatprep.subr.bf16.mxu0 %v1436_v8  ;;  %1363 = vmatpush3.bf16.msra.mxu1 %v1415_v38  ;;  %v940_v51 = vrot.slane %v938_v47, 1 }
 0x126   : > { %1364 = vmatprep.subr.bf16.mxu1 %v1436_v8 }
 0x127   : > { %v941_v54 = vor.u32 %v940_v51, %v936_v50 }
 0x128   : > { %1349 = vmatpush3.bf16.msra.mxu0 %v1416_v39 }
 0x129   : > { %1350 = vmatprep.subr.bf16.mxu0 %v1436_v8  ;;  %1365 = vmatpush3.bf16.msra.mxu1 %v1417_v40  ;;  %v946_v56 = vsel %vm623_vm14, %v941_v54, %v945_v55 }
 0x12a   : > { %1366 = vmatprep.subr.bf16.mxu1 %v1436_v8 }
 0x12c   : > { %1351 = vmatpush3.bf16.msra.mxu0 %v1418_v41 }
 0x12d   : > { %1352 = vmatprep.subr.bf16.mxu0 %v1436_v8  ;;  %1367 = vmatpush3.bf16.msra.mxu1 %v1419_v42 }
 0x12e   : > { %1368 = vmatprep.subr.bf16.mxu1 %v1436_v8 }
 0x130   : > { %1353 = vmatpush3.bf16.msra.mxu0 %v1420_v43 }
 0x131   : > { %1369 = vmatpush3.bf16.msra.mxu1 %v1421_v45 }
 0x132   : > { %1370 = vmatprep.subr.bf16.mxu1 %v1436_v8 }
 0x133   : > { %1355 = vmatmul.mubr.bf16.vlgmr.msra.gmra.mrb[4].mxu0 %v1422_v46 }
 0x135   : > { %1371 = vmatpush3.bf16.msra.mxu1 %v1423_v48 }
 0x136   : > { %1372 = vmatprep.subr.bf16.mxu1 %v1436_v8 }
 0x139   : > { %1373 = vmatpush3.bf16.msra.mxu1 %v1424_v52 }
 0x13c   : > { %1375 = vmatmul.mubr.bf16.vlgmr.msra.gmra.mrb[4].mxu1 %v946_v56 }
 0x1e6   : > { %v587_v58 = vpop.f32.mrb[0].mxu0 }
 0x1e7   : > { %v588_v59 = vadd.f32 %v1175_v57, %v587_v58  ;;  %v1316_v60 = vpop.f32.mrb[1].mxu0 }
 0x1e8   : > { %v590_v61 = vpop.f32.mrb[2].mxu0 }
 0x1e9   : > { %v591_v62 = vadd.f32 %v1175_v57, %v590_v61  ;;  %v1317_v63 = vpop.f32.mrb[3].mxu0 }
 0x1eb   : > { %v594_v0 = vpack.c.bf16 %v591_v62, %v588_v59 }
 0x1ef   : > { %v719_v1 = vpop.f32.mrb[0].mxu1 }
 0x1f0   : > { %v1336_v2 = vpop.f32.mrb[1].mxu1  ;;  %v720_v3 = vadd.f32 %v1175_v57, %v719_v1 }
 0x1f1   : > { %v722_v8 = vpop.f32.mrb[2].mxu1 }
 0x1f2   : > { %v723_v4 = vadd.f32 %v1175_v57, %v722_v8  ;;  %v1337_v5 = vpop.f32.mrb[3].mxu1 }
 0x1f4   : > { %v726_v6 = vpack.c.bf16 %v723_v4, %v720_v3 }
 0x1f6   : > { %728 = vrot.lane.b32.xlu1 %v726_v6, %s1438_s3 }
 0x206   : > { %v899_v9 = vpop.f32.mrb[4].mxu0 }
 0x207   : > { %v900_v10 = vadd.f32 %v1215_v7, %v899_v9  ;;  %v1356_v11 = vpop.f32.mrb[5].mxu0 }
 0x208   : > { %v902_v12 = vpop.f32.mrb[6].mxu0 }
 0x209   : > { %v903_v13 = vadd.f32 %v1215_v7, %v902_v12  ;;  %v1357_v14 = vpop.f32.mrb[7].mxu0 }
 0x20b   : > { %v906_v15 = vpack.c.bf16 %v903_v13, %v900_v10 }
 0x20f   : > { %v1030_v16 = vpop.f32.mrb[4].mxu1 }
 0x210   : > { %v1376_v17 = vpop.f32.mrb[5].mxu1  ;;  %v1031_v19 = vadd.f32 %v1215_v7, %v1030_v16 }
 0x211   : > { %v1033_v18 = vpop.f32.mrb[6].mxu1 }
 0x212   : > { %v1034_v20 = vadd.f32 %v1215_v7, %v1033_v18  ;;  %v1377_v21 = vpop.f32.mrb[7].mxu1 }
 0x214   : > { %v1037_v22 = vpack.c.bf16 %v1034_v20, %v1031_v19 }
 0x216   : > { %1039 = vrot.lane.b32.xlu0 %v1037_v22, %s1438_s3 }
 0x268   : > { %v729_v23 = vpop.permute.xlu1 %728 }
 0x269   : > { %v733_v24 = vsel %vm730_vm15, %v594_v0, %v729_v23 }
 0x26a   : > { %v1211_v25 = vcombine.low %v733_v24, %v733_v24  ;;  %v1212_v26 = vcombine.high %v733_v24, %v733_v24 }
 0x26c   : > { %741 = vst [vmem:[%s370_s16] sm:$0xf] %v1211_v25  ;;  %742 = vst [vmem:[%s370_s16 + $0x4] sm:$0xf] %v1212_v26 }
 0x288   : > { %v1040_v27 = vpop.permute.xlu0 %1039 }
 0x289   : > { %v1043_v28 = vsel %vm730_vm15, %v906_v15, %v1040_v27 }
 0x28a   : > { %v1251_v29 = vcombine.low %v1043_v28, %v1043_v28  ;;  %v1252_v30 = vcombine.high %v1043_v28, %v1043_v28 }
 0x28c   : > { %1051 = vst [vmem:[%s375_s19] sm:$0xf] %v1251_v29  ;;  %1052 = vst [vmem:[%s375_s19 + $0x4] sm:$0xf] %v1252_v30 }
 0x28d PF: > { %s22_s11 = sadd.s32 1, %s1433_s11  }
 0x28e   : > { %p19_p4 = scmp.ge.s32.totalorder %s22_s11, 4  }
 0x290   :  { %21 = sbr.rel (!%p19_p4) target bundleno = 3 (0x3), region = 102 }

// kernel: decoder_block_forward.3
= control target key start
LH: loop header
LB: loop body
LE: loop exit
PB: predicated region body
PF: predicated region fallthrough
CT: control target
= control target key end

     0   :  { %s6845_s0 = inlined_call_operand.vmem [shape: bf16[2,32,64], index: 0, kind: input, shape index: {}]   ;;  %s6846_s1 = inlined_call_operand.vmem [shape: bf16[2,32,64], index: 1, kind: input, shape index: {}]   ;;  %s6847_s2 = inlined_call_operand.vmem [shape: bf16[8,128,32], index: 2, kind: input, shape index: {}]   ;;  %s6848_s3 = inlined_call_operand.vmem [shape: bf16[4,128,32], index: 3, kind: input, shape index: {}]   ;;  %s6849_s4 = inlined_call_operand.vmem [shape: bf16[4,128,32], index: 4, kind: input, shape index: {}]   ;;  %s6850_s5 = inlined_call_operand.vmem [shape: bf16[4,128,32], index: 5, kind: input, shape index: {}]   ;;  %s6851_s6 = inlined_call_operand.vmem [shape: bf16[64,32], index: 6, kind: input, shape index: {}]   ;;  %s6852_s7 = inlined_call_operand.vmem [shape: f32[2,1,32], index: 7, kind: input, shape index: {}]   ;;  %s6853_s8 = inlined_call_operand.vmem [shape: f32[2,1,32], index: 8, kind: input, shape index: {}]   ;;  %s6854_s9 = inlined_call_operand.vmem [shape: f32[2,1,32], index: 9, kind: input, shape index: {}]   ;;  %s6855_s10 = inlined_call_operand.vmem [shape: f32[2,1,32], index: 10, kind: input, shape index: {}]   ;;  %s6856_s11 = inlined_call_operand.vmem [shape: f32[2,1,32], index: 11, kind: input, shape index: {}]   ;;  %s6857_s12 = inlined_call_operand.vmem [shape: f32[2,1,32], index: 12, kind: input, shape index: {}]   ;;  %s6858_s13 = inlined_call_operand.vmem [shape: f32[1,32], index: 13, kind: input, shape index: {}]   ;;  %s6859_s14 = inlined_call_operand.vmem [shape: f32[1,32], index: 14, kind: input, shape index: {}]   ;;  %s6860_s15 = inlined_call_operand.<no memory space> [shape: f32[1,1], index: 15, kind: input, shape index: {}]   ;;  %s6861_s18 = inlined_call_operand.vmem [shape: f32[2,32,32], index: 18, kind: output, shape index: {}]   ;;  %s6862_s16 = inlined_call_operand.<no memory space> [shape: f32[1,1], index: 16, kind: input, shape index: {}]   ;;  %s6863_s17 = inlined_call_operand.<no memory space> [shape: f32[1,1], index: 17, kind: input, shape index: {}]  }
   0x1   :  { %6865 = sst [smem:[#allocation9_spill]] %s6845_s0  ;;  %v23_v0 = vstv %s6860_s15  ;;  %v25_v1 = vstv %s6862_s16  ;;  %v27_v2 = vstv %s6863_s17 }
   0x2   :  { %6866 = sst [smem:[#allocation10_spill]] %s6846_s1  ;;  %24 = vst [vmem:[#allocation6] sm:$0x1] %v23_v0  ;;  %26 = vst [vmem:[#allocation7] sm:$0x1] %v25_v1  ;;  %s5996_s1 = smov 0  }
   0x3   :  { %6867 = sst [smem:[#allocation11_spill]] %s6847_s2  ;;  %28 = vst [vmem:[#allocation8] sm:$0x1] %v27_v2 }
   0x4 LB: > { %s4443_s15 = sadd.s32 4294967295, %s5886_s1   ;;  %p4447_p0 = scmp.ge.s32.totalorder %s5886_s1, 1  ;;  %s5886_s1 = sphi %s5996_s1, %s34_s1  }
   0x5   : > { %p576_p1 = scmp.lt.s32.totalorder %s5886_s1, 3 }
   0x7   : > { %p577_p2 = pnand %p4447_p0, %p576_p1 }
   0x8   : > { %p653_p3 = scmp.lt.s32.totalorder (!%p577_p2), %s4443_s15, 1  ;;  %vm703_vm0 = vsmask.f32 (!%p577_p2), 3328  ;;  %vm713_vm1 = vsmask.f32 (!%p577_p2), 7440  ;;  %s6868_s20 = sld [smem:[#allocation11_spill]] (!%p577_p2) }
   0x9   : > { %580 = sbr.rel (%p577_p2) target bundleno = 1970 (0x7b2), region = 92  ;;  %s6869_s27 = sld [smem:[#allocation9_spill]] (!%p577_p2)  ;;  %vm691_vm2 = vcmask (!%p577_p2), 1043456   ;;  %vm692_vm3 = vsmask.f32 (!%p577_p2), 7938  ;;  %vm697_vm4 = vcmask (!%p577_p2), 1043459   ;;  %vm6042_vm8 = vmor (!%p577_p2), %vm703_vm0, %vm713_vm1 }
   0xa   : > { %vm708_vm5 = vcmask (!%p577_p2), 519168   ;;  %v694_v10 = vld [vmem:[#allocation2 + $0x4] sm:$0xf] (!%p577_p2)  ;;  %vm6029_vm6 = vmand (!%p577_p2), %vm691_vm2, %vm692_vm3  ;;  %v700_v21 = vld [vmem:[#allocation2 + $0x14] sm:$0x8] (!%p577_p2)  ;;  %s5888_s0 = smov (!%p577_p2), 64  }
   0xb   : > { %vm6035_vm7 = vmand (!%p577_p2), %vm691_vm2, %vm703_vm0  ;;  %v705_v27 = vld [vmem:[#allocation2 + $0x18] sm:$0xf] (!%p577_p2)  ;;  %v695_v35 = vsel (!%p577_p2), %vm6029_vm6, 0, %v694_v10  ;;  %vm698_vm9 = vsmask.f32 (!%p577_p2), 7950  ;;  %s6876_s22 = sld [smem:[#allocation10_spill]] (!%p577_p2) }
   0xc   : > { %696 = vst [vmem:[#allocation2 + $0x4] sm:$0xf] (!%p577_p2), %v695_v35  ;;  %vm699_vm10 = vmand (!%p577_p2), %vm697_vm4, %vm698_vm9  ;;  %v706_v39 = vsel (!%p577_p2), %vm6035_vm7, 0, %v705_v27  ;;  %vm769_vm11 = vcmask (!%p577_p2), 1043971   ;;  %vm774_vm13 = vcmask (!%p577_p2), 1043968   ;;  %vm2043_vm4 = vcmask (!%p577_p2), 1042432  }
   0xd   : > { %v701_v42 = vsel (!%p577_p2), %vm699_vm10, 0, %v700_v21  ;;  %707 = vst [vmem:[#allocation2 + $0x18] sm:$0xf] (!%p577_p2), %v706_v39  ;;  %vm770_vm12 = vmand (!%p577_p2), %vm769_vm11, %vm698_vm9  ;;  %vm836_vm15 = vsmask.f32 (!%p577_p2), 6400  ;;  %vm2037_vm10 = vcmask (!%p577_p2), 1043458  }
   0xe   : > { %v5666_v3 = vld [vmem:[%s6868_s20 + $0x40] sm:$0xff] (!%p577_p2)   ;;  %v5668_v5 = vld [vmem:[%s6868_s20 + $0x48] sm:$0xff] (!%p577_p2)   ;;  %v5670_v36 = vld [vmem:[%s6868_s20 + $0x50] sm:$0xff] (!%p577_p2)   ;;  %702 = vst [vmem:[#allocation2 + $0x14] sm:$0x8] (!%p577_p2), %v701_v42  ;;  %s5890_s21 = smov (!%p577_p2), 32  }
   0xf   : > { %v5667_v4 = vld [vmem:[%s6868_s20 + $0x80] sm:$0xff] (!%p577_p2)   ;;  %5172 = vmatprep.subr.bf16.mxu1 (!%p577_p2), %v5666_v3  ;;  %v5669_v6 = vld [vmem:[%s6868_s20 + $0x88] sm:$0xff] (!%p577_p2)   ;;  %v5671_v43 = vld [vmem:[%s6868_s20 + $0x90] sm:$0xff] (!%p577_p2)   ;;  %vm1108_vm1 = vsmask.f32 (!%p577_p2), 5376 }
  0x10   : > { %s6884_s15 = smov (!%p653_p3, %s4443_s15), 1  ;;  %5212 = vmatprep.subr.bf16.mxu0 %v5667_v4  ;;  %5173 = vmatpush3.bf16.msra.mxu1 %v5666_v3  ;;  %v5672_v45 = vld [vmem:[%s6868_s20 + $0x58] sm:$0xff]   ;;  %v5674_v51 = vld [vmem:[%s6868_s20 + $0x60] sm:$0xff]   ;;  %v5676_v53 = vld [vmem:[%s6868_s20 + $0x68] sm:$0xff]   ;;  %vm968_vm2 = vsmask.f32 7424 }
  0x11   : > { %s4951_s2 = sshll.u32 %s6884_s15, 4  ;;  %5213 = vmatpush3.bf16.msra.mxu0 %v5667_v4  ;;  %5174 = vmatprep.subr.bf16.mxu1 %v5668_v5  ;;  %v5673_v46 = vld [vmem:[%s6868_s20 + $0x98] sm:$0xff]   ;;  %v5675_v52 = vld [vmem:[%s6868_s20 + $0xa0] sm:$0xff]   ;;  %v5677_v54 = vld [vmem:[%s6868_s20 + $0xa8] sm:$0xff]   ;;  %vm1258_vm3 = vsmask.f32 4352  ;;  %s665_s26 = scalar_lea.vmem %s6852_s7, %s6884_s15 }
  0x12   : > { %s657_s28 = scalar_lea.vmem %s6869_s27, %s4951_s2  ;;  %5214 = vmatprep.subr.bf16.mxu0 %v5669_v6  ;;  %v5678_v55 = vld [vmem:[%s6868_s20 + $0x70] sm:$0xff]   ;;  %v5680_v57 = vld [vmem:[%s6868_s20 + $0x78] sm:$0xff]   ;;  %v6102_v59 = vld [vmem:[%s6868_s20] sm:$0xff]   ;;  %s6116_s23 = scalar_lea.vmem %s6876_s22, %s4951_s2  ;;  %vm2038_vm11 = vsmask.f32 7946 }
  0x13   : > { %v687_v7 = vld [vmem:[%s657_s28] sm:$0xf]  ;;  %v688_v8 = vld [vmem:[%s657_s28 + $0x4] sm:$0xf]  ;;  %v689_v9 = vld [vmem:[%s657_s28 + $0x8] sm:$0xf]  ;;  %s668_s29 = scalar_lea.vmem %s6853_s8, %s6884_s15  ;;  %s671_s27 = scalar_lea.vmem %s6854_s9, %s6884_s15 }
  0x14   : > { %v716_v11 = vshll.u32 %v687_v7, 16  ;;  %v719_v12 = vshrl.u32 %v687_v7, 16  ;;  %v725_v13 = vshll.u32 %v688_v8, 16  ;;  %v729_v14 = vshrl.u32 %v688_v8, 16  ;;  %v690_v15 = vld [vmem:[%s657_s28 + $0xc] sm:$0xf]  ;;  %5175 = vmatpush3.bf16.msra.mxu1 %v5668_v5  ;;  %vm779_vm14 = vmand %vm774_vm13, %vm703_vm0  ;;  %s674_s16 = scalar_lea.vmem %s6855_s10, %s6884_s15  ;;  %s677_s19 = scalar_lea.vmem %s6856_s11, %s6884_s15 }
  0x15   : > { %710 = vst.msk [vmem:[#allocation2 + $0xc] sm:$0xf] %vm708_vm5, %v688_v8  ;;  %709 = vst.msk [vmem:[#allocation2 + $0x8] sm:$0xf] %vm708_vm5, %v687_v7  ;;  %v735_v16 = vshll.u32 %v689_v9, 16  ;;  %v739_v17 = vshrl.u32 %v689_v9, 16  ;;  %5215 = vmatpush3.bf16.msra.mxu0 %v5669_v6  ;;  %5176 = vmatprep.subr.bf16.mxu1 %v5670_v36  ;;  %s680_s17 = scalar_lea.vmem %s6857_s12, %s6884_s15 }
  0x16   : > { %711 = vst.msk [vmem:[#allocation2 + $0x10] sm:$0xf] %vm708_vm5, %v689_v9  ;;  %v745_v18 = vshll.u32 %v690_v15, 16  ;;  %v749_v19 = vshrl.u32 %v690_v15, 16  ;;  %v718_v22 = vrot.slane %v716_v11, 5  ;;  %v721_v23 = vrot.slane %v719_v12, 4  ;;  %5216 = vmatprep.subr.bf16.mxu0 %v5671_v43 }
  0x17   : > { %v727_v24 = vrot.slane %v725_v13, 5  ;;  %v731_v25 = vrot.slane %v729_v14, 4  ;;  %v737_v28 = vrot.slane %v735_v16, 5  ;;  %v741_v29 = vrot.slane %v739_v17, 4  ;;  %712 = vst.msk [vmem:[#allocation2 + $0x14] sm:$0xf] %vm708_vm5, %v690_v15 }
  0x18   : > { %v747_v30 = vrot.slane %v745_v18, 5  ;;  %v751_v31 = vrot.slane %v749_v19, 4  ;;  %754 = vrot.lane.b32.xlu0 %v718_v22, %s5888_s0  ;;  %v722_v32 = vor.u32 %v721_v23, %v718_v22  ;;  %5177 = vmatpush3.bf16.msra.mxu1 %v5670_v36  ;;  %v5679_v56 = vld [vmem:[%s6868_s20 + $0xb0] sm:$0xff]   ;;  %v5681_v58 = vld [vmem:[%s6868_s20 + $0xb8] sm:$0xff]   ;;  %v6107_v60 = vld [vmem:[%s6868_s20 + $0xc0] sm:$0xff]   ;;  %s5891_s22 = smov 96  }
  0x19   : > { %v732_v34 = vor.u32 %v731_v25, %v727_v24  ;;  %v742_v37 = vor.u32 %v741_v29, %v737_v28  ;;  %5217 = vmatpush3.bf16.msra.mxu0 %v5671_v43  ;;  %5178 = vmatprep.subr.bf16.mxu1 %v5672_v45  ;;  %v771_v61 = vld [vmem:[#allocation2 + $0x4] sm:$0x8]  ;;  %vm2044_vm5 = vsmask.f32 2304  ;;  %v5753_v33 = vld [vmem:[%s6848_s3 + $0x68] sm:$0xff]   ;;  %s4953_s25 = sshll.u32 %s6884_s15, 5 }
  0x1a   : > { %v752_v38 = vor.u32 %v751_v31, %v747_v30  ;;  %v723_v40 = vrot.slane %v722_v32, 4  ;;  %5218 = vmatprep.subr.bf16.mxu0 %v5673_v46  ;;  %vm2045_vm7 = vmand %vm2043_vm4, %vm2044_vm5  ;;  %s685_s28 = scalar_lea.vmem %s6861_s18, %s4953_s25 }
  0x1b   : > { %v733_v41 = vrot.slane %v732_v34, 4  ;;  %v743_v44 = vrot.slane %v742_v37, 4 }
  0x1c   : > { %v728_v48 = vsel %vm6042_vm8, %v723_v40, %v727_v24  ;;  %v753_v49 = vrot.slane %v752_v38, 4  ;;  %5179 = vmatpush3.bf16.msra.mxu1 %v5672_v45 }
  0x1d   : > { %v738_v47 = vsel %vm6042_vm8, %v733_v41, %v737_v28  ;;  %756 = vrot.lane.b32.xlu0 %v728_v48, %s5888_s0  ;;  %v748_v50 = vsel %vm6042_vm8, %v743_v44, %v747_v30  ;;  %5180 = vmatprep.subr.bf16.mxu1 %v5674_v51 }
  0x1e   : > { %758 = vrot.lane.b32.xlu1 %v738_v47, %s5888_s0  ;;  %5219 = vmatpush3.bf16.msra.mxu0 %v5673_v46  ;;  %v780_v2 = vld [vmem:[#allocation2 + $0x14] sm:$0xf] }
  0x1f   : > { %5220 = vmatprep.subr.bf16.mxu0 %v5675_v52 }
  0x20   : > { %5181 = vmatpush3.bf16.msra.mxu1 %v5674_v51 }
  0x21   : > { %762 = vrot.lane.b32.xlu0 %v753_v49, %s5888_s0  ;;  %5182 = vmatprep.subr.bf16.mxu1 %v5676_v53 }
  0x22   : > { %760 = vrot.lane.b32.xlu1 %v748_v50, %s5888_s0  ;;  %5221 = vmatpush3.bf16.msra.mxu0 %v5675_v52 }
  0x23   : > { %5222 = vmatprep.subr.bf16.mxu0 %v5677_v54 }
  0x24   : > { %5183 = vmatpush3.bf16.msra.mxu1 %v5676_v53 }
  0x25   : > { %5184 = vmatprep.subr.bf16.mxu1 %v5678_v55 }
  0x26   : > { %5223 = vmatpush3.bf16.msra.mxu0 %v5677_v54 }
  0x27   : > { %5224 = vmatprep.subr.bf16.mxu0 %v5679_v56 }
  0x28   : > { %5185 = vmatpush3.bf16.msra.mxu1 %v5678_v55 }
  0x29   : > { %5186 = vmatprep.subr.bf16.mxu1 %v5680_v57 }
  0x2a   : > { %5225 = vmatpush3.bf16.msra.mxu0 %v5679_v56  ;;  %v5747_v56 = vld [vmem:[#allocation2 + $0x18] ss:$0 sps:$4 sm:$0xff]  }
  0x2b   : > { %5226 = vmatprep.subr.bf16.mxu0 %v5681_v58 }
  0x2c   : > { %5187 = vmatpush3.bf16.msra.mxu1 %v5680_v57 }
  0x2d   : > { %5192 = vmatprep.subr.bf16.mxu1 %v6102_v59 }
  0x2e   : > { %5227 = vmatpush3.bf16.msra.mxu0 %v5681_v58 }
  0x2f   : > { %5232 = vmatprep.subr.bf16.mxu0 %v6107_v60 }
  0x8a   : > { %v755_v62 = vpop.permute.xlu0 %754 }
  0x8b   : > { %v772_v63 = vsel %vm770_vm12, %v755_v62, %v771_v61  ;;  %vm2039_vm12 = vmand %vm2037_vm10, %vm2038_vm11 }
  0x8c   : > { %773 = vst [vmem:[#allocation2 + $0x4] sm:$0x8] %v772_v63 }
  0x8f   : > { %v757_v1 = vpop.permute.xlu0 %756 }
  0x90   : > { %v759_v0 = vpop.permute.xlu1 %758  ;;  %775 = vst.msk [vmem:[#allocation2 + $0x8] sm:$0xf] %vm774_vm13, %v757_v1 }
  0x91   : > { %776 = vst.msk [vmem:[#allocation2 + $0xc] sm:$0xf] %vm774_vm13, %v759_v0  ;;  %v5691_v0 = vld [vmem:[%s6868_s20 + $0x8] sm:$0xff]  }
  0x93   : > { %v763_v4 = vpop.permute.xlu0 %762  ;;  %v804_v6 = vld [vmem:[#allocation2 + $0x4] sm:$0xe] }
  0x94   : > { %v761_v3 = vpop.permute.xlu1 %760  ;;  %v781_v5 = vsel %vm779_vm14, %v763_v4, %v780_v2  ;;  %v1083_v7 = vld [vmem:[#allocation2 + $0x4] sm:$0xc]  ;;  %v5692_v4 = vld [vmem:[%s6868_s20 + $0xc8] sm:$0xff]  }
  0x95   : > { %777 = vst.msk [vmem:[#allocation2 + $0x10] sm:$0xf] %vm774_vm13, %v761_v3  ;;  %782 = vst [vmem:[#allocation2 + $0x14] sm:$0xf] %v781_v5  ;;  %v783_v8 = vld [vmem:[#allocation2 + $0x4] sm:$0xf] }
  0x96   : > { %v1233_v10 = vld [vmem:[#allocation2 + $0x4] sm:$0x8] }
  0x97   : > { %v784_v9 = vld [vmem:[#allocation2 + $0x8] sm:$0xf] }
  0x98   : > { %v4470_v11 = vcombine.low %v804_v6, %v784_v9  ;;  %v4507_v12 = vcombine.low %v1083_v7, %v784_v9  ;;  %v4481_v13 = vcombine.low %v783_v8, %v784_v9  ;;  %v4533_v14 = vcombine.low %v1233_v10, %v784_v9  ;;  %v5693_v6 = vld [vmem:[%s6868_s20 + $0x10] sm:$0xff]   ;;  %v6151_v10 = vld [vmem:[#allocation2 + $0xc] sm:$0xf] }
  0x99   : > { %v1877_v7 = vshrl.u32 %v5747_v56, 16  ;;  %v1880_v8 = vshll.u32 %v5747_v56, 16 }
  0x9a   : > { %v838_v15 = vshrl.u32 %v4470_v11, 16  ;;  %v841_v16 = vshll.u32 %v4470_v11, 16  ;;  %v1110_v17 = vshrl.u32 %v4507_v12, 16  ;;  %v1113_v18 = vshll.u32 %v4507_v12, 16  ;;  %v1839_v12 = vld [vmem:[#allocation2 + $0x8] sm:$0x8] }
  0x9b   : > { %v972_v21 = vshll.u32 %v4481_v13, 16  ;;  %v1260_v22 = vshrl.u32 %v4533_v14, 16  ;;  %v970_v35 = vshrl.u32 %v4481_v13, 16  ;;  %v1263_v55 = vshll.u32 %v4533_v14, 16  ;;  %v5694_v14 = vld [vmem:[%s6868_s20 + $0xd0] sm:$0xff]  }
  0x9c   : > { %v5683_v19 = vld [vmem:[#allocation2 + $0xc] sm:$0xff]   ;;  %v840_v23 = vrot.slane %v838_v15, 1  ;;  %v843_v24 = vrot.slane %v841_v16, 2  ;;  %v1112_v25 = vrot.slane %v1110_v17, 2  ;;  %v1115_v26 = vrot.slane %v1113_v18, 3 }
  0x9d   : > { %v6120_v27 = vshrl.u32 %v5683_v19, 16  ;;  %v6122_v28 = vshll.u32 %v5683_v19, 16  ;;  %v5687_v29 = vld [vmem:[#allocation2 + $0x14] ss:$0 sps:$4 sm:$0x33]   ;;  %v974_v30 = vrot.slane %v972_v21, 1 }
  0x9e   : > { %v844_v31 = vor.u32 %v843_v24, %v840_v23  ;;  %v1116_v32 = vor.u32 %v1115_v26, %v1112_v25  ;;  %v5688_v34 = vld [vmem:[#allocation2 + $0x14] ss:$0 sps:$4 sm:$0x77]   ;;  %v855_v40 = vshrl.u32 %v5687_v29, 16  ;;  %v858_v41 = vshll.u32 %v5687_v29, 16  ;;  %v5696_v19 = vld [vmem:[%s6868_s20 + $0xd8] sm:$0xff]  }
  0x9f   : > { %v848_v36 = vrot.slane %v6120_v27, 1  ;;  %v851_v37 = vrot.slane %v6122_v28, 2  ;;  %v1117_v38 = vrot.slane %v6120_v27, 2  ;;  %v1118_v39 = vrot.slane %v6122_v28, 3  ;;  %v5709_v11 = vld [vmem:[#allocation2 + $0x10] sm:$0xff]   ;;  %v5697_v23 = vld [vmem:[%s6868_s20 + $0x20] sm:$0xff]  }
  0xa0   : > { %v1122_v42 = vshrl.u32 %v5688_v34, 16  ;;  %v1125_v43 = vshll.u32 %v5688_v34, 16  ;;  %v975_v46 = vor.u32 %v974_v30, %v970_v35  ;;  %v1262_v47 = vrot.slane %v1260_v22, 3  ;;  %v5698_v24 = vld [vmem:[%s6868_s20 + $0xe0] sm:$0xff]  }
  0xa1   : > { %v852_v44 = vor.u32 %v851_v37, %v848_v36  ;;  %v1119_v45 = vor.u32 %v1118_v39, %v1117_v38  ;;  %v857_v48 = vrot.slane %v855_v40, 1  ;;  %v860_v49 = vrot.slane %v858_v41, 2  ;;  %v5699_v36 = vld [vmem:[%s6868_s20 + $0x28] sm:$0xff]   ;;  %v5706_v39 = vld [vmem:[#allocation2 + $0x14] ss:$0 sps:$4 sm:$0xff]  }
  0xa2   : > { %v1124_v50 = vrot.slane %v1122_v42, 2  ;;  %v1127_v51 = vrot.slane %v1125_v43, 3  ;;  %v976_v54 = vrot.slane %v6122_v28, 1  ;;  %v1267_v61 = vrot.slane %v6120_v27, 3  ;;  %v5700_v37 = vld [vmem:[%s6868_s20 + $0xe8] sm:$0xff]   ;;  %v5701_v41 = vld [vmem:[%s6868_s20 + $0x30] sm:$0xff]  }
  0xa3   : > { %v853_v52 = vsel %vm836_vm15, %v844_v31, %v852_v44  ;;  %v1120_v53 = vsel %vm1108_vm1, %v1116_v32, %v1119_v45  ;;  %v861_v57 = vor.u32 %v860_v49, %v857_v48  ;;  %v1268_v62 = vrot.slane %v6122_v28, 4  ;;  %v1383_v40 = vld [vmem:[#allocation2 + $0x8] sm:$0xf]  ;;  %v5702_v42 = vld [vmem:[%s6868_s20 + $0xf0] sm:$0xff]   ;;  %v5704_v48 = vld [vmem:[%s6868_s20 + $0xf8] sm:$0xff]  }
  0xa4   : > { %5188 = vmatprep.mubr.bf16.mxu1 %v853_v52  ;;  %5228 = vmatprep.mubr.bf16.mxu0 %v1120_v53  ;;  %v1128_v58 = vor.u32 %v1127_v51, %v1124_v50  ;;  %v1265_v63 = vrot.slane %v1263_v55, 4  ;;  %v977_v9 = vsel %vm968_vm2, %v975_v46, %v976_v54  ;;  %v1879_v15 = vrot.slane %v1877_v7, 3  ;;  %v5707_v53 = vld [vmem:[%s6868_s20 + $0x100] sm:$0xff]   ;;  %v5711_v28 = vld [vmem:[%s6868_s20 + $0x110] sm:$0xff]  }
  0xa5   : > { %v862_v1 = vsel %vm836_vm15, %v852_v44, %v861_v57  ;;  %v6138_v3 = vor.u32 %v1268_v62, %v1267_v61  ;;  %v1882_v16 = vrot.slane %v1880_v8, 4  ;;  %v6162_v17 = vshll.u32 %v5709_v11, 16  ;;  %v5705_v44 = vld [vmem:[#allocation2 + $0x14] ss:$0 sps:$4 sm:$0x11]  }
  0xa6   : > { %v1129_v2 = vsel %vm1108_vm1, %v1119_v45, %v1128_v58  ;;  %5189 = vmatmul.mubr.bf16.vlgmr.msra.gmra.mrb[0].mxu1 %v862_v1  ;;  %v1266_v5 = vor.u32 %v1265_v63, %v1262_v47  ;;  %v6164_v18 = vshrl.u32 %v5709_v11, 16  ;;  %v4559_v43 = vcombine.low %v1383_v40, %v6151_v10  ;;  %v5703_v47 = vld [vmem:[%s6868_s20 + $0x38] sm:$0xff]  }
  0xa7   : > { %5229 = vmatmul.mubr.bf16.vlgmr.msra.gmra.mrb[0].mxu0 %v1129_v2  ;;  %5193 = vmatpush3.bf16.msra.mxu1 %v6102_v59  ;;  %v5695_v59 = vld [vmem:[%s6868_s20 + $0x18] sm:$0xff]   ;;  %v1873_v26 = vrot.slane %v6162_v17, 4  ;;  %v1883_v29 = vor.u32 %v1882_v16, %v1879_v15  ;;  %v1272_v45 = vshrl.u32 %v5706_v39, 16  ;;  %v1275_v46 = vshll.u32 %v5706_v39, 16 }
  0xa8   : > { %5233 = vmatpush3.bf16.msra.mxu0 %v6107_v60  ;;  %5208 = vmatprep.mubr.bf16.mxu1 %v977_v9  ;;  %v1270_v13 = vsel %vm1258_vm3, %v1266_v5, %v6138_v3  ;;  %v4638_v60 = vcombine.low %v1839_v12, %v6151_v10  ;;  %v1872_v25 = vrot.slane %v6164_v18, 3  ;;  %v1421_v49 = vshll.u32 %v4559_v43, 16  ;;  %v1541_v5 = vld [vmem:[#allocation2 + $0x8] sm:$0xe]  ;;  %v5716_v9 = vld [vmem:[%s6868_s20 + $0x138] sm:$0xff]  }
  0xa9   : > { %5194 = vmatprep.subr.bf16.mxu1 %v5691_v0  ;;  %5248 = vmatprep.mubr.bf16.mxu0 %v1270_v13  ;;  %v980_v50 = vshll.u32 %v5705_v44, 16  ;;  %v1274_v51 = vrot.slane %v1272_v45, 3  ;;  %v1277_v52 = vrot.slane %v1275_v46, 4  ;;  %v978_v56 = vor.u32 %v976_v54, %v6120_v27  ;;  %v5712_v54 = vld [vmem:[%s6868_s20 + $0x118] sm:$0xff]  }
  0xaa   : > { %5234 = vmatprep.subr.bf16.mxu0 %v5692_v4  ;;  %v1865_v21 = vshrl.u32 %v4638_v60, 16  ;;  %v1868_v22 = vshll.u32 %v4638_v60, 16  ;;  %v1874_v32 = vor.u32 %v1873_v26, %v1872_v25  ;;  %v1423_v55 = vrot.slane %v1421_v49, 1  ;;  %v5717_v8 = vld [vmem:[#allocation2 + $0x18] ss:$0 sps:$4 sm:$0x11]  }
  0xab   : > { %5195 = vmatpush3.bf16.msra.mxu1 %v5691_v0  ;;  %v982_v57 = vrot.slane %v980_v50, 1  ;;  %v1278_v58 = vor.u32 %v1277_v52, %v1274_v51  ;;  %v1419_v61 = vshrl.u32 %v4559_v43, 16  ;;  %v1428_v62 = vrot.slane %v6162_v17, 1  ;;  %v5710_v0 = vld [vmem:[%s6868_s20 + $0x108] sm:$0xff]   ;;  %v5718_v60 = vld [vmem:[%s6868_s20 + $0x140] sm:$0xff]  }
  0xac   : > { %5235 = vmatpush3.bf16.msra.mxu0 %v5692_v4  ;;  %5196 = vmatprep.subr.bf16.mxu1 %v5693_v6  ;;  %v1867_v30 = vrot.slane %v1865_v21, 3  ;;  %v1870_v31 = vrot.slane %v1868_v22, 4  ;;  %v6178_v35 = vsel %vm1258_vm3, %v1874_v32, %v1883_v29  ;;  %v5714_v4 = vld [vmem:[%s6868_s20 + $0x128] sm:$0xff]   ;;  %v4586_v7 = vcombine.low %v1541_v5, %v6151_v10  ;;  %v5721_v29 = vld [vmem:[%s6868_s20 + $0x150] sm:$0xff]  }
  0xad   : > { %5236 = vmatprep.subr.bf16.mxu0 %v5694_v14  ;;  %v1424_v63 = vor.u32 %v1423_v55, %v1419_v61  ;;  %v983_v1 = vsel %vm968_vm2, %v978_v56, %v982_v57  ;;  %v1279_v2 = vsel %vm1258_vm3, %v6138_v3, %v1278_v58  ;;  %v5713_v3 = vld [vmem:[%s6868_s20 + $0x120] sm:$0xff]   ;;  %v1434_v13 = vshll.u32 %v5717_v8, 16  ;;  %v5731_v56 = vld [vmem:[%s6868_s20 + $0x190] sm:$0xff]   ;;  %v5732_v57 = vld [vmem:[%s6868_s20 + $0x198] sm:$0xff]  }
  0xae   : > { %v1871_v34 = vor.u32 %v1870_v31, %v1867_v30  ;;  %v1567_v11 = vshrl.u32 %v4586_v7, 16  ;;  %v1570_v12 = vshll.u32 %v4586_v7, 16  ;;  %v5722_v30 = vld [vmem:[%s6868_s20 + $0x158] sm:$0xff]   ;;  %v5723_v31 = vld [vmem:[%s6868_s20 + $0x160] sm:$0xff]   ;;  %v5734_v61 = vld [vmem:[%s6868_s20 + $0x1a8] sm:$0xff]  }
  0xaf   : > { %5197 = vmatpush3.bf16.msra.mxu1 %v5693_v6  ;;  %v1429_v27 = vsel %vm968_vm2, %v1424_v63, %v1428_v62  ;;  %v5715_v6 = vld [vmem:[%s6868_s20 + $0x130] sm:$0xff]   ;;  %v1436_v21 = vrot.slane %v1434_v13, 1  ;;  %v5733_v58 = vld [vmem:[%s6868_s20 + $0x1a0] sm:$0xff]   ;;  %v5746_v13 = vld [vmem:[%s6868_s20 + $0x1f8] sm:$0xff]  }
  0xb0   : > { %5237 = vmatpush3.bf16.msra.mxu0 %v5694_v14  ;;  %5198 = vmatprep.subr.bf16.mxu1 %v5695_v59  ;;  %v6187_v38 = vsel %vm1258_vm3, %v1871_v34, %v1874_v32  ;;  %v1574_v14 = vrot.slane %v6164_v18, 1  ;;  %v1569_v15 = vrot.slane %v1567_v11, 1  ;;  %v1572_v16 = vrot.slane %v1570_v12, 2  ;;  %v5724_v32 = vld [vmem:[%s6868_s20 + $0x168] sm:$0xff]   ;;  %v5735_v63 = vld [vmem:[%s6868_s20 + $0x1b0] sm:$0xff]   ;;  %v5743_v11 = vld [vmem:[%s6868_s20 + $0x1e0] sm:$0xff]  }
  0xb1   : > { %5238 = vmatprep.subr.bf16.mxu0 %v5696_v19  ;;  %v5727_v34 = vld [vmem:[#allocation2 + $0x18] ss:$0 sps:$4 sm:$0x33]   ;;  %v5741_v8 = vld [vmem:[%s6868_s20 + $0x1d0] sm:$0xff]   ;;  %v5744_v12 = vld [vmem:[%s6868_s20 + $0x1e8] sm:$0xff]  }
  0xb2   : > { %v1579_v40 = vshrl.u32 %v5727_v34, 16 }
  0xb3   : > { %5199 = vmatpush3.bf16.msra.mxu1 %v5695_v59  ;;  %v1575_v59 = vrot.slane %v6162_v17, 2 }
  0xb4   : > { %5239 = vmatpush3.bf16.msra.mxu0 %v5696_v19  ;;  %5200 = vmatprep.subr.bf16.mxu1 %v5697_v23  ;;  %v1432_v19 = vor.u32 %v6164_v18, %v1428_v62  ;;  %v1581_v45 = vrot.slane %v1579_v40, 1  ;;  %v5737_v62 = vld [vmem:[#allocation2 + $0x18] ss:$0 sps:$4 sm:$0x77]  }
  0xb5   : > { %5240 = vmatprep.subr.bf16.mxu0 %v5698_v24  ;;  %v1576_v22 = vor.u32 %v1575_v59, %v1574_v14 }
  0xb6   : > { %v1437_v25 = vsel %vm968_vm2, %v1432_v19, %v1436_v21  ;;  %v2040_v21 = vld [vmem:[#allocation3 + $0x14] sm:$0xc] }
  0xb7   : > { %5201 = vmatpush3.bf16.msra.mxu1 %v5697_v23  ;;  %v1573_v23 = vor.u32 %v1572_v16, %v1569_v15  ;;  %v2046_v16 = vld [vmem:[#allocation3 + $0x18] sm:$0x7] }
  0xb8   : > { %5241 = vmatpush3.bf16.msra.mxu0 %v5698_v24  ;;  %5202 = vmatprep.subr.bf16.mxu1 %v5699_v36  ;;  %v5720_v24 = vld [vmem:[%s6868_s20 + $0x148] sm:$0xff]   ;;  %v2047_v19 = vsel %vm2045_vm7, 0, %v2046_v16  ;;  %vm2063_vm7 = vcmask 257024  }
  0xb9   : > { %5242 = vmatprep.subr.bf16.mxu0 %v5700_v37  ;;  %v1577_v26 = vsel %vm836_vm15, %v1573_v23, %v1576_v22  ;;  %2048 = vst [vmem:[#allocation3 + $0x18] sm:$0x7] %v2047_v19  ;;  %v4648_v23 = vld [vmem:[%s665_s26] ss:$0 sm:$0xff]  ;;  %v5749_v16 = vld [vmem:[%s6848_s3 + $0x48] sm:$0xff]  }
  0xbb   : > { %5203 = vmatpush3.bf16.msra.mxu1 %v5699_v36  ;;  %v1690_v36 = vld [vmem:[#allocation2 + $0x8] sm:$0xc] }
  0xbc   : > { %5243 = vmatpush3.bf16.msra.mxu0 %v5700_v37  ;;  %5204 = vmatprep.subr.bf16.mxu1 %v5701_v41  ;;  %v5725_v37 = vld [vmem:[%s6868_s20 + $0x170] sm:$0xff]   ;;  %v4612_v39 = vcombine.low %v1690_v36, %v6151_v10  ;;  %v5728_v10 = vld [vmem:[%s6868_s20 + $0x180] sm:$0xff]  }
  0xbd   : > { %5244 = vmatprep.subr.bf16.mxu0 %v5702_v42  ;;  %v2034_v36 = vld [vmem:[#allocation3 + $0x4] sm:$0xf] }
  0xbe   : > { %v1716_v43 = vshrl.u32 %v4612_v39, 16  ;;  %v1719_v44 = vshll.u32 %v4612_v39, 16 }
  0xbf   : > { %5205 = vmatpush3.bf16.msra.mxu1 %v5701_v41  ;;  %v1582_v41 = vshll.u32 %v5727_v34, 16 }
  0xc0   : > { %5245 = vmatpush3.bf16.msra.mxu0 %v5702_v42  ;;  %5206 = vmatprep.subr.bf16.mxu1 %v5703_v47  ;;  %v5726_v42 = vld [vmem:[%s6868_s20 + $0x178] sm:$0xff]   ;;  %v1718_v49 = vrot.slane %v1716_v43, 2  ;;  %v1721_v50 = vrot.slane %v1719_v44, 3 }
  0xc1   : > { %5246 = vmatprep.subr.bf16.mxu0 %v5704_v48  ;;  %v1584_v46 = vrot.slane %v1582_v41, 2  ;;  %v2035_v41 = vsel %vm6029_vm6, 0, %v2034_v36 }
  0xc2   : > { %2036 = vst [vmem:[#allocation3 + $0x4] sm:$0xf] %v2035_v41 }
  0xc3   : > { %5207 = vmatpush3.bf16.msra.mxu1 %v5703_v47  ;;  %v1723_v47 = vrot.slane %v6164_v18, 2  ;;  %v1585_v51 = vor.u32 %v1584_v46, %v1581_v45  ;;  %v5730_v18 = vld [vmem:[%s6868_s20 + $0x188] sm:$0xff]  }
  0xc4   : > { %5247 = vmatpush3.bf16.msra.mxu0 %v5704_v48  ;;  %v1724_v48 = vrot.slane %v6162_v17, 3 }
  0xc5   : > { %5252 = vmatprep.subr.bf16.mxu0 %v5707_v53  ;;  %v1586_v17 = vsel %vm836_vm15, %v1576_v22, %v1585_v51  ;;  %vm2136_vm15 = vcmask 1046532  }
  0xc6   : > { %5209 = vmatmul.mubr.bf16.vlgmr.msra.gmra.mrb[0].mxu1 %v983_v1  ;;  %v6270_v52 = vor.u32 %v1724_v48, %v1723_v47  ;;  %v1731_v1 = vshll.u32 %v5737_v62, 16  ;;  %vm6342_vm6 = vmor %vm2043_vm4, %vm2136_vm15  ;;  %vm2172_vm4 = vsmask.f32 6416  ;;  %vm2208_vm15 = vcmask 1044226  }
  0xc7   : > { %5249 = vmatmul.mubr.bf16.vlgmr.msra.gmra.mrb[0].mxu0 %v1279_v2  ;;  %v5736_v2 = vld [vmem:[%s6868_s20 + $0x1b8] sm:$0xff]  }
  0xc8   : > { %5253 = vmatpush3.bf16.msra.mxu0 %v5707_v53  ;;  %5268 = vmatprep.mubr.bf16.mxu0 %v1429_v27  ;;  %v1722_v53 = vor.u32 %v1721_v50, %v1718_v49  ;;  %v4650_v27 = vld [vmem:[#allocation6] ss:$0 sm:$0xff] }
  0xc9   : > { %5254 = vmatprep.subr.bf16.mxu0 %v5710_v0 }
  0xca   : > { %v1726_v55 = vsel %vm1108_vm1, %v1722_v53, %v6270_v52 }
  0xcc   : > { %5255 = vmatpush3.bf16.msra.mxu0 %v5710_v0  ;;  %v1728_v0 = vshrl.u32 %v5737_v62, 16  ;;  %v4756_v62 = vld [vmem:[#allocation7] ss:$0 sm:$0xff] }
  0xcd   : > { %5256 = vmatprep.subr.bf16.mxu0 %v5711_v28 }
  0xd0   : > { %5257 = vmatpush3.bf16.msra.mxu0 %v5711_v28  ;;  %v1730_v28 = vrot.slane %v1728_v0, 2 }
  0xd1   : > { %5258 = vmatprep.subr.bf16.mxu0 %v5712_v54 }
  0xd4   : > { %5259 = vmatpush3.bf16.msra.mxu0 %v5712_v54  ;;  %v1733_v54 = vrot.slane %v1731_v1, 3 }
  0xd5   : > { %5260 = vmatprep.subr.bf16.mxu0 %v5713_v3 }
  0xd6   : > { %v1734_v5 = vor.u32 %v1733_v54, %v1730_v28 }
  0xd8   : > { %5261 = vmatpush3.bf16.msra.mxu0 %v5713_v3  ;;  %v5889_v3 = vmov 0   ;;  %v1735_v7 = vsel %vm1108_vm1, %v6270_v52, %v1734_v5 }
  0xd9   : > { %5262 = vmatprep.subr.bf16.mxu0 %v5714_v4  ;;  %5664 = vset.pattern.permute.xlu1 %v5889_v3  ;;  %2986 = vst [vmem:[#allocation4] sm:$0xc] %v5889_v3  ;;  %2987 = vst [vmem:[#allocation4 + $0x4] sm:$0xf] %v5889_v3 }
  0xda   : > { %2988 = vst [vmem:[#allocation4 + $0x8] sm:$0xf] %v5889_v3  ;;  %2989 = vst [vmem:[#allocation4 + $0xc] sm:$0xf] %v5889_v3  ;;  %5665 = vset.pattern.permute.xlu0 %v5889_v3  ;;  %2021 = vperm.xlu1 %5664, %v4650_v27  }
  0xdb   : > { %2990 = vst [vmem:[#allocation4 + $0x18] sm:$0xc] %v5889_v3  ;;  %2991 = vst [vmem:[#allocation4 + $0x1c] sm:$0xf] %v5889_v3 }
  0xdc   : > { %5263 = vmatpush3.bf16.msra.mxu0 %v5714_v4  ;;  %2992 = vst [vmem:[#allocation4 + $0x20] sm:$0xf] %v5889_v3  ;;  %2993 = vst [vmem:[#allocation4 + $0x24] sm:$0xf] %v5889_v3  ;;  %v5738_v4 = vld [vmem:[%s6868_s20 + $0x1c0] sm:$0xff]  }
  0xdd   : > { %5264 = vmatprep.subr.bf16.mxu0 %v5715_v6  ;;  %2994 = vst [vmem:[#allocation4 + $0x28] sm:$0x3] %v5889_v3  ;;  %3694 = vst [vmem:[#allocation5 + $0x4] sm:$0xf] %v5889_v3 }
  0xde   : > { %3695 = vst [vmem:[#allocation5 + $0x8] sm:$0xf] %v5889_v3  ;;  %3696 = vst [vmem:[#allocation5 + $0xc] sm:$0xf] %v5889_v3 }
  0xdf   : > { %3697 = vst [vmem:[#allocation5 + $0x10] sm:$0xf] %v5889_v3  ;;  %3698 = vst [vmem:[#allocation5 + $0x14] sm:$0xf] %v5889_v3 }
  0xe0   : > { %5265 = vmatpush3.bf16.msra.mxu0 %v5715_v6  ;;  %3699 = vst [vmem:[#allocation5 + $0x18] sm:$0xf] %v5889_v3  ;;  %3700 = vst [vmem:[#allocation5 + $0x1c] sm:$0xf] %v5889_v3  ;;  %v5740_v6 = vld [vmem:[%s6868_s20 + $0x1c8] sm:$0xff]  }
  0xe1   : > { %5266 = vmatprep.subr.bf16.mxu0 %v5716_v9  ;;  %3701 = vst [vmem:[#allocation5 + $0x24] sm:$0xf] %v5889_v3  ;;  %3702 = vst [vmem:[#allocation5 + $0x28] sm:$0xf] %v5889_v3 }
  0xe2   : > { %3703 = vst [vmem:[#allocation5 + $0x2c] sm:$0xf] %v5889_v3  ;;  %3704 = vst [vmem:[#allocation5 + $0x30] sm:$0xf] %v5889_v3 }
  0xe3   : > { %3705 = vst [vmem:[#allocation5 + $0x34] sm:$0xf] %v5889_v3  ;;  %3706 = vst [vmem:[#allocation5 + $0x38] sm:$0xf] %v5889_v3 }
  0xe4   : > { %5267 = vmatpush3.bf16.msra.mxu0 %v5716_v9  ;;  %3707 = vst [vmem:[#allocation5 + $0x3c] sm:$0xf] %v5889_v3  ;;  %3708 = vst [vmem:[#allocation5 + $0x40] sm:$0xf] %v5889_v3  ;;  %v5742_v9 = vld [vmem:[%s6868_s20 + $0x1d8] sm:$0xff]  }
  0xe5   : > { %5272 = vmatprep.subr.bf16.mxu0 %v5718_v60 }
  0xe7   : > { %5269 = vmatmul.mubr.bf16.vlgmr.msra.gmra.mrb[0].mxu0 %v1437_v25 }
  0xe8   : > { %5273 = vmatpush3.bf16.msra.mxu0 %v5718_v60  ;;  %5288 = vmatprep.mubr.bf16.mxu0 %v1577_v26  ;;  %v4649_v26 = vld [vmem:[%s668_s29] ss:$0 sm:$0xff] }
  0xe9   : > { %5274 = vmatprep.subr.bf16.mxu0 %v5720_v24 }
  0xec   : > { %5275 = vmatpush3.bf16.msra.mxu0 %v5720_v24 }
  0xed   : > { %5276 = vmatprep.subr.bf16.mxu0 %v5721_v29 }
  0xf0   : > { %5277 = vmatpush3.bf16.msra.mxu0 %v5721_v29 }
  0xf1   : > { %5278 = vmatprep.subr.bf16.mxu0 %v5722_v30 }
  0xf4   : > { %5279 = vmatpush3.bf16.msra.mxu0 %v5722_v30 }
  0xf5   : > { %5280 = vmatprep.subr.bf16.mxu0 %v5723_v31 }
  0xf8   : > { %5281 = vmatpush3.bf16.msra.mxu0 %v5723_v31 }
  0xf9   : > { %5282 = vmatprep.subr.bf16.mxu0 %v5724_v32 }
  0xfc   : > { %5283 = vmatpush3.bf16.msra.mxu0 %v5724_v32 }
  0xfd   : > { %5284 = vmatprep.subr.bf16.mxu0 %v5725_v37 }
 0x100   : > { %5285 = vmatpush3.bf16.msra.mxu0 %v5725_v37 }
 0x101   : > { %5286 = vmatprep.subr.bf16.mxu0 %v5726_v42 }
 0x104   : > { %5287 = vmatpush3.bf16.msra.mxu0 %v5726_v42 }
 0x105   : > { %5292 = vmatprep.subr.bf16.mxu0 %v5728_v10 }
 0x107   : > { %5289 = vmatmul.mubr.bf16.vlgmr.msra.gmra.mrb[0].mxu0 %v1586_v17 }
 0x108   : > { %5293 = vmatpush3.bf16.msra.mxu0 %v5728_v10  ;;  %5308 = vmatprep.mubr.bf16.mxu0 %v1726_v55 }
 0x109   : > { %5294 = vmatprep.subr.bf16.mxu0 %v5730_v18 }
 0x10c   : > { %5295 = vmatpush3.bf16.msra.mxu0 %v5730_v18 }
 0x10d   : > { %5296 = vmatprep.subr.bf16.mxu0 %v5731_v56 }
 0x110   : > { %5297 = vmatpush3.bf16.msra.mxu0 %v5731_v56 }
 0x111   : > { %5298 = vmatprep.subr.bf16.mxu0 %v5732_v57 }
 0x114   : > { %5299 = vmatpush3.bf16.msra.mxu0 %v5732_v57 }
 0x115   : > { %5300 = vmatprep.subr.bf16.mxu0 %v5733_v58 }
 0x118   : > { %5301 = vmatpush3.bf16.msra.mxu0 %v5733_v58 }
 0x119   : > { %5302 = vmatprep.subr.bf16.mxu0 %v5734_v61 }
 0x11c   : > { %5303 = vmatpush3.bf16.msra.mxu0 %v5734_v61 }
 0x11d   : > { %5304 = vmatprep.subr.bf16.mxu0 %v5735_v63 }
 0x120   : > { %5305 = vmatpush3.bf16.msra.mxu0 %v5735_v63 }
 0x121   : > { %5306 = vmatprep.subr.bf16.mxu0 %v5736_v2 }
 0x124   : > { %5307 = vmatpush3.bf16.msra.mxu0 %v5736_v2 }
 0x125   : > { %5312 = vmatprep.subr.bf16.mxu0 %v5738_v4 }
 0x127   : > { %5309 = vmatmul.mubr.bf16.vlgmr.msra.gmra.mrb[0].mxu0 %v1735_v7 }
 0x128   : > { %5313 = vmatpush3.bf16.msra.mxu0 %v5738_v4  ;;  %5328 = vmatprep.mubr.bf16.mxu0 %v6187_v38  ;;  %v5745_v38 = vld [vmem:[%s6868_s20 + $0x1f0] sm:$0xff]  }
 0x129   : > { %5314 = vmatprep.subr.bf16.mxu0 %v5740_v6 }
 0x12c   : > { %5315 = vmatpush3.bf16.msra.mxu0 %v5740_v6 }
 0x12d   : > { %5316 = vmatprep.subr.bf16.mxu0 %v5741_v8 }
 0x130   : > { %5317 = vmatpush3.bf16.msra.mxu0 %v5741_v8 }
 0x131   : > { %5318 = vmatprep.subr.bf16.mxu0 %v5742_v9 }
 0x134   : > { %5319 = vmatpush3.bf16.msra.mxu0 %v5742_v9 }
 0x135   : > { %5320 = vmatprep.subr.bf16.mxu0 %v5743_v11 }
 0x138   : > { %5321 = vmatpush3.bf16.msra.mxu0 %v5743_v11 }
 0x139   : > { %5322 = vmatprep.subr.bf16.mxu0 %v5744_v12 }
 0x13c   : > { %5323 = vmatpush3.bf16.msra.mxu0 %v5744_v12 }
 0x13d   : > { %5324 = vmatprep.subr.bf16.mxu0 %v5745_v38 }
 0x140   : > { %5325 = vmatpush3.bf16.msra.mxu0 %v5745_v38 }
 0x141   : > { %5326 = vmatprep.subr.bf16.mxu0 %v5746_v13 }
 0x144   : > { %5327 = vmatpush3.bf16.msra.mxu0 %v5746_v13  ;;  %v5748_v13 = vld [vmem:[%s6848_s3 + $0x40] sm:$0xff]  }
 0x145   : > { %5332 = vmatprep.subr.bf16.mxu1 %v5748_v13 }
 0x146   : > { %5333 = vmatpush3.bf16.msra.mxu1 %v5748_v13 }
 0x147   : > { %5329 = vmatmul.mubr.bf16.vlgmr.msra.gmra.mrb[0].mxu0 %v6178_v35  ;;  %v2041_v35 = vsel %vm2039_vm12, 0, %v2040_v21  ;;  %5334 = vmatprep.subr.bf16.mxu1 %v5749_v16  ;;  %vm6374_vm12 = vmor %vm2044_vm5, %vm2172_vm4  ;;  %vm2166_vm4 = vcmask 781824  }
 0x148   : > { %2042 = vst [vmem:[#allocation3 + $0x14] sm:$0xc] %v2041_v35 }
 0x14a   : > { %5335 = vmatpush3.bf16.msra.mxu1 %v5749_v16 }
 0x159   : > { %v2022_v40 = vpop.permute.xlu1 %2021 }
 0x199   : > { %v5210_v14 = vpop.f32.mrb[0].mxu1 }
 0x19a   : > { %v1068_v59 = vpop.f32.mrb[1].mxu1 }
 0x19b   : > { %v5211_v60 = vpop.f32.mrb[2].mxu1 }
 0x19c   : > { %v1071_v15 = vpop.f32.mrb[3].mxu1 }
 0x21a   : > { %v5330_v22 = vpop.f32.mrb[0].mxu0 }
 0x21b   : > { %v5584_v24 = vadd.f32 %v5330_v22, %v5210_v14  ;;  %v1969_v25 = vpop.f32.mrb[1].mxu0 }
 0x21c   : > { %v5585_v29 = vadd.f32 %v1969_v25, %v1068_v59  ;;  %v5331_v30 = vpop.f32.mrb[2].mxu0 }
 0x21d   : > { %v1997_v31 = vmul.f32 %v5584_v24, %v4648_v23  ;;  %v5586_v32 = vadd.f32 %v5331_v30, %v5211_v60  ;;  %v1972_v34 = vpop.f32.mrb[3].mxu0 }
 0x21e   : > { %v1995_v37 = vmul.f32 %v5585_v29, %v4648_v23  ;;  %v5587_v39 = vadd.f32 %v1972_v34, %v1071_v15 }
 0x21f   : > { %v2008_v42 = vadd.f32 %v4649_v26, %v1997_v31  ;;  %v1998_v43 = vmul.f32 %v5586_v32, %v4648_v23 }
 0x220   : > { %v2006_v44 = vadd.f32 %v4649_v26, %v1995_v37  ;;  %v1996_v45 = vmul.f32 %v5587_v39, %v4648_v23 }
 0x221   : > { %vm2012_vm13 = vcmp.ge.f32.partialorder %v2008_v42, 0.0  ;;  %v2009_v46 = vadd.f32 %v4649_v26, %v1998_v43  ;;  %v2026_v47 = vmul.f32 %v2022_v40, %v2008_v42 }
 0x222   : > { %vm2010_vm14 = vcmp.ge.f32.partialorder %v2006_v44, 0.0  ;;  %v2007_v48 = vadd.f32 %v4649_v26, %v1996_v45  ;;  %v2024_v10 = vmul.f32 %v2022_v40, %v2006_v44 }
 0x223   : > { %vm2013_vm3 = vcmp.ge.f32.partialorder %v2009_v46, 0.0  ;;  %v2027_v49 = vmul.f32 %v2022_v40, %v2009_v46  ;;  %v2030_v50 = vsel %vm2012_vm13, %v2008_v42, %v2026_v47  ;;  %v5750_v47 = vld [vmem:[%s6848_s3 + $0x50] sm:$0xff]  }
 0x224   : > { %vm2011_vm10 = vcmp.ge.f32.partialorder %v2007_v48, 0.0  ;;  %v2025_v51 = vmul.f32 %v2022_v40, %v2007_v48  ;;  %v2028_v20 = vsel %vm2010_vm14, %v2006_v44, %v2024_v10  ;;  %v4956_v52 = vpack.c.bf16 %v2030_v50, %v2030_v50  ;;  %5336 = vmatprep.subr.bf16.mxu1 %v5750_v47 }
 0x225   : > { %v2031_v53 = vsel %vm2013_vm3, %v2009_v46, %v2027_v49  ;;  %v4954_v18 = vpack.c.bf16 %v2028_v20, %v2028_v20  ;;  %5337 = vmatpush3.bf16.msra.mxu1 %v5750_v47  ;;  %vm2164_vm14 = vcmask 781827   ;;  %vm2127_vm3 = vcmask 519424  }
 0x226   : > { %v2029_v17 = vsel %vm2011_vm10, %v2007_v48, %v2025_v51  ;;  %v6337_v55 = vpack.c.bf16 %v2031_v53, %v2031_v53  ;;  %v2143_v56 = vrot.slane %v4956_v52, 5  ;;  %v2088_v57 = vshll.u32 %v4956_v52, 16  ;;  %2066 = vst.msk [vmem:[#allocation3 + $0x10] sm:$0xf] %vm2063_vm7, %v4956_v52  ;;  %vm2209_vm10 = vmand %vm2208_vm15, %vm2038_vm11 }
 0x227   : > { %v4955_v58 = vpack.c.bf16 %v2029_v17, %v2029_v17  ;;  %v2138_v61 = vrot.slane %v4954_v18, 5  ;;  %v2069_v63 = vshll.u32 %v4954_v18, 16  ;;  %v2072_v0 = vshrl.u32 %v4954_v18, 16  ;;  %2064 = vst.msk [vmem:[#allocation3 + $0x8] sm:$0xf] %vm2063_vm7, %v4954_v18 }
 0x228   : > { %v2145_v1 = vrot.slane %v2143_v56, 4  ;;  %v2146_v2 = vrot.slane %v6337_v55, 5  ;;  %v2098_v27 = vshll.u32 %v6337_v55, 16  ;;  %v2102_v28 = vshrl.u32 %v6337_v55, 16  ;;  %2067 = vst.msk [vmem:[#allocation3 + $0x14] sm:$0xf] %vm2063_vm7, %v6337_v55 }
 0x229   : > { %2149 = vrot.lane.b32.xlu0 %v2138_v61, %s5888_s0  ;;  %v2139_v54 = vrot.slane %v2138_v61, 4  ;;  %v2071_v3 = vrot.slane %v2069_v63, 5  ;;  %v2074_v4 = vrot.slane %v2072_v0, 4  ;;  %v2174_v5 = vrot.slane %v2072_v0, 5  ;;  %2065 = vst.msk [vmem:[#allocation3 + $0xc] sm:$0xf] %vm2063_vm7, %v4955_v58 }
 0x22a   : > { %v2147_v6 = vsel %vm6342_vm6, %v2145_v1, %v2146_v2  ;;  %v2175_v7 = vrot.slane %v2069_v63, 6  ;;  %v2140_v8 = vrot.slane %v4955_v58, 5  ;;  %v2148_v11 = vrot.slane %v2146_v2, 4  ;;  %v5755_v61 = vld [vmem:[%s6848_s3 + $0x78] sm:$0xff]   ;;  %v6423_v63 = vld [vmem:[%s6848_s3] sm:$0xff]  }
 0x22b   : > { %2155 = vrot.lane.b32.xlu1 %v2147_v6, %s5888_s0  ;;  %v2075_v9 = vor.u32 %v2074_v4, %v2071_v3  ;;  %v2100_v12 = vrot.slane %v2098_v27, 5  ;;  %v6357_v38 = vrot.slane %v2088_v57, 5  ;;  %v2092_v15 = vshrl.u32 %v4956_v52, 16  ;;  %v5751_v52 = vld [vmem:[%s6848_s3 + $0x58] sm:$0xff]   ;;  %v2124_v2 = vld [vmem:[#allocation3 + $0x4] sm:$0x8] }
 0x22c   : > { %v2176_v14 = vor.u32 %v2175_v7, %v2174_v5  ;;  %v2141_v59 = vsel %vm6342_vm6, %v2139_v54, %v2140_v8  ;;  %v2142_v60 = vrot.slane %v2140_v8, 4  ;;  %v2104_v19 = vrot.slane %v2102_v28, 4  ;;  %5338 = vmatprep.subr.bf16.mxu1 %v5751_v52 }
 0x22d   : > { %2107 = vrot.lane.b32.xlu0 %v2071_v3, %s5890_s21  ;;  %v2078_v21 = vshll.u32 %v4955_v58, 16  ;;  %v2082_v35 = vshrl.u32 %v4955_v58, 16  ;;  %v2076_v22 = vrot.slane %v2075_v9, 4  ;;  %v2094_v24 = vrot.slane %v2092_v15, 4  ;;  %5339 = vmatpush3.bf16.msra.mxu1 %v5751_v52 }
 0x22e   : > { %v2144_v23 = vsel %vm6342_vm6, %v2142_v60, %v2143_v56  ;;  %v2183_v25 = vrot.slane %v2092_v15, 5  ;;  %v2177_v26 = vrot.slane %v2176_v14, 4  ;;  %v2184_v37 = vrot.slane %v2088_v57, 6  ;;  %v5752_v56 = vld [vmem:[%s6848_s3 + $0x60] sm:$0xff]   ;;  %v5754_v57 = vld [vmem:[%s6848_s3 + $0x70] sm:$0xff]   ;;  %vm2132_vm6 = vmand %vm2127_vm3, %vm703_vm0 }
 0x22f   : > { %2157 = vrot.lane.b32.xlu1 %v2148_v11, %s5888_s0  ;;  %v2178_v29 = vrot.slane %v2082_v35, 5  ;;  %v2179_v30 = vrot.slane %v2078_v21, 6  ;;  %v2080_v31 = vrot.slane %v2078_v21, 5  ;;  %v2095_v32 = vor.u32 %v2094_v24, %v6357_v38  ;;  %5340 = vmatprep.subr.bf16.mxu1 %v5752_v56  ;;  %v2133_v7 = vld [vmem:[#allocation3 + $0x14] sm:$0xf] }
 0x230   : > { %v2084_v36 = vrot.slane %v2082_v35, 4  ;;  %v2188_v39 = vrot.slane %v2102_v28, 5  ;;  %v2105_v40 = vor.u32 %v2104_v19, %v2100_v12  ;;  %v2189_v43 = vrot.slane %v2098_v27, 6 }
 0x231   : > { %2193 = vrot.lane.b32.xlu0 %v2176_v14, %s5891_s22  ;;  %v2180_v41 = vor.u32 %v2179_v30, %v2178_v29  ;;  %v2081_v42 = vsel %vm6042_vm8, %v2076_v22, %v2080_v31  ;;  %v2096_v44 = vrot.slane %v2095_v32, 4  ;;  %v2185_v46 = vor.u32 %v2184_v37, %v2183_v25  ;;  %5341 = vmatpush3.bf16.msra.mxu1 %v5752_v56  ;;  %v5765_v56 = vld [vmem:[%s6848_s3 + $0x28] sm:$0xff]  }
 0x232   : > { %v2085_v45 = vor.u32 %v2084_v36, %v2080_v31  ;;  %v2190_v49 = vor.u32 %v2189_v43, %v2188_v39  ;;  %v2106_v53 = vrot.slane %v2105_v40, 4  ;;  %5342 = vmatprep.subr.bf16.mxu1 %v5753_v33  ;;  %vm2213_vm11 = vcmask 1044224  }
 0x233   : > { %2151 = vrot.lane.b32.xlu1 %v2141_v59, %s5888_s0  ;;  %v2181_v48 = vsel %vm6374_vm12, %v2177_v26, %v2180_v41  ;;  %v2182_v10 = vrot.slane %v2180_v41, 4  ;;  %v2101_v50 = vsel %vm6042_vm8, %v2096_v44, %v2100_v12  ;;  %v2187_v20 = vrot.slane %v2185_v46, 4 }
 0x234   : > { %v2086_v51 = vrot.slane %v2085_v45, 4  ;;  %v2192_v58 = vrot.slane %v2190_v49, 4  ;;  %vm2217_vm0 = vcmask 1043200  }
 0x235   : > { %2153 = vrot.lane.b32.xlu0 %v2144_v23, %s5888_s0  ;;  %v2186_v18 = vsel %vm6374_vm12, %v2182_v10, %v2185_v46  ;;  %v2191_v55 = vsel %vm6374_vm12, %v2187_v20, %v2190_v49  ;;  %5343 = vmatpush3.bf16.msra.mxu1 %v5753_v33  ;;  %vm2218_vm12 = vmand %vm2217_vm0, %vm2044_vm5  ;;  %v5761_v20 = vld [vmem:[%s6848_s3 + $0x8] sm:$0xff]   ;;  %vm3085_vm0 = vcmask 1042176  }
 0x236   : > { %v2091_v17 = vsel %vm6042_vm8, %v2086_v51, %v6357_v38  ;;  %5344 = vmatprep.subr.bf16.mxu1 %v5754_v57  ;;  %vm2122_vm8 = vcmask 519427  }
 0x237   : > { %2115 = vrot.lane.b32.xlu1 %v2106_v53, %s5890_s21  ;;  %vm2123_vm13 = vmand %vm2122_vm8, %vm698_vm9  ;;  %vm2170_vm9 = vcmask 780800  }
 0x239   : > { %2113 = vrot.lane.b32.xlu0 %v2101_v50, %s5890_s21  ;;  %5345 = vmatpush3.bf16.msra.mxu1 %v5754_v57 }
 0x23a   : > { %5346 = vmatprep.subr.bf16.mxu1 %v5755_v61 }
 0x23b   : > { %2195 = vrot.lane.b32.xlu1 %v2181_v48, %s5891_s22 }
 0x23d   : > { %2109 = vrot.lane.b32.xlu0 %v2081_v42, %s5890_s21  ;;  %5347 = vmatpush3.bf16.msra.mxu1 %v5755_v61 }
 0x23e   : > { %5352 = vmatprep.subr.bf16.mxu1 %v6423_v63 }
 0x23f   : > { %2111 = vrot.lane.b32.xlu1 %v2091_v17, %s5890_s21  ;;  %v5763_v17 = vld [vmem:[%s6848_s3 + $0x18] sm:$0xff]  }
 0x241   : > { %2197 = vrot.lane.b32.xlu0 %v2186_v18, %s5891_s22  ;;  %v5762_v18 = vld [vmem:[%s6848_s3 + $0x10] sm:$0xff]  }
 0x243   : > { %2199 = vrot.lane.b32.xlu1 %v2191_v55, %s5891_s22  ;;  %v5764_v55 = vld [vmem:[%s6848_s3 + $0x20] sm:$0xff]  }
 0x245   : > { %2201 = vrot.lane.b32.xlu0 %v2192_v58, %s5891_s22  ;;  %v5766_v58 = vld [vmem:[%s6848_s3 + $0x30] sm:$0xff]  }
 0x247   : > { %2973 = vperm.xlu1 %5664, %v4756_v62  }
 0x29b   : > { %v2150_v0 = vpop.permute.xlu0 %2149 }
 0x29d   : > { %v2156_v1 = vpop.permute.xlu1 %2155 }
 0x29f   : > { %v2108_v27 = vpop.permute.xlu0 %2107 }
 0x2a0   : > { %v2125_v28 = vsel %vm2123_vm13, %v2108_v27, %v2124_v2 }
 0x2a1   : > { %2126 = vst [vmem:[#allocation3 + $0x4] sm:$0x8] %v2125_v28  ;;  %v2158_v54 = vpop.permute.xlu1 %2157  ;;  %v5769_v28 = vld [vmem:[%s6848_s3 + $0x80] sm:$0xff]  }
 0x2a2   : > { %2165 = vst.msk [vmem:[#allocation3 + $0x4] sm:$0x8] %vm2164_vm14, %v2150_v0  ;;  %v5767_v0 = vld [vmem:[%s6848_s3 + $0x38] sm:$0xff]   ;;  %vm3013_vm14 = vcmask 1041408  }
 0x2a3   : > { %v2194_v3 = vpop.permute.xlu0 %2193 }
 0x2a5   : > { %v2152_v4 = vpop.permute.xlu1 %2151 }
 0x2a7   : > { %v2154_v5 = vpop.permute.xlu0 %2153 }
 0x2a9   : > { %v2210_v6 = vld [vmem:[#allocation3 + $0x4] sm:$0xc]  ;;  %v2116_v8 = vpop.permute.xlu1 %2115 }
 0x2aa   : > { %v2211_v9 = vsel %vm2209_vm10, %v2194_v3, %v2210_v6  ;;  %v2134_v11 = vsel %vm2132_vm6, %v2116_v8, %v2133_v7  ;;  %v5772_v8 = vld [vmem:[%s6848_s3 + $0x88] sm:$0xff]   ;;  %vm3014_vm10 = vcmask 1045508  }
 0x2ab   : > { %2212 = vst [vmem:[#allocation3 + $0x4] sm:$0xc] %v2211_v9  ;;  %2135 = vst [vmem:[#allocation3 + $0x14] sm:$0xf] %v2134_v11  ;;  %v2114_v12 = vpop.permute.xlu0 %2113 }
 0x2ac   : > { %2171 = vst.msk [vmem:[#allocation3 + $0x14] sm:$0x7] %vm2170_vm9, %v2158_v54  ;;  %vm6576_vm6 = vmor %vm3013_vm14, %vm3014_vm10  ;;  %vm3042_vm9 = vcmask 519426  }
 0x2ad   : > { %2130 = vst.msk [vmem:[#allocation3 + $0x10] sm:$0xf] %vm2127_vm3, %v2114_v12  ;;  %v2196_v38 = vpop.permute.xlu1 %2195  ;;  %v5773_v12 = vld [vmem:[%s6848_s3 + $0x90] sm:$0xff]  }
 0x2ae   : > { %2169 = vst.msk [vmem:[#allocation3 + $0x10] sm:$0xf] %vm2166_vm4, %v2156_v1 }
 0x2af   : > { %v2110_v13 = vpop.permute.xlu0 %2109 }
 0x2b0   : > { %2128 = vst.msk [vmem:[#allocation3 + $0x8] sm:$0xf] %vm2127_vm3, %v2110_v13  ;;  %v5775_v13 = vld [vmem:[%s6848_s3 + $0xa0] sm:$0xff]  }
 0x2b1   : > { %2167 = vst.msk [vmem:[#allocation3 + $0x8] sm:$0xf] %vm2166_vm4, %v2152_v4  ;;  %v2112_v14 = vpop.permute.xlu1 %2111 }
 0x2b2   : > { %2214 = vst.msk [vmem:[#allocation3 + $0x8] sm:$0xf] %vm2213_vm11, %v2196_v38  ;;  %v2243_v35 = vld [vmem:[#allocation3 + $0x4] sm:$0xc]  ;;  %v5774_v38 = vld [vmem:[%s6848_s3 + $0x98] sm:$0xff]  }
 0x2b3   : > { %2129 = vst.msk [vmem:[#allocation3 + $0xc] sm:$0xf] %vm2127_vm3, %v2112_v14  ;;  %v2198_v59 = vpop.permute.xlu0 %2197  ;;  %v2219_v15 = vld [vmem:[#allocation3 + $0x14] sm:$0x7]  ;;  %v2222_v22 = vld [vmem:[#allocation3 + $0x4] sm:$0xf] }
 0x2b4   : > { %2168 = vst.msk [vmem:[#allocation3 + $0xc] sm:$0xf] %vm2166_vm4, %v2154_v5  ;;  %v5776_v14 = vld [vmem:[%s6848_s3 + $0xa8] sm:$0xff]  }
 0x2b5   : > { %2215 = vst.msk [vmem:[#allocation3 + $0xc] sm:$0xf] %vm2213_vm11, %v2198_v59  ;;  %v2200_v60 = vpop.permute.xlu1 %2199 }
 0x2b6   : > { %2216 = vst.msk [vmem:[#allocation3 + $0x10] sm:$0xf] %vm2213_vm11, %v2200_v60  ;;  %v5777_v60 = vld [vmem:[%s6848_s3 + $0xb0] sm:$0xff]  }
 0x2b7   : > { %v2202_v16 = vpop.permute.xlu0 %2201 }
 0x2b8   : > { %v2220_v19 = vsel %vm2218_vm12, %v2202_v16, %v2219_v15  ;;  %v5779_v16 = vld [vmem:[#allocation3 + $0x18] ss:$0 sps:$4 sm:$0x11]   ;;  %vm3142_vm12 = vcmask 1045504  }
 0x2b9   : > { %2221 = vst [vmem:[#allocation3 + $0x14] sm:$0x7] %v2220_v19  ;;  %v2223_v21 = vld [vmem:[#allocation3 + $0x8] sm:$0xf] }
 0x2ba   : > { %v4671_v23 = vcombine.low %v2243_v35, %v2223_v21  ;;  %v4682_v24 = vcombine.low %v2222_v22, %v2223_v21  ;;  %v2520_v57 = vld [vmem:[#allocation3 + $0x8] sm:$0xf]  ;;  %v5778_v21 = vld [vmem:[%s6848_s3 + $0xb8] sm:$0xff]  }
 0x2bb   : > { %v2678_v59 = vld [vmem:[#allocation3 + $0x8] sm:$0xc] }
 0x2bc   : > { %v2276_v25 = vshrl.u32 %v4671_v23, 16  ;;  %v2279_v26 = vshll.u32 %v4671_v23, 16  ;;  %v2409_v30 = vshll.u32 %v4682_v24, 16  ;;  %v2407_v46 = vshrl.u32 %v4682_v24, 16  ;;  %v2521_v33 = vld [vmem:[#allocation3 + $0xc] sm:$0xf] }
 0x2bd   : > { %v5757_v29 = vld [vmem:[#allocation3 + $0xc] sm:$0xff]   ;;  %v4708_v61 = vcombine.low %v2520_v57, %v2521_v33  ;;  %v4735_v15 = vcombine.low %v2678_v59, %v2521_v33  ;;  %v2571_v23 = vshll.u32 %v5779_v16, 16  ;;  %v4753_v33 = vld [vmem:[%s6858_s13] ss:$0 sm:$0xff] }
 0x2be   : > { %v2278_v31 = vrot.slane %v2276_v25, 2  ;;  %v2281_v32 = vrot.slane %v2279_v26, 3  ;;  %v2284_v34 = vshrl.u32 %v5757_v29, 16  ;;  %v2287_v36 = vshll.u32 %v5757_v29, 16  ;;  %v5780_v26 = vld [vmem:[%s6848_s3 + $0xc0] sm:$0xff]  }
 0x2bf   : > { %v2411_v41 = vrot.slane %v2409_v30, 1  ;;  %v2558_v1 = vshll.u32 %v4708_v61, 16  ;;  %v2556_v5 = vshrl.u32 %v4708_v61, 16  ;;  %v2704_v35 = vshrl.u32 %v4735_v15, 16 }
 0x2c0   : > { %v5759_v37 = vld [vmem:[#allocation3 + $0x14] ss:$0 sps:$4 sm:$0x77]   ;;  %v2286_v39 = vrot.slane %v2284_v34, 2  ;;  %v2289_v40 = vrot.slane %v2287_v36, 3  ;;  %v2282_v44 = vor.u32 %v2281_v32, %v2278_v31  ;;  %v2413_v50 = vrot.slane %v2287_v36, 1 }
 0x2c1   : > { %v2293_v42 = vshrl.u32 %v5759_v37, 16  ;;  %v2296_v43 = vshll.u32 %v5759_v37, 16  ;;  %v2412_v49 = vor.u32 %v2411_v41, %v2407_v46  ;;  %v5768_v62 = vld [vmem:[#allocation3 + $0x14] ss:$0 sps:$4 sm:$0x11]   ;;  %v2560_v54 = vrot.slane %v2558_v1, 1 }
 0x2c2   : > { %v2290_v45 = vor.u32 %v2289_v40, %v2286_v39  ;;  %v2417_v2 = vshll.u32 %v5768_v62, 16  ;;  %v2415_v3 = vor.u32 %v2413_v50, %v2284_v34  ;;  %v2707_v22 = vshll.u32 %v4735_v15, 16  ;;  %v5782_v37 = vld [vmem:[%s6848_s3 + $0xc8] sm:$0xff]   ;;  %v5783_v41 = vld [vmem:[%s6848_s3 + $0xd0] sm:$0xff]  }
 0x2c3   : > { %v2295_v47 = vrot.slane %v2293_v42, 2  ;;  %v2298_v48 = vrot.slane %v2296_v43, 3  ;;  %v2414_v53 = vsel %vm968_vm2, %v2412_v49, %v2413_v50  ;;  %v2561_v7 = vor.u32 %v2560_v54, %v2556_v5  ;;  %v5784_v42 = vld [vmem:[%s6848_s3 + $0xd8] sm:$0xff]   ;;  %v5785_v43 = vld [vmem:[%s6848_s3 + $0xe0] sm:$0xff]   ;;  %v5787_v46 = vld [vmem:[%s6848_s3 + $0xf0] sm:$0xff]  }
 0x2c4   : > { %v2291_v10 = vsel %vm1108_vm1, %v2282_v44, %v2290_v45  ;;  %v2419_v4 = vrot.slane %v2417_v2, 1  ;;  %v2706_v29 = vrot.slane %v2704_v35, 2  ;;  %v2709_v30 = vrot.slane %v2707_v22, 3  ;;  %v5786_v44 = vld [vmem:[%s6848_s3 + $0xe8] sm:$0xff]   ;;  %v5796_v2 = vld [vmem:[%s6849_s4 + $0x40] sm:$0xff]   ;;  %v5798_v22 = vld [vmem:[%s6849_s4 + $0x50] sm:$0xff]  }
 0x2c5   : > { %5348 = vmatprep.mubr.bf16.mxu1 %v2291_v10  ;;  %v2299_v51 = vor.u32 %v2298_v48, %v2295_v47  ;;  %v2573_v32 = vrot.slane %v2571_v23, 1  ;;  %v5788_v10 = vld [vmem:[%s6848_s3 + $0xf8] sm:$0xff]  }
 0x2c6   : > { %v2420_v9 = vsel %vm968_vm2, %v2415_v3, %v2419_v4  ;;  %v2710_v36 = vor.u32 %v2709_v30, %v2706_v29  ;;  %v5799_v29 = vld [vmem:[%s6849_s4 + $0x58] sm:$0xff]  }
 0x2c7   : > { %v2300_v52 = vsel %vm1108_vm1, %v2290_v45, %v2299_v51  ;;  %v5789_v45 = vld [vmem:[#allocation3 + $0x18] ss:$0 sps:$4 sm:$0x77]   ;;  %v5790_v51 = vld [vmem:[%s6851_s6] sm:$0xff]  }
 0x2c8   : > { %5349 = vmatmul.mubr.bf16.vlgmr.msra.gmra.mrb[4].mxu1 %v2300_v52  ;;  %v2716_v47 = vshrl.u32 %v5789_v45, 16  ;;  %v2719_v48 = vshll.u32 %v5789_v45, 16  ;;  %v5794_v52 = vld [vmem:[%s6116_s23] sm:$0xff]  }
 0x2c9   : > { %5353 = vmatpush3.bf16.msra.mxu1 %v6423_v63  ;;  %5368 = vmatprep.mubr.bf16.mxu1 %v2414_v53  ;;  %v5771_v63 = vld [vmem:[#allocation3 + $0x10] sm:$0xff]  }
 0x2ca   : > { %5354 = vmatprep.subr.bf16.mxu1 %v5761_v20  ;;  %v2563_v27 = vshll.u32 %v5771_v63, 16  ;;  %v2567_v19 = vshrl.u32 %v5771_v63, 16  ;;  %v2718_v49 = vrot.slane %v2716_v47, 2  ;;  %v2721_v50 = vrot.slane %v2719_v48, 3  ;;  %v5791_v53 = vld [vmem:[%s6851_s6 + $0x8] sm:$0xff]   ;;  %v5806_v47 = vld [vmem:[%s6849_s4] sm:$0xff]  }
 0x2cb   : > { %v4755_v63 = vld [vmem:[%s674_s16] ss:$0 sm:$0xff] }
 0x2cc   : > { %v2565_v6 = vrot.slane %v2563_v27, 1  ;;  %v2711_v24 = vrot.slane %v2567_v19, 2  ;;  %v2712_v25 = vrot.slane %v2563_v27, 3 }
 0x2cd   : > { %5355 = vmatpush3.bf16.msra.mxu1 %v5761_v20  ;;  %v2722_v20 = vor.u32 %v2721_v50, %v2718_v49 }
 0x2ce   : > { %5356 = vmatprep.subr.bf16.mxu1 %v5762_v18  ;;  %v2566_v11 = vsel %vm968_vm2, %v2561_v7, %v2565_v6  ;;  %v2569_v31 = vor.u32 %v2567_v19, %v2565_v6  ;;  %v2713_v34 = vor.u32 %v2712_v25, %v2711_v24  ;;  %v2974_v7 = vpop.permute.xlu1 %2973 }
 0x2d0   : > { %v2574_v39 = vsel %vm968_vm2, %v2569_v31, %v2573_v32  ;;  %v2714_v40 = vsel %vm1108_vm1, %v2710_v36, %v2713_v34  ;;  %vm2873_vm2 = vcmask 523264  }
 0x2d1   : > { %5357 = vmatpush3.bf16.msra.mxu1 %v5762_v18  ;;  %v2723_v18 = vsel %vm1108_vm1, %v2713_v34, %v2722_v20 }
 0x2d2   : > { %5358 = vmatprep.subr.bf16.mxu1 %v5763_v17 }
 0x2d5   : > { %5359 = vmatpush3.bf16.msra.mxu1 %v5763_v17  ;;  %v5792_v17 = vld [vmem:[%s6851_s6 + $0x10] sm:$0xff]  }
 0x2d6   : > { %5360 = vmatprep.subr.bf16.mxu1 %v5764_v55 }
 0x2d9   : > { %5361 = vmatpush3.bf16.msra.mxu1 %v5764_v55  ;;  %v5793_v55 = vld [vmem:[%s6851_s6 + $0x18] sm:$0xff]  }
 0x2da   : > { %5362 = vmatprep.subr.bf16.mxu1 %v5765_v56 }
 0x2dd   : > { %5363 = vmatpush3.bf16.msra.mxu1 %v5765_v56  ;;  %v5795_v56 = vld [vmem:[%s6116_s23 + $0x8] sm:$0xff]  }
 0x2de   : > { %5364 = vmatprep.subr.bf16.mxu1 %v5766_v58 }
 0x2e1   : > { %5365 = vmatpush3.bf16.msra.mxu1 %v5766_v58  ;;  %v4754_v58 = vld [vmem:[%s671_s27] ss:$0 sm:$0xff] }
 0x2e2   : > { %5366 = vmatprep.subr.bf16.mxu1 %v5767_v0 }
 0x2e5   : > { %5367 = vmatpush3.bf16.msra.mxu1 %v5767_v0 }
 0x2e6   : > { %5372 = vmatprep.subr.bf16.mxu1 %v5769_v28 }
 0x2e8   : > { %5369 = vmatmul.mubr.bf16.vlgmr.msra.gmra.mrb[4].mxu1 %v2420_v9 }
 0x2e9   : > { %5373 = vmatpush3.bf16.msra.mxu1 %v5769_v28  ;;  %5388 = vmatprep.mubr.bf16.mxu1 %v2566_v11 }
 0x2ea   : > { %5374 = vmatprep.subr.bf16.mxu1 %v5772_v8 }
 0x2ed   : > { %5375 = vmatpush3.bf16.msra.mxu1 %v5772_v8 }
 0x2ee   : > { %5376 = vmatprep.subr.bf16.mxu1 %v5773_v12 }
 0x2f1   : > { %5377 = vmatpush3.bf16.msra.mxu1 %v5773_v12 }
 0x2f2   : > { %5378 = vmatprep.subr.bf16.mxu1 %v5774_v38 }
 0x2f5   : > { %5379 = vmatpush3.bf16.msra.mxu1 %v5774_v38 }
 0x2f6   : > { %5380 = vmatprep.subr.bf16.mxu1 %v5775_v13 }
 0x2f9   : > { %5381 = vmatpush3.bf16.msra.mxu1 %v5775_v13 }
 0x2fa   : > { %5382 = vmatprep.subr.bf16.mxu1 %v5776_v14 }
 0x2fd   : > { %5383 = vmatpush3.bf16.msra.mxu1 %v5776_v14  ;;  %v5797_v14 = vld [vmem:[%s6849_s4 + $0x48] sm:$0xff]  }
 0x2fe   : > { %5384 = vmatprep.subr.bf16.mxu1 %v5777_v60 }
 0x301   : > { %5385 = vmatpush3.bf16.msra.mxu1 %v5777_v60 }
 0x302   : > { %5386 = vmatprep.subr.bf16.mxu1 %v5778_v21 }
 0x305   : > { %5387 = vmatpush3.bf16.msra.mxu1 %v5778_v21 }
 0x306   : > { %5392 = vmatprep.subr.bf16.mxu1 %v5780_v26 }
 0x308   : > { %5389 = vmatmul.mubr.bf16.vlgmr.msra.gmra.mrb[4].mxu1 %v2574_v39 }
 0x309   : > { %5393 = vmatpush3.bf16.msra.mxu1 %v5780_v26  ;;  %5408 = vmatprep.mubr.bf16.mxu1 %v2714_v40 }
 0x30a   : > { %5394 = vmatprep.subr.bf16.mxu1 %v5782_v37 }
 0x30d   : > { %5395 = vmatpush3.bf16.msra.mxu1 %v5782_v37  ;;  %v5800_v37 = vld [vmem:[%s6849_s4 + $0x60] sm:$0xff]  }
 0x30e   : > { %5396 = vmatprep.subr.bf16.mxu1 %v5783_v41 }
 0x311   : > { %5397 = vmatpush3.bf16.msra.mxu1 %v5783_v41 }
 0x312   : > { %5398 = vmatprep.subr.bf16.mxu1 %v5784_v42 }
 0x315   : > { %5399 = vmatpush3.bf16.msra.mxu1 %v5784_v42  ;;  %v5801_v42 = vld [vmem:[%s6849_s4 + $0x68] sm:$0xff]  }
 0x316   : > { %5400 = vmatprep.subr.bf16.mxu1 %v5785_v43 }
 0x319   : > { %5401 = vmatpush3.bf16.msra.mxu1 %v5785_v43 }
 0x31a   : > { %5402 = vmatprep.subr.bf16.mxu1 %v5786_v44 }
 0x31d   : > { %5403 = vmatpush3.bf16.msra.mxu1 %v5786_v44  ;;  %v5802_v44 = vld [vmem:[%s6849_s4 + $0x70] sm:$0xff]  }
 0x31e   : > { %5404 = vmatprep.subr.bf16.mxu1 %v5787_v46 }
 0x321   : > { %5405 = vmatpush3.bf16.msra.mxu1 %v5787_v46  ;;  %v5803_v46 = vld [vmem:[%s6849_s4 + $0x78] sm:$0xff]  }
 0x322   : > { %5406 = vmatprep.subr.bf16.mxu1 %v5788_v10 }
 0x325   : > { %5407 = vmatpush3.bf16.msra.mxu1 %v5788_v10 }
 0x326   : > { %5412 = vmatprep.subr.bf16.mxu1 %v5790_v51 }
 0x328   : > { %5409 = vmatmul.mubr.bf16.vlgmr.msra.gmra.mrb[4].mxu1 %v2723_v18 }
 0x329   : > { %5413 = vmatpush3.bf16.msra.mxu1 %v5790_v51  ;;  %5420 = vmatprep.mubr.msk.bf16.mxu1 %vm2873_vm2, %v5794_v52  ;;  %v4855_v51 = vld [vmem:[#allocation8] ss:$0 sm:$0xff] }
 0x32a   : > { %5414 = vmatprep.subr.bf16.mxu1 %v5791_v53 }
 0x32d   : > { %5415 = vmatpush3.bf16.msra.mxu1 %v5791_v53 }
 0x32e   : > { %5416 = vmatprep.subr.bf16.mxu1 %v5792_v17 }
 0x331   : > { %5417 = vmatpush3.bf16.msra.mxu1 %v5792_v17 }
 0x332   : > { %5418 = vmatprep.subr.bf16.mxu1 %v5793_v55 }
 0x335   : > { %5419 = vmatpush3.bf16.msra.mxu1 %v5793_v55 }
 0x336   : > { %5424 = vmatprep.subr.bf16.mxu1 %v5796_v2 }
 0x338   : > { %5421 = vmatmul.mubr.msk.bf16.vlgmr.msra.gmra.mrb[4].mxu1 %vm2873_vm2, %v5795_v56 }
 0x339   : > { %5425 = vmatpush3.bf16.msra.mxu1 %v5796_v2 }
 0x33a   : > { %5426 = vmatprep.subr.bf16.mxu1 %v5797_v14 }
 0x33d   : > { %5427 = vmatpush3.bf16.msra.mxu1 %v5797_v14 }
 0x33e   : > { %5428 = vmatprep.subr.bf16.mxu1 %v5798_v22 }
 0x341   : > { %5429 = vmatpush3.bf16.msra.mxu1 %v5798_v22 }
 0x342   : > { %5430 = vmatprep.subr.bf16.mxu1 %v5799_v29 }
 0x345   : > { %5431 = vmatpush3.bf16.msra.mxu1 %v5799_v29 }
 0x346   : > { %5432 = vmatprep.subr.bf16.mxu1 %v5800_v37 }
 0x349   : > { %5433 = vmatpush3.bf16.msra.mxu1 %v5800_v37  ;;  %v5823_v37 = vld [vmem:[%s6849_s4 + $0x98] sm:$0xff]  }
 0x34a   : > { %5434 = vmatprep.subr.bf16.mxu1 %v5801_v42 }
 0x34d   : > { %5435 = vmatpush3.bf16.msra.mxu1 %v5801_v42  ;;  %v5827_v42 = vld [vmem:[%s6849_s4 + $0xb8] sm:$0xff]  }
 0x34e   : > { %5436 = vmatprep.subr.bf16.mxu1 %v5802_v44 }
 0x351   : > { %5437 = vmatpush3.bf16.msra.mxu1 %v5802_v44 }
 0x352   : > { %5438 = vmatprep.subr.bf16.mxu1 %v5803_v46 }
 0x355   : > { %5439 = vmatpush3.bf16.msra.mxu1 %v5803_v46  ;;  %v5829_v46 = vld [vmem:[%s6849_s4 + $0xc0] sm:$0xff]  }
 0x356   : > { %5444 = vmatprep.subr.bf16.mxu1 %v5806_v47 }
 0x40b   : > { %v5422_v57 = vpop.f32.mrb[4].mxu1 }
 0x40c   : > { %v6544_v61 = vadd.f32 %v5422_v57, %v4753_v33  ;;  %v2914_v62 = vpop.f32.mrb[5].mxu1 }
 0x40d   : > { %v6546_v0 = vadd.f32 %v4753_v33, %v2914_v62  ;;  %v5423_v1 = vpop.f32.mrb[6].mxu1 }
 0x40e   : > { %v2949_v27 = vmul.f32 %v4754_v58, %v6544_v61  ;;  %v6552_v28 = vadd.f32 %v5423_v1, %v4753_v33  ;;  %v2917_v54 = vpop.f32.mrb[7].mxu1 }
 0x40f   : > { %v2947_v3 = vmul.f32 %v4754_v58, %v6546_v0  ;;  %v6555_v4 = vadd.f32 %v4753_v33, %v2917_v54  ;;  %v5808_v54 = vld [vmem:[#allocation4] sm:$0xfc]  }
 0x410   : > { %v2960_v5 = vadd.f32 %v4755_v63, %v2949_v27  ;;  %v2950_v6 = vmul.f32 %v4754_v58, %v6552_v28 }
 0x411   : > { %v2958_v8 = vadd.f32 %v4755_v63, %v2947_v3  ;;  %v2948_v9 = vmul.f32 %v4754_v58, %v6555_v4 }
 0x412   : > { %v2961_v11 = vadd.f32 %v4755_v63, %v2950_v6  ;;  %vm2964_vm1 = vcmp.ge.f32.partialorder %v2960_v5, 0.0  ;;  %v2978_v12 = vmul.f32 %v2974_v7, %v2960_v5 }
 0x413   : > { %v2959_v38 = vadd.f32 %v4755_v63, %v2948_v9  ;;  %vm2962_vm5 = vcmp.ge.f32.partialorder %v2958_v8, 0.0  ;;  %v2976_v13 = vmul.f32 %v2974_v7, %v2958_v8  ;;  %v3258_v9 = vrot.slane %v5808_v54, 2 }
 0x414   : > { %v2982_v59 = vsel %vm2964_vm1, %v2960_v5, %v2978_v12  ;;  %vm2965_vm8 = vcmp.ge.f32.partialorder %v2961_v11, 0.0  ;;  %v2979_v60 = vmul.f32 %v2974_v7, %v2961_v11 }
 0x415   : > { %v4960_v15 = vpack.c.bf16 %v2982_v59, %v2982_v59  ;;  %v2980_v16 = vsel %vm2962_vm5, %v2958_v8, %v2976_v13  ;;  %vm2963_vm13 = vcmp.ge.f32.partialorder %v2959_v38, 0.0  ;;  %v2977_v19 = vmul.f32 %v2974_v7, %v2959_v38  ;;  %v5810_v13 = vld [vmem:[%s6849_s4 + $0x8] sm:$0xff]  }
 0x416   : > { %v2983_v21 = vsel %vm2965_vm8, %v2961_v11, %v2979_v60  ;;  %v4958_v35 = vpack.c.bf16 %v2980_v16, %v2980_v16  ;;  %v5811_v60 = vld [vmem:[%s6849_s4 + $0x10] sm:$0xff]   ;;  %v5813_v16 = vld [vmem:[%s6849_s4 + $0x20] sm:$0xff]  }
 0x417   : > { %3053 = vrot.lane.b32.xlu0 %v4960_v15, %s5888_s0  ;;  %3011 = vst.msk [vmem:[#allocation4 + $0x18] sm:$0xf] %vm2063_vm7, %v4960_v15  ;;  %v4961_v23 = vpack.c.bf16 %v2983_v21, %v2983_v21  ;;  %v2981_v24 = vsel %vm2963_vm13, %v2959_v38, %v2977_v19  ;;  %v3021_v26 = vrot.slane %v4960_v15, 6  ;;  %v5812_v15 = vld [vmem:[%s6849_s4 + $0x18] sm:$0xff]   ;;  %v5814_v19 = vld [vmem:[%s6849_s4 + $0x28] sm:$0xff]   ;;  %v5815_v21 = vld [vmem:[%s6849_s4 + $0x30] sm:$0xff]  }
 0x418   : > { %3009 = vst.msk [vmem:[#allocation4 + $0x10] sm:$0xf] %vm2063_vm7, %v4958_v35  ;;  %v4959_v25 = vpack.c.bf16 %v2981_v24, %v2981_v24  ;;  %v3016_v30 = vrot.slane %v4958_v35, 6  ;;  %v5818_v24 = vld [vmem:[%s6849_s4 + $0x80] sm:$0xff]  }
 0x419   : > { %3055 = vrot.lane.b32.xlu1 %v4961_v23, %s5888_s0  ;;  %3012 = vst.msk [vmem:[#allocation4 + $0x1c] sm:$0xf] %vm2063_vm7, %v4961_v23  ;;  %v3023_v31 = vrot.slane %v3021_v26, 4  ;;  %v3024_v32 = vrot.slane %v4961_v23, 6 }
 0x41a   : > { %3010 = vst.msk [vmem:[#allocation4 + $0x14] sm:$0xf] %vm2063_vm7, %v4959_v25  ;;  %v3018_v36 = vrot.slane %v4959_v25, 6  ;;  %v3017_v40 = vrot.slane %v3016_v30, 4 }
 0x41b   : > { %3049 = vrot.lane.b32.xlu0 %v4958_v35, %s5888_s0  ;;  %v3025_v39 = vsel %vm6576_vm6, %v3023_v31, %v3024_v32  ;;  %v3026_v48 = vrot.slane %v3024_v32, 4  ;;  %v5816_v35 = vld [vmem:[%s6849_s4 + $0x38] sm:$0xff]   ;;  %v5821_v31 = vld [vmem:[%s6849_s4 + $0x88] sm:$0xff]  }
 0x41c   : > { %v3020_v41 = vrot.slane %v3018_v36, 4  ;;  %v3019_v43 = vsel %vm6576_vm6, %v3017_v40, %v3018_v36  ;;  %v5822_v36 = vld [vmem:[%s6849_s4 + $0x90] sm:$0xff]   ;;  %v5825_v40 = vld [vmem:[%s6849_s4 + $0xa8] sm:$0xff]  }
 0x41d   : > { %3051 = vrot.lane.b32.xlu1 %v4959_v25, %s5888_s0 }
 0x41e   : > { %v3022_v45 = vsel %vm6576_vm6, %v3020_v41, %v3021_v26  ;;  %v5826_v41 = vld [vmem:[%s6849_s4 + $0xb0] sm:$0xff]  }
 0x41f   : > { %3027 = vrot.lane.b32.xlu0 %v3016_v30, %s5890_s21 }
 0x421   : > { %3033 = vrot.lane.b32.xlu1 %v3025_v39, %s5890_s21 }
 0x423   : > { %3065 = vrot.lane.b32.xlu0 %v3016_v30, %s5891_s22 }
 0x425   : > { %3029 = vrot.lane.b32.xlu1 %v3019_v43, %s5890_s21 }
 0x427   : > { %3031 = vrot.lane.b32.xlu0 %v3022_v45, %s5890_s21 }
 0x429   : > { %3067 = vrot.lane.b32.xlu1 %v3019_v43, %s5891_s22  ;;  %v5828_v43 = vld [vmem:[#allocation4 + $0x20] ss:$0 sps:$4 sm:$0x33]  }
 0x42b   : > { %3069 = vrot.lane.b32.xlu0 %v3022_v45, %s5891_s22  ;;  %v5831_v45 = vld [vmem:[#allocation4 + $0x20] sm:$0xff]  }
 0x42d   : > { %3071 = vrot.lane.b32.xlu1 %v3025_v39, %s5891_s22  ;;  %v5824_v39 = vld [vmem:[%s6849_s4 + $0xa0] sm:$0xff]  }
 0x42f   : > { %3073 = vrot.lane.b32.xlu0 %v3026_v48, %s5891_s22 }
 0x431   : > { %3035 = vrot.lane.b32.xlu1 %v3026_v48, %s5890_s21 }
 0x433   : > { %3681 = vperm.xlu0 %5665, %v4855_v51  }
 0x489   : > { %v3054_v10 = vpop.permute.xlu0 %3053 }
 0x48b   : > { %v3056_v49 = vpop.permute.xlu1 %3055 }
 0x48d   : > { %v3050_v50 = vpop.permute.xlu0 %3049 }
 0x48f   : > { %v3052_v20 = vpop.permute.xlu1 %3051 }
 0x491   : > { %v3028_v52 = vpop.permute.xlu0 %3027 }
 0x492   : > { %3043 = vst.msk [vmem:[#allocation4 + $0xc] sm:$0xc] %vm3042_vm9, %v3028_v52  ;;  %v5834_v52 = vld [vmem:[%s6849_s4 + $0xd8] sm:$0xff]  }
 0x493   : > { %3061 = vst.msk [vmem:[#allocation4 + $0xc] sm:$0xf] %vm2166_vm4, %v3050_v50  ;;  %v3034_v53 = vpop.permute.xlu1 %3033 }
 0x494   : > { %3046 = vst.msk [vmem:[#allocation4 + $0x18] sm:$0xf] %vm2127_vm3, %v3034_v53  ;;  %v5835_v53 = vld [vmem:[%s6849_s4 + $0xe0] sm:$0xff]  }
 0x495   : > { %3064 = vst.msk [vmem:[#allocation4 + $0x18] sm:$0xf] %vm2166_vm4, %v3056_v49  ;;  %v3066_v18 = vpop.permute.xlu0 %3065  ;;  %v5832_v49 = vld [vmem:[%s6849_s4 + $0xc8] sm:$0xff]  }
 0x496   : > { %3081 = vst.msk [vmem:[#allocation4 + $0x8] sm:$0xc] %vm2208_vm15, %v3066_v18  ;;  %vm3047_vm15 = vcmask 517376   ;;  %v5836_v18 = vld [vmem:[%s6849_s4 + $0xe8] sm:$0xff]  }
 0x497   : > { %v3030_v17 = vpop.permute.xlu1 %3029 }
 0x498   : > { %3044 = vst.msk [vmem:[#allocation4 + $0x10] sm:$0xf] %vm2127_vm3, %v3030_v17  ;;  %v5837_v17 = vld [vmem:[%s6849_s4 + $0xf0] sm:$0xff]  }
 0x499   : > { %3062 = vst.msk [vmem:[#allocation4 + $0x10] sm:$0xf] %vm2166_vm4, %v3052_v20  ;;  %v3032_v55 = vpop.permute.xlu0 %3031  ;;  %v5833_v20 = vld [vmem:[%s6849_s4 + $0xd0] sm:$0xff]  }
 0x49a   : > { %3045 = vst.msk [vmem:[#allocation4 + $0x14] sm:$0xf] %vm2127_vm3, %v3032_v55  ;;  %v5839_v55 = vld [vmem:[#allocation4 + $0x28] ss:$0 sps:$4 sm:$0x33]  }
 0x49b   : > { %3063 = vst.msk [vmem:[#allocation4 + $0x14] sm:$0xf] %vm2166_vm4, %v3054_v10  ;;  %v3068_v56 = vpop.permute.xlu1 %3067  ;;  %v3541_v10 = vrot.slane %v5831_v45, 2 }
 0x49c   : > { %3082 = vst.msk [vmem:[#allocation4 + $0xc] sm:$0xf] %vm2213_vm11, %v3068_v56  ;;  %v5838_v56 = vld [vmem:[%s6849_s4 + $0xf8] sm:$0xff]  }
 0x49d   : > { %v3070_v33 = vpop.permute.xlu0 %3069  ;;  %v3108_v1 = vld [vmem:[#allocation4 + $0x8] sm:$0xc] }
 0x49e   : > { %3083 = vst.msk [vmem:[#allocation4 + $0x10] sm:$0xf] %vm2213_vm11, %v3070_v33  ;;  %v3089_v27 = vld [vmem:[#allocation4 + $0x8] sm:$0xf]  ;;  %v3543_v33 = vrot.slane %v5839_v55, 2  ;;  %v5856_v55 = vld [vmem:[%s6850_s5 + $0x30] sm:$0xff]  }
 0x49f   : > { %v3072_v57 = vpop.permute.xlu1 %3071 }
 0x4a0   : > { %3084 = vst.msk [vmem:[#allocation4 + $0x14] sm:$0xf] %vm2213_vm11, %v3072_v57  ;;  %v3544_v57 = vsel %vm3142_vm12, %v3541_v10, %v3543_v33  ;;  %v5860_v33 = vld [vmem:[%s6850_s5 + $0x80] sm:$0xff]  }
 0x4a1   : > { %v3074_v58 = vpop.permute.xlu0 %3073 }
 0x4a2   : > { %3086 = vst.msk [vmem:[#allocation4 + $0x18] sm:$0x3] %vm3085_vm0, %v3074_v58  ;;  %v5840_v58 = vld [vmem:[%s6850_s5 + $0x40] sm:$0xff]  }
 0x4a3   : > { %v3036_v62 = vpop.permute.xlu1 %3035  ;;  %v3090_v63 = vld [vmem:[#allocation4 + $0xc] sm:$0xf]  ;;  %5504 = vmatprep.subr.bf16.mxu0 %v5840_v58 }
 0x4a4   : > { %3048 = vst.msk [vmem:[#allocation4 + $0x1c] sm:$0x3] %vm3047_vm15, %v3036_v62  ;;  %v4777_v2 = vcombine.low %v3108_v1, %v3090_v63  ;;  %v4789_v3 = vcombine.low %v3089_v27, %v3090_v63  ;;  %v5841_v62 = vld [vmem:[%s6850_s5 + $0x48] sm:$0xff]   ;;  %5505 = vmatpush3.bf16.msra.mxu0 %v5840_v58  ;;  %v4853_v63 = vld [vmem:[%s677_s19] ss:$0 sm:$0xff]  ;;  %v5842_v1 = vld [vmem:[%s6850_s5 + $0x50] sm:$0xff]  }
 0x4a5   : > { %v5817_v22 = vld [vmem:[#allocation4 + $0x10] ss:$0 sps:$4 sm:$0x33]   ;;  %5506 = vmatprep.subr.bf16.mxu0 %v5841_v62  ;;  %v4854_v27 = vld [vmem:[%s680_s17] ss:$0 sm:$0xff] }
 0x4a6   : > { %v3143_v6 = vrot.slane %v4777_v2, 2  ;;  %v3259_v11 = vrot.slane %v4789_v3, 2  ;;  %v3261_v26 = vrot.slane %v5817_v22, 2  ;;  %v5862_v58 = vld [vmem:[%s6850_s5 + $0x88] sm:$0xff]  }
 0x4a7   : > { %v5805_v5 = vld [vmem:[#allocation4 + $0x10] sm:$0xff]  }
 0x4a8   : > { %v3144_v7 = vrot.slane %v5805_v5, 2  ;;  %v3260_v59 = vsel %vm3142_vm12, %v3258_v9, %v3259_v11  ;;  %v5819_v25 = vld [vmem:[#allocation4 + $0x10] sm:$0xfc]   ;;  %v3262_v32 = vsel %vm3142_vm12, %v3259_v11, %v3261_v26  ;;  %5507 = vmatpush3.bf16.msra.mxu0 %v5841_v62 }
 0x4a9   : > { %v5807_v8 = vld [vmem:[#allocation4 + $0x18] ss:$0 sps:$4 sm:$0x33]   ;;  %v3397_v30 = vrot.slane %v5819_v25, 2  ;;  %5508 = vmatprep.subr.bf16.mxu0 %v5842_v1 }
 0x4aa   : > { %v3145_v12 = vsel %vm3142_vm12, %v3143_v6, %v3144_v7  ;;  %v3146_v38 = vrot.slane %v5807_v8, 2  ;;  %v5843_v8 = vld [vmem:[%s6850_s5 + $0x58] sm:$0xff]  }
 0x4ab   : > { %5440 = vmatprep.mubr.bf16.mxu1 %v3145_v12  ;;  %v5820_v23 = vld [vmem:[#allocation4 + $0x18] sm:$0xff]  }
 0x4ac   : > { %v3147_v14 = vsel %vm3142_vm12, %v3144_v7, %v3146_v38  ;;  %v3398_v29 = vrot.slane %v5820_v23, 2  ;;  %v5830_v44 = vld [vmem:[#allocation4 + $0x18] sm:$0xfc]   ;;  %5509 = vmatpush3.bf16.msra.mxu0 %v5842_v1  ;;  %v5864_v1 = vld [vmem:[%s6850_s5 + $0x98] sm:$0xff]  }
 0x4ad   : > { %5441 = vmatmul.mubr.bf16.vlgmr.msra.gmra.mrb[8].mxu1 %v3147_v14  ;;  %v3540_v48 = vrot.slane %v5830_v44, 2  ;;  %5510 = vmatprep.subr.bf16.mxu0 %v5843_v8 }
 0x4ae   : > { %5445 = vmatpush3.bf16.msra.mxu1 %v5806_v47  ;;  %5460 = vmatprep.mubr.bf16.mxu1 %v3260_v59  ;;  %v3399_v34 = vsel %vm3142_vm12, %v3397_v30, %v3398_v29  ;;  %v3400_v47 = vrot.slane %v5828_v43, 2  ;;  %v5845_v30 = vld [vmem:[%s6850_s5 + $0x68] sm:$0xff]  }
 0x4af   : > { %5446 = vmatprep.subr.bf16.mxu1 %v5810_v13  ;;  %v3542_v51 = vsel %vm3142_vm12, %v3540_v48, %v3541_v10 }
 0x4b0   : > { %v3401_v50 = vsel %vm3142_vm12, %v3398_v29, %v3400_v47  ;;  %5511 = vmatpush3.bf16.msra.mxu0 %v5843_v8  ;;  %v5871_v8 = vld [vmem:[%s6850_s5 + $0xc8] sm:$0xff]  }
 0x4b2   : > { %5447 = vmatpush3.bf16.msra.mxu1 %v5810_v13  ;;  %v3682_v7 = vpop.permute.xlu0 %3681 }
 0x4b3   : > { %5448 = vmatprep.subr.bf16.mxu1 %v5811_v60 }
 0x4b6   : > { %5449 = vmatpush3.bf16.msra.mxu1 %v5811_v60 }
 0x4b7   : > { %5450 = vmatprep.subr.bf16.mxu1 %v5812_v15 }
 0x4ba   : > { %5451 = vmatpush3.bf16.msra.mxu1 %v5812_v15 }
 0x4bb   : > { %5452 = vmatprep.subr.bf16.mxu1 %v5813_v16 }
 0x4be   : > { %5453 = vmatpush3.bf16.msra.mxu1 %v5813_v16 }
 0x4bf   : > { %5454 = vmatprep.subr.bf16.mxu1 %v5814_v19 }
 0x4c2   : > { %5455 = vmatpush3.bf16.msra.mxu1 %v5814_v19 }
 0x4c3   : > { %5456 = vmatprep.subr.bf16.mxu1 %v5815_v21 }
 0x4c6   : > { %5457 = vmatpush3.bf16.msra.mxu1 %v5815_v21  ;;  %v5844_v21 = vld [vmem:[%s6850_s5 + $0x60] sm:$0xff]  }
 0x4c7   : > { %5458 = vmatprep.subr.bf16.mxu1 %v5816_v35  ;;  %5512 = vmatprep.subr.bf16.mxu0 %v5844_v21 }
 0x4c8   : > { %5513 = vmatpush3.bf16.msra.mxu0 %v5844_v21 }
 0x4c9   : > { %5514 = vmatprep.subr.bf16.mxu0 %v5845_v30 }
 0x4ca   : > { %5459 = vmatpush3.bf16.msra.mxu1 %v5816_v35 }
 0x4cb   : > { %5464 = vmatprep.subr.bf16.mxu1 %v5818_v24 }
 0x4cc   : > { %5515 = vmatpush3.bf16.msra.mxu0 %v5845_v30 }
 0x4cd   : > { %5461 = vmatmul.mubr.bf16.vlgmr.msra.gmra.mrb[8].mxu1 %v3262_v32  ;;  %v5846_v32 = vld [vmem:[%s6850_s5 + $0x70] sm:$0xff]  }
 0x4ce   : > { %5465 = vmatpush3.bf16.msra.mxu1 %v5818_v24  ;;  %5480 = vmatprep.mubr.bf16.mxu1 %v3399_v34  ;;  %v5848_v34 = vld [vmem:[%s6850_s5 + $0x78] sm:$0xff]  }
 0x4cf   : > { %5466 = vmatprep.subr.bf16.mxu1 %v5821_v31  ;;  %5516 = vmatprep.subr.bf16.mxu0 %v5846_v32 }
 0x4d0   : > { %5517 = vmatpush3.bf16.msra.mxu0 %v5846_v32 }
 0x4d1   : > { %5518 = vmatprep.subr.bf16.mxu0 %v5848_v34 }
 0x4d2   : > { %5467 = vmatpush3.bf16.msra.mxu1 %v5821_v31 }
 0x4d3   : > { %5468 = vmatprep.subr.bf16.mxu1 %v5822_v36 }
 0x4d4   : > { %5519 = vmatpush3.bf16.msra.mxu0 %v5848_v34 }
 0x4d6   : > { %5469 = vmatpush3.bf16.msra.mxu1 %v5822_v36  ;;  %v5849_v36 = vld [vmem:[%s6850_s5] sm:$0xff]  }
 0x4d7   : > { %5470 = vmatprep.subr.bf16.mxu1 %v5823_v37  ;;  %5524 = vmatprep.subr.bf16.mxu0 %v5849_v36 }
 0x4da   : > { %5471 = vmatpush3.bf16.msra.mxu1 %v5823_v37 }
 0x4db   : > { %5472 = vmatprep.subr.bf16.mxu1 %v5824_v39 }
 0x4de   : > { %5473 = vmatpush3.bf16.msra.mxu1 %v5824_v39 }
 0x4df   : > { %5474 = vmatprep.subr.bf16.mxu1 %v5825_v40 }
 0x4e2   : > { %5475 = vmatpush3.bf16.msra.mxu1 %v5825_v40 }
 0x4e3   : > { %5476 = vmatprep.subr.bf16.mxu1 %v5826_v41 }
 0x4e6   : > { %5477 = vmatpush3.bf16.msra.mxu1 %v5826_v41 }
 0x4e7   : > { %5478 = vmatprep.subr.bf16.mxu1 %v5827_v42 }
 0x4ea   : > { %5479 = vmatpush3.bf16.msra.mxu1 %v5827_v42 }
 0x4eb   : > { %5484 = vmatprep.subr.bf16.mxu1 %v5829_v46 }
 0x4ed   : > { %5481 = vmatmul.mubr.bf16.vlgmr.msra.gmra.mrb[8].mxu1 %v3401_v50 }
 0x4ee   : > { %5485 = vmatpush3.bf16.msra.mxu1 %v5829_v46  ;;  %5500 = vmatprep.mubr.bf16.mxu1 %v3542_v51 }
 0x4ef   : > { %5486 = vmatprep.subr.bf16.mxu1 %v5832_v49 }
 0x4f2   : > { %5487 = vmatpush3.bf16.msra.mxu1 %v5832_v49  ;;  %v5858_v49 = vld [vmem:[#allocation5 + $0x4] sm:$0xff]  }
 0x4f3   : > { %5488 = vmatprep.subr.bf16.mxu1 %v5833_v20 }
 0x4f6   : > { %5489 = vmatpush3.bf16.msra.mxu1 %v5833_v20  ;;  %v5851_v20 = vld [vmem:[%s6850_s5 + $0x8] sm:$0xff]  }
 0x4f7   : > { %5490 = vmatprep.subr.bf16.mxu1 %v5834_v52 }
 0x4fa   : > { %5491 = vmatpush3.bf16.msra.mxu1 %v5834_v52  ;;  %v5852_v52 = vld [vmem:[%s6850_s5 + $0x10] sm:$0xff]  }
 0x4fb   : > { %5492 = vmatprep.subr.bf16.mxu1 %v5835_v53 }
 0x4fe   : > { %5493 = vmatpush3.bf16.msra.mxu1 %v5835_v53  ;;  %v5853_v53 = vld [vmem:[%s6850_s5 + $0x18] sm:$0xff]  }
 0x4ff   : > { %5494 = vmatprep.subr.bf16.mxu1 %v5836_v18 }
 0x502   : > { %5495 = vmatpush3.bf16.msra.mxu1 %v5836_v18  ;;  %v5854_v18 = vld [vmem:[%s6850_s5 + $0x20] sm:$0xff]  }
 0x503   : > { %5496 = vmatprep.subr.bf16.mxu1 %v5837_v17 }
 0x506   : > { %5497 = vmatpush3.bf16.msra.mxu1 %v5837_v17  ;;  %v5855_v17 = vld [vmem:[%s6850_s5 + $0x28] sm:$0xff]  }
 0x507   : > { %5498 = vmatprep.subr.bf16.mxu1 %v5838_v56 }
 0x50a   : > { %5499 = vmatpush3.bf16.msra.mxu1 %v5838_v56  ;;  %v5857_v56 = vld [vmem:[%s6850_s5 + $0x38] sm:$0xff]  }
 0x50d   : > { %5501 = vmatmul.mubr.bf16.vlgmr.msra.gmra.mrb[8].mxu1 %v3544_v57  ;;  %v5859_v57 = vld [vmem:[#allocation5 + $0xc] sm:$0xff]  }
 0x5e0   : > { %v5502_v2 = vpop.f32.mrb[8].mxu1 }
 0x5e1   : > { %v3657_v54 = vmul.f32 %v5502_v2, %v4853_v63  ;;  %v3629_v3 = vpop.f32.mrb[9].mxu1  ;;  %v5865_v2 = vld [vmem:[%s6850_s5 + $0xa0] sm:$0xff]  }
 0x5e2   : > { %v3655_v5 = vmul.f32 %v4853_v63, %v3629_v3  ;;  %v5503_v6 = vpop.f32.mrb[10].mxu1  ;;  %v5868_v3 = vld [vmem:[%s6850_s5 + $0xb8] sm:$0xff]  }
 0x5e3   : > { %v3668_v9 = vadd.f32 %v4854_v27, %v3657_v54  ;;  %v3658_v11 = vmul.f32 %v5503_v6, %v4853_v63  ;;  %v3632_v12 = vpop.f32.mrb[11].mxu1  ;;  %v5867_v54 = vld [vmem:[%s6850_s5 + $0xb0] sm:$0xff]   ;;  %v5878_v6 = vld [vmem:[#allocation5 + $0x34] sm:$0xff]  }
 0x5e4   : > { %v3666_v38 = vadd.f32 %v4854_v27, %v3655_v5  ;;  %v3656_v13 = vmul.f32 %v4853_v63, %v3632_v12  ;;  %v5863_v63 = vld [vmem:[%s6850_s5 + $0x90] sm:$0xff]   ;;  %v5870_v5 = vld [vmem:[%s6850_s5 + $0xc0] sm:$0xff]  }
 0x5e5   : > { %vm3672_vm2 = vcmp.ge.f32.partialorder %v3668_v9, 0.0  ;;  %v3669_v14 = vadd.f32 %v4854_v27, %v3658_v11  ;;  %v3686_v59 = vmul.f32 %v3682_v7, %v3668_v9  ;;  %v5873_v11 = vld [vmem:[%s6850_s5 + $0xd8] sm:$0xff]   ;;  %v5874_v12 = vld [vmem:[%s6850_s5 + $0xe0] sm:$0xff]  }
 0x5e6   : > { %vm3670_vm1 = vcmp.ge.f32.partialorder %v3666_v38, 0.0  ;;  %v3667_v60 = vadd.f32 %v4854_v27, %v3656_v13  ;;  %v3684_v15 = vmul.f32 %v3682_v7, %v3666_v38  ;;  %v5866_v27 = vld [vmem:[%s6850_s5 + $0xa8] sm:$0xff]   ;;  %v5876_v13 = vld [vmem:[%s6850_s5 + $0xf0] sm:$0xff]  }
 0x5e7   : > { %vm3673_vm5 = vcmp.ge.f32.partialorder %v3669_v14, 0.0  ;;  %v3687_v16 = vmul.f32 %v3682_v7, %v3669_v14  ;;  %v3690_v19 = vsel %vm3672_vm2, %v3668_v9, %v3686_v59  ;;  %v5872_v9 = vld [vmem:[%s6850_s5 + $0xd0] sm:$0xff]   ;;  %v5879_v59 = vld [vmem:[#allocation5 + $0x3c] sm:$0xff]  }
 0x5e8   : > { %vm3671_vm8 = vcmp.ge.f32.partialorder %v3667_v60, 0.0  ;;  %v3685_v35 = vmul.f32 %v3682_v7, %v3667_v60  ;;  %v4964_v22 = vpack.c.bf16 %v3690_v19, %v3690_v19  ;;  %v3688_v23 = vsel %vm3670_vm1, %v3666_v38, %v3684_v15  ;;  %v5875_v38 = vld [vmem:[%s6850_s5 + $0xe8] sm:$0xff]  }
 0x5e9   : > { %v4962_v24 = vpack.c.bf16 %v3688_v23, %v3688_v23  ;;  %v3691_v25 = vsel %vm3673_vm5, %v3669_v14, %v3687_v16  ;;  %v5877_v14 = vld [vmem:[%s6850_s5 + $0xf8] sm:$0xff]  }
 0x5ea   : > { %3747 = vrot.lane.b32.xlu0 %v4964_v22, %s5888_s0  ;;  %3725 = vst.msk [vmem:[#allocation5 + $0x28] sm:$0xf] %vm2063_vm7, %v4964_v22  ;;  %v3689_v26 = vsel %vm3671_vm8, %v3667_v60, %v3685_v35  ;;  %v4965_v29 = vpack.c.bf16 %v3691_v25, %v3691_v25  ;;  %v4948_v60 = vld [vmem:[%s6859_s14] ss:$0 sm:$0xff] }
 0x5eb   : > { %3727 = vrot.lane.b32.xlu1 %v4962_v24, %s5890_s21  ;;  %3723 = vst.msk [vmem:[#allocation5 + $0x20] sm:$0xf] %vm2063_vm7, %v4962_v24  ;;  %v4963_v31 = vpack.c.bf16 %v3689_v26, %v3689_v26 }
 0x5ec   : > { %3726 = vst.msk [vmem:[#allocation5 + $0x2c] sm:$0xf] %vm2063_vm7, %v4965_v29 }
 0x5ed   : > { %3724 = vst.msk [vmem:[#allocation5 + $0x24] sm:$0xf] %vm2063_vm7, %v4963_v31  ;;  %vm4317_vm7 = vcmask 261120  }
 0x5ee   : > { %3743 = vrot.lane.b32.xlu0 %v4962_v24, %s5888_s0 }
 0x5ef   : > { %3759 = vrot.lane.b32.xlu1 %v4962_v24, %s5891_s22 }
 0x5f2   : > { %3761 = vrot.lane.b32.xlu0 %v4963_v31, %s5891_s22 }
 0x5f3   : > { %3729 = vrot.lane.b32.xlu1 %v4963_v31, %s5890_s21  ;;  %v5869_v7 = vld [vmem:[#allocation5 + $0x2c] sm:$0xff]  }
 0x5f6   : > { %3765 = vrot.lane.b32.xlu0 %v4965_v29, %s5891_s22 }
 0x5f7   : > { %3745 = vrot.lane.b32.xlu1 %v4963_v31, %s5888_s0 }
 0x5fa   : > { %3733 = vrot.lane.b32.xlu0 %v4965_v29, %s5890_s21 }
 0x5fb   : > { %3763 = vrot.lane.b32.xlu1 %v4964_v22, %s5891_s22 }
 0x5ff   : > { %3731 = vrot.lane.b32.xlu1 %v4964_v22, %s5890_s21 }
 0x603   : > { %3749 = vrot.lane.b32.xlu1 %v4965_v29, %s5888_s0 }
 0x65c   : > { %v3748_v37 = vpop.permute.xlu0 %3747 }
 0x65d   : > { %v3728_v39 = vpop.permute.xlu1 %3727 }
 0x65e   : > { %3739 = vst.msk [vmem:[#allocation5 + $0x1c] sm:$0xf] %vm2127_vm3, %v3728_v39 }
 0x660   : > { %v3744_v40 = vpop.permute.xlu0 %3743 }
 0x661   : > { %3755 = vst.msk [vmem:[#allocation5 + $0x18] sm:$0xf] %vm2166_vm4, %v3744_v40  ;;  %v3760_v41 = vpop.permute.xlu1 %3759 }
 0x662   : > { %3771 = vst.msk [vmem:[#allocation5 + $0x14] sm:$0xf] %vm2213_vm11, %v3760_v41 }
 0x664   : > { %v3762_v42 = vpop.permute.xlu0 %3761 }
 0x665   : > { %3772 = vst.msk [vmem:[#allocation5 + $0x18] sm:$0xf] %vm2213_vm11, %v3762_v42  ;;  %v3730_v43 = vpop.permute.xlu1 %3729 }
 0x666   : > { %3740 = vst.msk [vmem:[#allocation5 + $0x20] sm:$0xf] %vm2127_vm3, %v3730_v43 }
 0x667   : > { %3757 = vst.msk [vmem:[#allocation5 + $0x20] sm:$0xf] %vm2166_vm4, %v3748_v37 }
 0x668   : > { %v3766_v44 = vpop.permute.xlu0 %3765 }
 0x669   : > { %3774 = vst.msk [vmem:[#allocation5 + $0x20] sm:$0xf] %vm2213_vm11, %v3766_v44  ;;  %v3746_v45 = vpop.permute.xlu1 %3745 }
 0x66a   : > { %3756 = vst.msk [vmem:[#allocation5 + $0x1c] sm:$0xf] %vm2166_vm4, %v3746_v45 }
 0x66c   : > { %v3734_v46 = vpop.permute.xlu0 %3733  ;;  %v5847_v47 = vld [vmem:[#allocation5 + $0x14] sm:$0xff]  }
 0x66d   : > { %3742 = vst.msk [vmem:[#allocation5 + $0x28] sm:$0xf] %vm2127_vm3, %v3734_v46  ;;  %v3764_v48 = vpop.permute.xlu1 %3763  ;;  %5520 = vmatprep.mubr.bf16.mxu0 %v5847_v47 }
 0x66e   : > { %3773 = vst.msk [vmem:[#allocation5 + $0x1c] sm:$0xf] %vm2213_vm11, %v3764_v48 }
 0x671   : > { %v3732_v10 = vpop.permute.xlu1 %3731 }
 0x672   : > { %3741 = vst.msk [vmem:[#allocation5 + $0x24] sm:$0xf] %vm2127_vm3, %v3732_v10 }
 0x675   : > { %v3750_v50 = vpop.permute.xlu1 %3749  ;;  %v5850_v51 = vld [vmem:[#allocation5 + $0x1c] sm:$0xff]  }
 0x676   : > { %3758 = vst.msk [vmem:[#allocation5 + $0x24] sm:$0xf] %vm2166_vm4, %v3750_v50  ;;  %5521 = vmatmul.mubr.bf16.vlgmr.msra.gmra.mrb[4].mxu0 %v5850_v51 }
 0x677   : > { %5525 = vmatpush3.bf16.msra.mxu0 %v5849_v36  ;;  %5540 = vmatprep.mubr.bf16.mxu0 %v5858_v49 }
 0x678   : > { %5526 = vmatprep.subr.bf16.mxu0 %v5851_v20 }
 0x67b   : > { %5527 = vmatpush3.bf16.msra.mxu0 %v5851_v20 }
 0x67c   : > { %5528 = vmatprep.subr.bf16.mxu0 %v5852_v52 }
 0x67d   : > { %v5861_v62 = vld [vmem:[#allocation5 + $0x24] sm:$0xff]  }
 0x67f   : > { %5529 = vmatpush3.bf16.msra.mxu0 %v5852_v52 }
 0x680   : > { %5530 = vmatprep.subr.bf16.mxu0 %v5853_v53 }
 0x683   : > { %5531 = vmatpush3.bf16.msra.mxu0 %v5853_v53 }
 0x684   : > { %5532 = vmatprep.subr.bf16.mxu0 %v5854_v18 }
 0x687   : > { %5533 = vmatpush3.bf16.msra.mxu0 %v5854_v18 }
 0x688   : > { %5534 = vmatprep.subr.bf16.mxu0 %v5855_v17 }
 0x68b   : > { %5535 = vmatpush3.bf16.msra.mxu0 %v5855_v17 }
 0x68c   : > { %5536 = vmatprep.subr.bf16.mxu0 %v5856_v55 }
 0x68f   : > { %5537 = vmatpush3.bf16.msra.mxu0 %v5856_v55 }
 0x690   : > { %5538 = vmatprep.subr.bf16.mxu0 %v5857_v56 }
 0x693   : > { %5539 = vmatpush3.bf16.msra.mxu0 %v5857_v56 }
 0x694   : > { %5544 = vmatprep.subr.bf16.mxu0 %v5860_v33 }
 0x696   : > { %5541 = vmatmul.mubr.bf16.vlgmr.msra.gmra.mrb[4].mxu0 %v5859_v57 }
 0x697   : > { %5545 = vmatpush3.bf16.msra.mxu0 %v5860_v33  ;;  %5560 = vmatprep.mubr.bf16.mxu0 %v5861_v62 }
 0x698   : > { %5546 = vmatprep.subr.bf16.mxu0 %v5862_v58 }
 0x69b   : > { %5547 = vmatpush3.bf16.msra.mxu0 %v5862_v58 }
 0x69c   : > { %5548 = vmatprep.subr.bf16.mxu0 %v5863_v63 }
 0x69f   : > { %5549 = vmatpush3.bf16.msra.mxu0 %v5863_v63 }
 0x6a0   : > { %5550 = vmatprep.subr.bf16.mxu0 %v5864_v1 }
 0x6a3   : > { %5551 = vmatpush3.bf16.msra.mxu0 %v5864_v1 }
 0x6a4   : > { %5552 = vmatprep.subr.bf16.mxu0 %v5865_v2 }
 0x6a7   : > { %5553 = vmatpush3.bf16.msra.mxu0 %v5865_v2 }
 0x6a8   : > { %5554 = vmatprep.subr.bf16.mxu0 %v5866_v27 }
 0x6ab   : > { %5555 = vmatpush3.bf16.msra.mxu0 %v5866_v27 }
 0x6ac   : > { %5556 = vmatprep.subr.bf16.mxu0 %v5867_v54 }
 0x6af   : > { %5557 = vmatpush3.bf16.msra.mxu0 %v5867_v54 }
 0x6b0   : > { %5558 = vmatprep.subr.bf16.mxu0 %v5868_v3 }
 0x6b3   : > { %5559 = vmatpush3.bf16.msra.mxu0 %v5868_v3 }
 0x6b4   : > { %5564 = vmatprep.subr.bf16.mxu0 %v5870_v5 }
 0x6b6   : > { %5561 = vmatmul.mubr.bf16.vlgmr.msra.gmra.mrb[4].mxu0 %v5869_v7 }
 0x6b7   : > { %5565 = vmatpush3.bf16.msra.mxu0 %v5870_v5  ;;  %5580 = vmatprep.mubr.bf16.mxu0 %v5878_v6 }
 0x6b8   : > { %5566 = vmatprep.subr.bf16.mxu0 %v5871_v8 }
 0x6bb   : > { %5567 = vmatpush3.bf16.msra.mxu0 %v5871_v8 }
 0x6bc   : > { %5568 = vmatprep.subr.bf16.mxu0 %v5872_v9 }
 0x6bf   : > { %5569 = vmatpush3.bf16.msra.mxu0 %v5872_v9 }
 0x6c0   : > { %5570 = vmatprep.subr.bf16.mxu0 %v5873_v11 }
 0x6c3   : > { %5571 = vmatpush3.bf16.msra.mxu0 %v5873_v11 }
 0x6c4   : > { %5572 = vmatprep.subr.bf16.mxu0 %v5874_v12 }
 0x6c7   : > { %5573 = vmatpush3.bf16.msra.mxu0 %v5874_v12 }
 0x6c8   : > { %5574 = vmatprep.subr.bf16.mxu0 %v5875_v38 }
 0x6cb   : > { %5575 = vmatpush3.bf16.msra.mxu0 %v5875_v38 }
 0x6cc   : > { %5576 = vmatprep.subr.bf16.mxu0 %v5876_v13 }
 0x6cf   : > { %5577 = vmatpush3.bf16.msra.mxu0 %v5876_v13 }
 0x6d0   : > { %5578 = vmatprep.subr.bf16.mxu0 %v5877_v14 }
 0x6d3   : > { %5579 = vmatpush3.bf16.msra.mxu0 %v5877_v14 }
 0x6d6   : > { %5581 = vmatmul.mubr.bf16.vlgmr.msra.gmra.mrb[4].mxu0 %v5879_v59 }
 0x7a9   : > { %v5582_v15 = vpop.f32.mrb[4].mxu0 }
 0x7aa   : > { %v4311_v16 = vadd.f32 %v5582_v15, %v4948_v60  ;;  %v4283_v19 = vpop.f32.mrb[5].mxu0 }
 0x7ab   : > { %v4309_v21 = vadd.f32 %v4948_v60, %v4283_v19  ;;  %v5583_v35 = vpop.f32.mrb[6].mxu0 }
 0x7ac   : > { %v4315_v22 = vadd.f32 %v4311_v16, %v6544_v61  ;;  %v4312_v23 = vadd.f32 %v5583_v35, %v4948_v60  ;;  %v4286_v24 = vpop.f32.mrb[7].mxu0 }
 0x7ad   : > { %v4313_v25 = vadd.f32 %v4309_v21, %v6546_v0  ;;  %v4310_v26 = vadd.f32 %v4948_v60, %v4286_v24 }
 0x7ae   : > { %4320 = vst.msk [vmem:[%s685_s28 + $0x10] sm:$0xff] %vm4317_vm7, %v4315_v22  ;;  %v4316_v29 = vadd.f32 %v4312_v23, %v6552_v28 }
 0x7af   : > { %4318 = vst.msk [vmem:[%s685_s28] sm:$0xff] %vm4317_vm7, %v4313_v25  ;;  %v4314_v30 = vadd.f32 %v4310_v26, %v6555_v4 }
 0x7b0   : > { %4321 = vst.msk [vmem:[%s685_s28 + $0x18] sm:$0xff] %vm4317_vm7, %v4316_v29 }
 0x7b1   : > { %4319 = vst.msk [vmem:[%s685_s28 + $0x8] sm:$0xff] %vm4317_vm7, %v4314_v30 }
 0x7b2 PF: > { %s34_s1 = sadd.s32 1, %s5886_s1  }
 0x7b3   : > { %p31_p4 = scmp.ge.s32.totalorder %s34_s1, 4  }
 0x7b5   :  { %33 = sbr.rel (!%p31_p4) target bundleno = 4 (0x4), region = 159 }

</bundles_post_ra>
